<compile_context>
chip_gen: v6e
topology: v6e:2x2x1
jax: 0.10.0
libtpu: 0.0.40
codegen_flags: <defaults>
</compile_context>

<pallas_src>
import math
import functools

import jax
import jax.numpy as jnp
from jax.experimental import pallas as pl
from jax.experimental.pallas import tpu as pltpu


VMEM_LIMIT_BYTES = 32 * 1024 * 1024  # explicit scoped-VMEM budget (v7x-safe)


# ----------------------------- small helpers -------------------------------

def _round_up(x, m):
    return (x + m - 1) // m * m


def _pick_row_tile(mp):
    """Exact divisor of the (8-padded) row count; >=2 tiles when possible so the
    'parallel' grid axis can be megacore-sharded on v7x; tiles capped at 256."""
    for tm in (256, 128, 64, 32, 16, 8):
        if tm < mp and mp % tm == 0:
            return tm
    return mp


def _channel_sums(x):
    """Per-channel sum and sum-of-squares of an (..., C) tensor (f32)."""
    xf = x.astype(jnp.float32)
    axes = tuple(range(x.ndim - 1))
    return jnp.sum(xf, axis=axes), jnp.sum(xf * xf, axis=axes)


def _bn_scale_bias(gamma, beta, c_sum, c_sumsq, count, eps=1e-5):
    """Training-mode BatchNorm2d folded to per-channel (scale, bias) from carried
    per-channel sums (biased variance, matching PyTorch's normalization)."""
    mean = c_sum / count
    var = jnp.maximum(c_sumsq / count - mean * mean, 0.0)
    scale = gamma * jax.lax.rsqrt(var + eps)
    bias = beta - mean * scale
    return scale, bias


# ----------------------------- Pallas kernels ------------------------------

def _matmul_kernel(*refs, taps, n_act):
    """Fused MXU matmul.

    Plain mode (n_act == 0):
        refs = (a, b, cbias, out);  a block (taps, tm, K), b block (taps, K, N).
        out = sum_t a[t] @ b[t] + cbias   (taps = conv taps; 9 for a 3x3 conv).
    Prologue mode (n_act >= 1):
        refs = (scale, kbias, a_0..a_{n-1}, b, cbias, out); each a_i (1, tm, K).
        out = (mean_i relu(a_i*scale + kbias)) @ b[0] + cbias
        n_act == 1: fused BatchNorm-affine + ReLU (bottleneck 1x1 conv).
        n_act == 4: additionally fuses the transition layer's 2x2 average pool
                    (average pool and 1x1 conv commute).
    Accumulation is f32; operands bf16 on the MXU.
    """
    if n_act:
        s_ref, kb_ref = refs[0], refs[1]
        a_refs = refs[2:2 + n_act]
        b_ref, cb_ref, o_ref = refs[2 + n_act:]
        pooled = jnp.zeros(a_refs[0].shape[1:], jnp.float32)
        for a_ref in a_refs:
            pooled = pooled + jnp.maximum(
                a_ref[0].astype(jnp.float32) * s_ref[...] + kb_ref[...], 0.0)
        a_eff = (pooled * (1.0 / n_act)).astype(jnp.bfloat16)
        acc = jnp.dot(a_eff, b_ref[0], preferred_element_type=jnp.float32)
    else:
        a_ref, b_ref, cb_ref, o_ref = refs
        acc = jnp.zeros(o_ref.shape, jnp.float32)
        for t in range(taps):
            acc = acc + jnp.dot(a_ref[t], b_ref[t],
                                preferred_element_type=jnp.float32)
    o_ref[...] = (acc + cb_ref[...]).astype(o_ref.dtype)


def _window_max_kernel(x_ref, o_ref):
    # max over the leading (pooling-window) axis of a (K, tm, C) block.
    o_ref[...] = jnp.max(x_ref[...].astype(jnp.float32), axis=0).astype(o_ref.dtype)


def _gap_kernel(x_ref, o_ref):
    # global average pool: mean over the flattened-spatial axis of (N, HW, C).
    o_ref[...] = jnp.mean(x_ref[...].astype(jnp.float32), axis=1)


# --------------------------- Pallas call wrappers ---------------------------

def fused_matmul(a, b, cbias, *, act_scale=None, act_bias=None,
                 out_dtype=jnp.bfloat16):
    """out = sum_t a[t] @ b[t] + cbias, tiled over rows only.

    a: (R, M, K) tap stack (plain mode), or a list of (M, K) slabs when
       act_scale/act_bias are given (fused BN-affine+ReLU[+avg-pool] prologue).
    b: (R, K, N) per-tap weights.  K and N are full-dim blocks (never padded).
    """
    apply_act = act_scale is not None
    if apply_act:
        slabs = list(a)
        n_act = len(slabs)
        M, K = slabs[0].shape
        R = 1
    else:
        slabs = None
        n_act = 0
        R, M, K = a.shape
    Rb, Kb, Nout = b.shape
    assert Rb == R and Kb == K

    Mp = _round_up(M, 8)
    tm = _pick_row_tile(Mp)
    nm = Mp // tm

    b_arg = b.astype(jnp.bfloat16)
    cb_arg = cbias.astype(jnp.float32).reshape(1, Nout)

    a_spec = pl.BlockSpec((R, tm, K), lambda i: (0, i, 0))
    b_spec = pl.BlockSpec((R, K, Nout), lambda i: (0, 0, 0))
    v_spec = pl.BlockSpec((1, Nout), lambda i: (0, 0))
    k_spec = pl.BlockSpec((1, K), lambda i: (0, 0))
    out_spec = pl.BlockSpec((tm, Nout), lambda i: (i, 0))

    if apply_act:
        a_args = [jnp.pad(s.astype(jnp.bfloat16),
                          ((0, Mp - M), (0, 0))).reshape(1, Mp, K)
                  for s in slabs]
        args = ([act_scale.astype(jnp.float32).reshape(1, K),
                 act_bias.astype(jnp.float32).reshape(1, K)]
                + a_args + [b_arg, cb_arg])
        in_specs = [k_spec, k_spec] + [a_spec] * n_act + [b_spec, v_spec]
    else:
        a_arg = jnp.pad(a.astype(jnp.bfloat16), ((0, 0), (0, Mp - M), (0, 0)))
        args = [a_arg, b_arg, cb_arg]
        in_specs = [a_spec, b_spec, v_spec]

    out = pl.pallas_call(
        functools.partial(_matmul_kernel, taps=R, n_act=n_act),
        out_shape=jax.ShapeDtypeStruct((Mp, Nout), out_dtype),
        grid=(nm,),
        in_specs=in_specs,
        out_specs=out_spec,
        compiler_params=pltpu.CompilerParams(
            dimension_semantics=("parallel",),
            vmem_limit_bytes=VMEM_LIMIT_BYTES,
        ),
    )(*args)
    return out[:M]


def pallas_window_max(stacked):
    """Max over the leading axis of (K, M, C) -> (M, C), tiled over M."""
    K, M, C = stacked.shape
    Mp = _round_up(M, 8)
    tm = _pick_row_tile(Mp)
    x_p = jnp.pad(stacked, ((0, 0), (0, Mp - M), (0, 0)))
    out = pl.pallas_call(
        _window_max_kernel,
        out_shape=jax.ShapeDtypeStruct((Mp, C), stacked.dtype),
        grid=(Mp // tm,),
        in_specs=[pl.BlockSpec((K, tm, C), lambda i: (0, i, 0))],
        out_specs=pl.BlockSpec((tm, C), lambda i: (i, 0)),
        compiler_params=pltpu.CompilerParams(
            dimension_semantics=("parallel",),
            vmem_limit_bytes=VMEM_LIMIT_BYTES,
        ),
    )(x_p)
    return out[:M]


def global_avg_pool(x):
    """AdaptiveAvgPool2d((1,1)) + flatten, NHWC -> (N, C) f32."""
    N, H, W, C = x.shape
    xs = x.reshape(N, H * W, C)
    return pl.pallas_call(
        _gap_kernel,
        out_shape=jax.ShapeDtypeStruct((N, C), jnp.float32),
        grid=(1,),
        in_specs=[pl.BlockSpec((N, H * W, C), lambda i: (0, 0, 0))],
        out_specs=pl.BlockSpec((N, C), lambda i: (0, 0)),
        compiler_params=pltpu.CompilerParams(
            vmem_limit_bytes=VMEM_LIMIT_BYTES,
        ),
    )(xs)


# ------------------------------ layer building ------------------------------

def im2col(x, kh, kw, stride, pad):
    """NHWC -> (N*Ho*Wo, kh*kw*C) patches, feature order (ki, kj, c).
    Used only for the single 7x7 stem conv (K=147 as one un-tiled reduction)."""
    N, H, W, C = x.shape
    Ho = (H + 2 * pad - kh) // stride + 1
    Wo = (W + 2 * pad - kw) // stride + 1
    xp = jnp.pad(x, ((0, 0), (pad, pad), (pad, pad), (0, 0)))
    cols = [xp[:, i:i + stride * (Ho - 1) + 1:stride,
               j:j + stride * (Wo - 1) + 1:stride, :]
            for i in range(kh) for j in range(kw)]
    patches = jnp.concatenate(cols, axis=-1)
    return patches.reshape(N * Ho * Wo, kh * kw * C), (N, Ho, Wo)


def conv7x7_s2_p3(x, w_taps, cbias):
    """Stem conv: 7x7 stride-2 pad-3 via im2col + single MXU matmul."""
    cols, (N, Ho, Wo) = im2col(x.astype(jnp.bfloat16), 7, 7, stride=2, pad=3)
    Cout = w_taps.shape[-1]
    w2 = w_taps.reshape(1, w_taps.shape[0] * w_taps.shape[1], Cout)
    y = fused_matmul(cols.reshape(1, *cols.shape), w2, cbias)
    return y.reshape(N, Ho, Wo, Cout)


def conv3x3_tapsum(x, scale, bias, w_taps, cbias):
    """relu(BN(x)) -> 3x3 s1 p1 conv.

    The BN-affine + ReLU must run BEFORE the spatial zero-padding, so it cannot
    ride in the matmul prologue; it is left to XLA, which fuses it into the nine
    shifted-window copies (the activation itself never round-trips HBM).  The
    matmul kernel then reduces over the 9 taps in-kernel (K per tap = Cin,
    no K padding; N = growth kept un-padded -> bf16 (M, 8) output)."""
    N, H, W, C = x.shape
    Cout = w_taps.shape[-1]
    act = jnp.maximum(x.astype(jnp.float32) * scale + bias, 0.0).astype(jnp.bfloat16)
    ap = jnp.pad(act, ((0, 0), (1, 1), (1, 1), (0, 0)))
    taps = [ap[:, di:di + H, dj:dj + W, :] for di in range(3) for dj in range(3)]
    stack = jnp.stack(taps, axis=0).reshape(9, N * H * W, C)
    y = fused_matmul(stack, w_taps, cbias)
    return y.reshape(N, H, W, Cout)


def maxpool_3x3_s2_p1(x):
    N, H, W, C = x.shape
    Ho = (H + 2 - 3) // 2 + 1
    Wo = (W + 2 - 3) // 2 + 1
    xp = jnp.pad(x, ((0, 0), (1, 1), (1, 1), (0, 0)), constant_values=-jnp.inf)
    slabs = [xp[:, i:i + 2 * (Ho - 1) + 1:2, j:j + 2 * (Wo - 1) + 1:2, :]
             for i in range(3) for j in range(3)]
    stacked = jnp.stack(slabs, axis=0).reshape(9, N * Ho * Wo, C)
    out = pallas_window_max(stacked)
    return out.reshape(N, Ho, Wo, C)


def dense_layer(x, sums, sumsqs, p):
    """Single / Bottleneck dense layer.  Returns (concat, carried BN sums)."""
    N, H, W, C = x.shape
    count = N * H * W
    if "bn1" in p:  # BottleneckLayer: BN1->ReLU->1x1 (fused prologue) -> BN2->ReLU->3x3
        g1, b1 = p["bn1"]
        s1, a1 = _bn_scale_bias(g1, b1, sums, sumsqs, count)
        w1, cb1 = p["bott"]
        inner = w1.shape[-1]
        mid = fused_matmul([x.reshape(count, C)], w1, cb1,
                           act_scale=s1, act_bias=a1).reshape(N, H, W, inner)
        g2, b2 = p["bn2"]
        msum, msq = _channel_sums(mid)
        s2, a2 = _bn_scale_bias(g2, b2, msum, msq, count)
        w2, cb2 = p["conv"]
        out = conv3x3_tapsum(mid, s2, a2, w2, cb2)
    else:           # SingleDenseLayer: BN->ReLU->3x3
        g, b = p["bn"]
        s, a = _bn_scale_bias(g, b, sums, sumsqs, count)
        w, cb = p["conv"]
        out = conv3x3_tapsum(x, s, a, w, cb)
    osum, osq = _channel_sums(out)
    # torch.cat([out, x], axis=1) == channel (last-axis) concat in NHWC.
    # TODO(synk): aliased channel-growing buffer needs a channel-major layout so
    #             the 8 new channels form an (8, M) row slice a BlockSpec can hit.
    x_new = jnp.concatenate([out, x], axis=-1)
    return (x_new,
            jnp.concatenate([osum, sums]),
            jnp.concatenate([osq, sumsqs]))


def transition_layer(x, sums, sumsqs, p):
    """BN->ReLU->1x1 conv->AvgPool2d(2,2), fused into ONE matmul call.

    AvgPool commutes with the (spatially pointwise, linear) 1x1 conv, so the
    kernel prologue averages relu(bn(.)) over the four 2x2 window slabs and the
    conv runs on the pooled (4x smaller) rows."""
    N, H, W, C = x.shape
    gamma, beta = p["bn"]
    scale, bias = _bn_scale_bias(gamma, beta, sums, sumsqs, N * H * W)
    w, cb = p["conv"]
    Cout = w.shape[-1]
    Ho, Wo = H // 2, W // 2
    xe = x[:, :2 * Ho, :2 * Wo, :]          # AvgPool2d floor behavior
    slabs = [xe[:, i::2, j::2, :].reshape(N * Ho * Wo, C)
             for i in range(2) for j in range(2)]
    y = fused_matmul(slabs, w, cb, act_scale=scale, act_bias=bias)
    y = y.reshape(N, Ho, Wo, Cout)
    new_sum, new_sumsq = _channel_sums(y)
    return y, new_sum, new_sumsq


# ------------------------------ parameter init ------------------------------

def _conv_params(key, out_c, in_c, kh, kw):
    """Weights stored pre-transposed as a (kh*kw, in_c, out_c) bf16 tap stack."""
    k_w, k_b = jax.random.split(key)
    fan_in = in_c * kh * kw
    std = (2.0 / fan_in) ** 0.5
    w = jax.random.normal(k_w, (out_c, in_c, kh, kw), jnp.float32) * std
    b = jax.random.normal(k_b, (out_c,), jnp.float32) * 0.01
    w_taps = jnp.transpose(w, (2, 3, 1, 0)).reshape(kh * kw, in_c, out_c)
    return w_taps.astype(jnp.bfloat16), b


def init_densenet_params(key, growth=8, blocks=(1, 1, 1, 1), num_classes=10,
                         bottleneck=False, reduction=False):
    theta = 0.5 if reduction else 1.0
    keys = list(jax.random.split(key, 256))
    ki = iter(keys)
    params = {}
    params["conv1"] = _conv_params(next(ki), 2 * growth, 3, 7, 7)
    c = 2 * growth
    dense_blocks, transitions = [], []
    for bi, n_layers in enumerate(blocks):
        layers = []
        for _ in range(n_layers):
            if bottleneck:
                inner = 4 * growth
                layers.append(dict(
                    bn1=(jnp.ones(c, jnp.float32), jnp.zeros(c, jnp.float32)),
                    bott=_conv_params(next(ki), inner, c, 1, 1),
                    bn2=(jnp.ones(inner, jnp.float32), jnp.zeros(inner, jnp.float32)),
                    conv=_conv_params(next(ki), growth, inner, 3, 3),
                ))
            else:
                layers.append(dict(
                    bn=(jnp.ones(c, jnp.float32), jnp.zeros(c, jnp.float32)),
                    conv=_conv_params(next(ki), growth, c, 3, 3),
                ))
            c += growth
        dense_blocks.append(layers)
        if bi < len(blocks) - 1:
            out_c = int(math.floor(theta * c))
            transitions.append(dict(
                bn=(jnp.ones(c, jnp.float32), jnp.zeros(c, jnp.float32)),
                conv=_conv_params(next(ki), out_c, c, 1, 1),
            ))
            c = out_c
    params["blocks"] = dense_blocks
    params["transitions"] = transitions
    kfw, kfb = jax.random.split(next(ki))
    fc_w = (jax.random.normal(kfw, (num_classes, c), jnp.float32)
            * (1.0 / c) ** 0.5).T.reshape(1, c, num_classes)
    params["fc"] = (fc_w.astype(jnp.bfloat16),
                    jax.random.normal(kfb, (num_classes,), jnp.float32) * 0.01)
    return params


# -------------------------------- forward -----------------------------------

def densenet_forward(params, x_nchw):
    # NCHW -> NHWC
    x = jnp.transpose(x_nchw.astype(jnp.float32), (0, 2, 3, 1))
    w, b = params["conv1"]
    x = conv7x7_s2_p3(x, w, b)                    # 7x7 s2 p3 stem conv (bf16)
    x = maxpool_3x3_s2_p1(x)                      # 3x3 s2 p1 max pool
    sums, sumsqs = _channel_sums(x)               # carried BN statistics
    n_blocks = len(params["blocks"])
    for bi in range(n_blocks):
        for layer in params["blocks"][bi]:
            x, sums, sumsqs = dense_layer(x, sums, sumsqs, layer)
        if bi < n_blocks - 1:
            x, sums, sumsqs = transition_layer(x, sums, sumsqs,
                                               params["transitions"][bi])
    feat = global_avg_pool(x)                     # AdaptiveAvgPool2d((1,1)) + flatten
    fw, fb = params["fc"]
    N, C = feat.shape
    return fused_matmul(feat.reshape(1, N, C), fw, fb, out_dtype=jnp.float32)


# --------------------------------- main --------------------------------------

if __name__ == "__main__":
    key = jax.random.PRNGKey(0)
    kx, kp = jax.random.split(key)
    # Small config: input 2x3x32x32, growth_rate=8, blocks=[1,1,1,1], 10 classes.
    x = jax.random.normal(kx, (2, 3, 32, 32), jnp.float32)
    params = init_densenet_params(kp, growth=8, blocks=(1, 1, 1, 1),
                                  num_classes=10, bottleneck=False, reduction=False)
    fwd = jax.jit(densenet_forward)
    out = jax.block_until_ready(fwd(params, x))
    assert out.shape == (2, 10), out.shape
    assert bool(jnp.all(jnp.isfinite(out)))
    print("KERNEL_OK")
</pallas_src>

<mosaic_0001>
module attributes {stable_mosaic.version = 11 : i64} {
  func.func @_matmul_kernel(%arg0: i32, %arg1: memref<1x256x147xbf16, #tpu.memory_space<vmem>>, %arg2: memref<1x147x16xbf16, #tpu.memory_space<vmem>>, %arg3: memref<1x16xf32, #tpu.memory_space<vmem>>, %arg4: memref<256x16xbf16, #tpu.memory_space<vmem>>) attributes {dimension_semantics = [#tpu.dimension_semantics<parallel>], iteration_bounds = array<i64: 2>, scalar_prefetch = 0 : i64, scratch_operands = 0 : i64, tpu.core_type = #tpu.core_type<tc>, window_params = [{transform_indices = @transform_0, window_bounds = array<i64: 1, 256, 147>}, {pipeline_mode = #tpu.pipeline_mode<synchronous>, transform_indices = @transform_1, window_bounds = array<i64: 1, 147, 16>}, {pipeline_mode = #tpu.pipeline_mode<synchronous>, transform_indices = @transform_2, window_bounds = array<i64: 1, 16>}, {transform_indices = @transform_3, window_bounds = array<i64: 256, 16>}]} {
    %cst = arith.constant 0.000000e+00 : f32
    %0 = vector.broadcast %cst : f32 to vector<256x16xf32>
    %c0 = arith.constant 0 : index
    %c0_0 = arith.constant 0 : index
    %c0_1 = arith.constant 0 : index
    %1 = vector.load %arg1[%c0, %c0_0, %c0_1] : memref<1x256x147xbf16, #tpu.memory_space<vmem>>, vector<1x256x147xbf16>
    %2 = vector.shape_cast %1 : vector<1x256x147xbf16> to vector<256x147xbf16>
    %c0_2 = arith.constant 0 : index
    %c0_3 = arith.constant 0 : index
    %c0_4 = arith.constant 0 : index
    %3 = vector.load %arg2[%c0_2, %c0_3, %c0_4] : memref<1x147x16xbf16, #tpu.memory_space<vmem>>, vector<1x147x16xbf16>
    %4 = vector.shape_cast %3 : vector<1x147x16xbf16> to vector<147x16xbf16>
    %cst_5 = arith.constant dense<0.000000e+00> : vector<256x16xf32>
    %5 = tpu.matmul %2, %4, %cst_5 {dimension_numbers = #tpu.dot_dimension_numbers<[1], [0], [0], [1], [0, 0, 1, 1], [], []>} : vector<256x147xbf16>, vector<147x16xbf16>, vector<256x16xf32> -> vector<256x16xf32>
    %6 = arith.addf %0, %5 : vector<256x16xf32>
    %c0_6 = arith.constant 0 : index
    %c0_7 = arith.constant 0 : index
    %7 = vector.load %arg3[%c0_6, %c0_7] : memref<1x16xf32, #tpu.memory_space<vmem>>, vector<1x16xf32>
    %8 = vector.broadcast %7 : vector<1x16xf32> to vector<256x16xf32>
    %9 = arith.addf %6, %8 : vector<256x16xf32>
    %10 = arith.truncf %9 : vector<256x16xf32> to vector<256x16xbf16>
    %c0_8 = arith.constant 0 : index
    %c0_9 = arith.constant 0 : index
    %11 = vector.load %arg4[%c0_8, %c0_9] : memref<256x16xbf16, #tpu.memory_space<vmem>>, vector<256x16xbf16>
    tpu.vector_store %arg4[%c0_8, %c0_9], %10 {strides = array<i32>} : memref<256x16xbf16, #tpu.memory_space<vmem>>, vector<256x16xbf16>,
    return
  }
  func.func @transform_0(%arg0: i32) -> (i32, i32, i32) {
    %c0_i32 = arith.constant 0 : i32
    %c0_i32_0 = arith.constant 0 : i32
    %c0_i32_1 = arith.constant 0 : i32
    return %c0_i32, %arg0, %c0_i32_0 : i32, i32, i32
  }
  func.func @transform_1(%arg0: i32) -> (i32, i32, i32) {
    %c0_i32 = arith.constant 0 : i32
    %c0_i32_0 = arith.constant 0 : i32
    %c0_i32_1 = arith.constant 0 : i32
    %c0_i32_2 = arith.constant 0 : i32
    return %c0_i32, %c0_i32_0, %c0_i32_1 : i32, i32, i32
  }
  func.func @transform_2(%arg0: i32) -> (i32, i32) {
    %c0_i32 = arith.constant 0 : i32
    %c0_i32_0 = arith.constant 0 : i32
    %c0_i32_1 = arith.constant 0 : i32
    return %c0_i32, %c0_i32_0 : i32, i32
  }
  func.func @transform_3(%arg0: i32) -> (i32, i32) {
    %c0_i32 = arith.constant 0 : i32
    %c0_i32_0 = arith.constant 0 : i32
    return %arg0, %c0_i32 : i32, i32
  }
}

module attributes {stable_mosaic.version = 11 : i64} {
  func.func @_window_max_kernel(%arg0: i32, %arg1: memref<9x64x16xbf16, #tpu.memory_space<vmem>>, %arg2: memref<64x16xbf16, #tpu.memory_space<vmem>>) attributes {dimension_semantics = [#tpu.dimension_semantics<parallel>], iteration_bounds = array<i64: 2>, scalar_prefetch = 0 : i64, scratch_operands = 0 : i64, tpu.core_type = #tpu.core_type<tc>, window_params = [{transform_indices = @transform_0, window_bounds = array<i64: 9, 64, 16>}, {transform_indices = @transform_1, window_bounds = array<i64: 64, 16>}]} {
    %c0 = arith.constant 0 : index
    %c0_0 = arith.constant 0 : index
    %c0_1 = arith.constant 0 : index
    %0 = vector.load %arg1[%c0, %c0_0, %c0_1] : memref<9x64x16xbf16, #tpu.memory_space<vmem>>, vector<9x64x16xbf16>
    %1 = arith.extf %0 : vector<9x64x16xbf16> to vector<9x64x16xf32>
    %cst = arith.constant dense<0xFF800000> : vector<64x16xf32>
    %2 = vector.multi_reduction <maximumf>, %1, %cst [0] : vector<9x64x16xf32> to vector<64x16xf32>
    %3 = arith.truncf %2 : vector<64x16xf32> to vector<64x16xbf16>
    %c0_2 = arith.constant 0 : index
    %c0_3 = arith.constant 0 : index
    %4 = vector.load %arg2[%c0_2, %c0_3] : memref<64x16xbf16, #tpu.memory_space<vmem>>, vector<64x16xbf16>
    tpu.vector_store %arg2[%c0_2, %c0_3], %3 {strides = array<i32>} : memref<64x16xbf16, #tpu.memory_space<vmem>>, vector<64x16xbf16>,
    return
  }
  func.func @transform_0(%arg0: i32) -> (i32, i32, i32) {
    %c0_i32 = arith.constant 0 : i32
    %c0_i32_0 = arith.constant 0 : i32
    %c0_i32_1 = arith.constant 0 : i32
    return %c0_i32, %arg0, %c0_i32_0 : i32, i32, i32
  }
  func.func @transform_1(%arg0: i32) -> (i32, i32) {
    %c0_i32 = arith.constant 0 : i32
    %c0_i32_0 = arith.constant 0 : i32
    return %arg0, %c0_i32 : i32, i32
  }
}

module attributes {stable_mosaic.version = 11 : i64} {
  func.func @_matmul_kernel(%arg0: i32, %arg1: memref<9x64x16xbf16, #tpu.memory_space<vmem>>, %arg2: memref<9x16x8xbf16, #tpu.memory_space<vmem>>, %arg3: memref<1x8xf32, #tpu.memory_space<vmem>>, %arg4: memref<64x8xbf16, #tpu.memory_space<vmem>>) attributes {dimension_semantics = [#tpu.dimension_semantics<parallel>], iteration_bounds = array<i64: 2>, scalar_prefetch = 0 : i64, scratch_operands = 0 : i64, tpu.core_type = #tpu.core_type<tc>, window_params = [{transform_indices = @transform_0, window_bounds = array<i64: 9, 64, 16>}, {pipeline_mode = #tpu.pipeline_mode<synchronous>, transform_indices = @transform_1, window_bounds = array<i64: 9, 16, 8>}, {pipeline_mode = #tpu.pipeline_mode<synchronous>, transform_indices = @transform_2, window_bounds = array<i64: 1, 8>}, {transform_indices = @transform_3, window_bounds = array<i64: 64, 8>}]} {
    %cst = arith.constant 0.000000e+00 : f32
    %0 = vector.broadcast %cst : f32 to vector<64x8xf32>
    %c0 = arith.constant 0 : index
    %c0_0 = arith.constant 0 : index
    %c0_1 = arith.constant 0 : index
    %1 = vector.load %arg1[%c0, %c0_0, %c0_1] : memref<9x64x16xbf16, #tpu.memory_space<vmem>>, vector<1x64x16xbf16>
    %2 = vector.shape_cast %1 : vector<1x64x16xbf16> to vector<64x16xbf16>
    %c0_2 = arith.constant 0 : index
    %c0_3 = arith.constant 0 : index
    %c0_4 = arith.constant 0 : index
    %3 = vector.load %arg2[%c0_2, %c0_3, %c0_4] : memref<9x16x8xbf16, #tpu.memory_space<vmem>>, vector<1x16x8xbf16>
    %4 = vector.shape_cast %3 : vector<1x16x8xbf16> to vector<16x8xbf16>
    %cst_5 = arith.constant dense<0.000000e+00> : vector<64x8xf32>
    %5 = tpu.matmul %2, %4, %cst_5 {dimension_numbers = #tpu.dot_dimension_numbers<[1], [0], [0], [1], [0, 0, 1, 1], [], []>} : vector<64x16xbf16>, vector<16x8xbf16>, vector<64x8xf32> -> vector<64x8xf32>
    %6 = arith.addf %0, %5 : vector<64x8xf32>
    %c1 = arith.constant 1 : index
    %c0_6 = arith.constant 0 : index
    %c0_7 = arith.constant 0 : index
    %7 = vector.load %arg1[%c1, %c0_6, %c0_7] : memref<9x64x16xbf16, #tpu.memory_space<vmem>>, vector<1x64x16xbf16>
    %8 = vector.shape_cast %7 : vector<1x64x16xbf16> to vector<64x16xbf16>
    %c1_8 = arith.constant 1 : index
    %c0_9 = arith.constant 0 : index
    %c0_10 = arith.constant 0 : index
    %9 = vector.load %arg2[%c1_8, %c0_9, %c0_10] : memref<9x16x8xbf16, #tpu.memory_space<vmem>>, vector<1x16x8xbf16>
    %10 = vector.shape_cast %9 : vector<1x16x8xbf16> to vector<16x8xbf16>
    %cst_11 = arith.constant dense<0.000000e+00> : vector<64x8xf32>
    %11 = tpu.matmul %8, %10, %cst_11 {dimension_numbers = #tpu.dot_dimension_numbers<[1], [0], [0], [1], [0, 0, 1, 1], [], []>} : vector<64x16xbf16>, vector<16x8xbf16>, vector<64x8xf32> -> vector<64x8xf32>
    %12 = arith.addf %6, %11 : vector<64x8xf32>
    %c2 = arith.constant 2 : index
    %c0_12 = arith.constant 0 : index
    %c0_13 = arith.constant 0 : index
    %13 = vector.load %arg1[%c2, %c0_12, %c0_13] : memref<9x64x16xbf16, #tpu.memory_space<vmem>>, vector<1x64x16xbf16>
    %14 = vector.shape_cast %13 : vector<1x64x16xbf16> to vector<64x16xbf16>
    %c2_14 = arith.constant 2 : index
    %c0_15 = arith.constant 0 : index
    %c0_16 = arith.constant 0 : index
    %15 = vector.load %arg2[%c2_14, %c0_15, %c0_16] : memref<9x16x8xbf16, #tpu.memory_space<vmem>>, vector<1x16x8xbf16>
    %16 = vector.shape_cast %15 : vector<1x16x8xbf16> to vector<16x8xbf16>
    %cst_17 = arith.constant dense<0.000000e+00> : vector<64x8xf32>
    %17 = tpu.matmul %14, %16, %cst_17 {dimension_numbers = #tpu.dot_dimension_numbers<[1], [0], [0], [1], [0, 0, 1, 1], [], []>} : vector<64x16xbf16>, vector<16x8xbf16>, vector<64x8xf32> -> vector<64x8xf32>
    %18 = arith.addf %12, %17 : vector<64x8xf32>
    %c3 = arith.constant 3 : index
    %c0_18 = arith.constant 0 : index
    %c0_19 = arith.constant 0 : index
    %19 = vector.load %arg1[%c3, %c0_18, %c0_19] : memref<9x64x16xbf16, #tpu.memory_space<vmem>>, vector<1x64x16xbf16>
    %20 = vector.shape_cast %19 : vector<1x64x16xbf16> to vector<64x16xbf16>
    %c3_20 = arith.constant 3 : index
    %c0_21 = arith.constant 0 : index
    %c0_22 = arith.constant 0 : index
    %21 = vector.load %arg2[%c3_20, %c0_21, %c0_22] : memref<9x16x8xbf16, #tpu.memory_space<vmem>>, vector<1x16x8xbf16>
    %22 = vector.shape_cast %21 : vector<1x16x8xbf16> to vector<16x8xbf16>
    %cst_23 = arith.constant dense<0.000000e+00> : vector<64x8xf32>
    %23 = tpu.matmul %20, %22, %cst_23 {dimension_numbers = #tpu.dot_dimension_numbers<[1], [0], [0], [1], [0, 0, 1, 1], [], []>} : vector<64x16xbf16>, vector<16x8xbf16>, vector<64x8xf32> -> vector<64x8xf32>
    %24 = arith.addf %18, %23 : vector<64x8xf32>
    %c4 = arith.constant 4 : index
    %c0_24 = arith.constant 0 : index
    %c0_25 = arith.constant 0 : index
    %25 = vector.load %arg1[%c4, %c0_24, %c0_25] : memref<9x64x16xbf16, #tpu.memory_space<vmem>>, vector<1x64x16xbf16>
    %26 = vector.shape_cast %25 : vector<1x64x16xbf16> to vector<64x16xbf16>
    %c4_26 = arith.constant 4 : index
    %c0_27 = arith.constant 0 : index
    %c0_28 = arith.constant 0 : index
    %27 = vector.load %arg2[%c4_26, %c0_27, %c0_28] : memref<9x16x8xbf16, #tpu.memory_space<vmem>>, vector<1x16x8xbf16>
    %28 = vector.shape_cast %27 : vector<1x16x8xbf16> to vector<16x8xbf16>
    %cst_29 = arith.constant dense<0.000000e+00> : vector<64x8xf32>
    %29 = tpu.matmul %26, %28, %cst_29 {dimension_numbers = #tpu.dot_dimension_numbers<[1], [0], [0], [1], [0, 0, 1, 1], [], []>} : vector<64x16xbf16>, vector<16x8xbf16>, vector<64x8xf32> -> vector<64x8xf32>
    %30 = arith.addf %24, %29 : vector<64x8xf32>
    %c5 = arith.constant 5 : index
    %c0_30 = arith.constant 0 : index
    %c0_31 = arith.constant 0 : index
    %31 = vector.load %arg1[%c5, %c0_30, %c0_31] : memref<9x64x16xbf16, #tpu.memory_space<vmem>>, vector<1x64x16xbf16>
    %32 = vector.shape_cast %31 : vector<1x64x16xbf16> to vector<64x16xbf16>
    %c5_32 = arith.constant 5 : index
    %c0_33 = arith.constant 0 : index
    %c0_34 = arith.constant 0 : index
    %33 = vector.load %arg2[%c5_32, %c0_33, %c0_34] : memref<9x16x8xbf16, #tpu.memory_space<vmem>>, vector<1x16x8xbf16>
    %34 = vector.shape_cast %33 : vector<1x16x8xbf16> to vector<16x8xbf16>
    %cst_35 = arith.constant dense<0.000000e+00> : vector<64x8xf32>
    %35 = tpu.matmul %32, %34, %cst_35 {dimension_numbers = #tpu.dot_dimension_numbers<[1], [0], [0], [1], [0, 0, 1, 1], [], []>} : vector<64x16xbf16>, vector<16x8xbf16>, vector<64x8xf32> -> vector<64x8xf32>
    %36 = arith.addf %30, %35 : vector<64x8xf32>
    %c6 = arith.constant 6 : index
    %c0_36 = arith.constant 0 : index
    %c0_37 = arith.constant 0 : index
    %37 = vector.load %arg1[%c6, %c0_36, %c0_37] : memref<9x64x16xbf16, #tpu.memory_space<vmem>>, vector<1x64x16xbf16>
    %38 = vector.shape_cast %37 : vector<1x64x16xbf16> to vector<64x16xbf16>
    %c6_38 = arith.constant 6 : index
    %c0_39 = arith.constant 0 : index
    %c0_40 = arith.constant 0 : index
    %39 = vector.load %arg2[%c6_38, %c0_39, %c0_40] : memref<9x16x8xbf16, #tpu.memory_space<vmem>>, vector<1x16x8xbf16>
    %40 = vector.shape_cast %39 : vector<1x16x8xbf16> to vector<16x8xbf16>
    %cst_41 = arith.constant dense<0.000000e+00> : vector<64x8xf32>
    %41 = tpu.matmul %38, %40, %cst_41 {dimension_numbers = #tpu.dot_dimension_numbers<[1], [0], [0], [1], [0, 0, 1, 1], [], []>} : vector<64x16xbf16>, vector<16x8xbf16>, vector<64x8xf32> -> vector<64x8xf32>
    %42 = arith.addf %36, %41 : vector<64x8xf32>
    %c7 = arith.constant 7 : index
    %c0_42 = arith.constant 0 : index
    %c0_43 = arith.constant 0 : index
    %43 = vector.load %arg1[%c7, %c0_42, %c0_43] : memref<9x64x16xbf16, #tpu.memory_space<vmem>>, vector<1x64x16xbf16>
    %44 = vector.shape_cast %43 : vector<1x64x16xbf16> to vector<64x16xbf16>
    %c7_44 = arith.constant 7 : index
    %c0_45 = arith.constant 0 : index
    %c0_46 = arith.constant 0 : index
    %45 = vector.load %arg2[%c7_44, %c0_45, %c0_46] : memref<9x16x8xbf16, #tpu.memory_space<vmem>>, vector<1x16x8xbf16>
    %46 = vector.shape_cast %45 : vector<1x16x8xbf16> to vector<16x8xbf16>
    %cst_47 = arith.constant dense<0.000000e+00> : vector<64x8xf32>
    %47 = tpu.matmul %44, %46, %cst_47 {dimension_numbers = #tpu.dot_dimension_numbers<[1], [0], [0], [1], [0, 0, 1, 1], [], []>} : vector<64x16xbf16>, vector<16x8xbf16>, vector<64x8xf32> -> vector<64x8xf32>
    %48 = arith.addf %42, %47 : vector<64x8xf32>
    %c8 = arith.constant 8 : index
    %c0_48 = arith.constant 0 : index
    %c0_49 = arith.constant 0 : index
    %49 = vector.load %arg1[%c8, %c0_48, %c0_49] : memref<9x64x16xbf16, #tpu.memory_space<vmem>>, vector<1x64x16xbf16>
    %50 = vector.shape_cast %49 : vector<1x64x16xbf16> to vector<64x16xbf16>
    %c8_50 = arith.constant 8 : index
    %c0_51 = arith.constant 0 : index
    %c0_52 = arith.constant 0 : index
    %51 = vector.load %arg2[%c8_50, %c0_51, %c0_52] : memref<9x16x8xbf16, #tpu.memory_space<vmem>>, vector<1x16x8xbf16>
    %52 = vector.shape_cast %51 : vector<1x16x8xbf16> to vector<16x8xbf16>
    %cst_53 = arith.constant dense<0.000000e+00> : vector<64x8xf32>
    %53 = tpu.matmul %50, %52, %cst_53 {dimension_numbers = #tpu.dot_dimension_numbers<[1], [0], [0], [1], [0, 0, 1, 1], [], []>} : vector<64x16xbf16>, vector<16x8xbf16>, vector<64x8xf32> -> vector<64x8xf32>
    %54 = arith.addf %48, %53 : vector<64x8xf32>
    %c0_54 = arith.constant 0 : index
    %c0_55 = arith.constant 0 : index
    %55 = vector.load %arg3[%c0_54, %c0_55] : memref<1x8xf32, #tpu.memory_space<vmem>>, vector<1x8xf32>
    %56 = vector.broadcast %55 : vector<1x8xf32> to vector<64x8xf32>
    %57 = arith.addf %54, %56 : vector<64x8xf32>
    %58 = arith.truncf %57 : vector<64x8xf32> to vector<64x8xbf16>
    %c0_56 = arith.constant 0 : index
    %c0_57 = arith.constant 0 : index
    %59 = vector.load %arg4[%c0_56, %c0_57] : memref<64x8xbf16, #tpu.memory_space<vmem>>, vector<64x8xbf16>
    tpu.vector_store %arg4[%c0_56, %c0_57], %58 {strides = array<i32>} : memref<64x8xbf16, #tpu.memory_space<vmem>>, vector<64x8xbf16>,
    return
  }
  func.func @transform_0(%arg0: i32) -> (i32, i32, i32) {
    %c0_i32 = arith.constant 0 : i32
    %c0_i32_0 = arith.constant 0 : i32
    %c0_i32_1 = arith.constant 0 : i32
    return %c0_i32, %arg0, %c0_i32_0 : i32, i32, i32
  }
  func.func @transform_1(%arg0: i32) -> (i32, i32, i32) {
    %c0_i32 = arith.constant 0 : i32
    %c0_i32_0 = arith.constant 0 : i32
    %c0_i32_1 = arith.constant 0 : i32
    %c0_i32_2 = arith.constant 0 : i32
    return %c0_i32, %c0_i32_0, %c0_i32_1 : i32, i32, i32
  }
  func.func @transform_2(%arg0: i32) -> (i32, i32) {
    %c0_i32 = arith.constant 0 : i32
    %c0_i32_0 = arith.constant 0 : i32
    %c0_i32_1 = arith.constant 0 : i32
    return %c0_i32, %c0_i32_0 : i32, i32
  }
  func.func @transform_3(%arg0: i32) -> (i32, i32) {
    %c0_i32 = arith.constant 0 : i32
    %c0_i32_0 = arith.constant 0 : i32
    return %arg0, %c0_i32 : i32, i32
  }
}

module attributes {stable_mosaic.version = 11 : i64} {
  func.func @_matmul_kernel(%arg0: i32, %arg1: memref<1x24xf32, #tpu.memory_space<vmem>>, %arg2: memref<1x24xf32, #tpu.memory_space<vmem>>, %arg3: memref<1x16x24xbf16, #tpu.memory_space<vmem>>, %arg4: memref<1x16x24xbf16, #tpu.memory_space<vmem>>, %arg5: memref<1x16x24xbf16, #tpu.memory_space<vmem>>, %arg6: memref<1x16x24xbf16, #tpu.memory_space<vmem>>, %arg7: memref<1x24x24xbf16, #tpu.memory_space<vmem>>, %arg8: memref<1x24xf32, #tpu.memory_space<vmem>>, %arg9: memref<16x24xbf16, #tpu.memory_space<vmem>>) attributes {dimension_semantics = [#tpu.dimension_semantics<parallel>], iteration_bounds = array<i64: 2>, scalar_prefetch = 0 : i64, scratch_operands = 0 : i64, tpu.core_type = #tpu.core_type<tc>, window_params = [{pipeline_mode = #tpu.pipeline_mode<synchronous>, transform_indices = @transform_0, window_bounds = array<i64: 1, 24>}, {pipeline_mode = #tpu.pipeline_mode<synchronous>, transform_indices = @transform_1, window_bounds = array<i64: 1, 24>}, {transform_indices = @transform_2, window_bounds = array<i64: 1, 16, 24>}, {transform_indices = @transform_3, window_bounds = array<i64: 1, 16, 24>}, {transform_indices = @transform_4, window_bounds = array<i64: 1, 16, 24>}, {transform_indices = @transform_5, window_bounds = array<i64: 1, 16, 24>}, {pipeline_mode = #tpu.pipeline_mode<synchronous>, transform_indices = @transform_6, window_bounds = array<i64: 1, 24, 24>}, {pipeline_mode = #tpu.pipeline_mode<synchronous>, transform_indices = @transform_7, window_bounds = array<i64: 1, 24>}, {transform_indices = @transform_8, window_bounds = array<i64: 16, 24>}]} {
    %cst = arith.constant 0.000000e+00 : f32
    %0 = vector.broadcast %cst : f32 to vector<16x24xf32>
    %c0 = arith.constant 0 : index
    %c0_0 = arith.constant 0 : index
    %c0_1 = arith.constant 0 : index
    %1 = vector.load %arg3[%c0, %c0_0, %c0_1] : memref<1x16x24xbf16, #tpu.memory_space<vmem>>, vector<1x16x24xbf16>
    %2 = vector.shape_cast %1 : vector<1x16x24xbf16> to vector<16x24xbf16>
    %3 = arith.extf %2 : vector<16x24xbf16> to vector<16x24xf32>
    %c0_2 = arith.constant 0 : index
    %c0_3 = arith.constant 0 : index
    %4 = vector.load %arg1[%c0_2, %c0_3] : memref<1x24xf32, #tpu.memory_space<vmem>>, vector<1x24xf32>
    %5 = vector.broadcast %4 : vector<1x24xf32> to vector<16x24xf32>
    %6 = arith.mulf %3, %5 : vector<16x24xf32>
    %c0_4 = arith.constant 0 : index
    %c0_5 = arith.constant 0 : index
    %7 = vector.load %arg2[%c0_4, %c0_5] : memref<1x24xf32, #tpu.memory_space<vmem>>, vector<1x24xf32>
    %8 = vector.broadcast %7 : vector<1x24xf32> to vector<16x24xf32>
    %9 = arith.addf %6, %8 : vector<16x24xf32>
    %cst_6 = arith.constant 0.000000e+00 : f32
    %10 = vector.broadcast %cst_6 : f32 to vector<16x24xf32>
    %11 = arith.maximumf %9, %10 : vector<16x24xf32>
    %12 = arith.addf %0, %11 : vector<16x24xf32>
    %c0_7 = arith.constant 0 : index
    %c0_8 = arith.constant 0 : index
    %c0_9 = arith.constant 0 : index
    %13 = vector.load %arg4[%c0_7, %c0_8, %c0_9] : memref<1x16x24xbf16, #tpu.memory_space<vmem>>, vector<1x16x24xbf16>
    %14 = vector.shape_cast %13 : vector<1x16x24xbf16> to vector<16x24xbf16>
    %15 = arith.extf %14 : vector<16x24xbf16> to vector<16x24xf32>
    %c0_10 = arith.constant 0 : index
    %c0_11 = arith.constant 0 : index
    %16 = vector.load %arg1[%c0_10, %c0_11] : memref<1x24xf32, #tpu.memory_space<vmem>>, vector<1x24xf32>
    %17 = vector.broadcast %16 : vector<1x24xf32> to vector<16x24xf32>
    %18 = arith.mulf %15, %17 : vector<16x24xf32>
    %c0_12 = arith.constant 0 : index
    %c0_13 = arith.constant 0 : index
    %19 = vector.load %arg2[%c0_12, %c0_13] : memref<1x24xf32, #tpu.memory_space<vmem>>, vector<1x24xf32>
    %20 = vector.broadcast %19 : vector<1x24xf32> to vector<16x24xf32>
    %21 = arith.addf %18, %20 : vector<16x24xf32>
    %cst_14 = arith.constant 0.000000e+00 : f32
    %22 = vector.broadcast %cst_14 : f32 to vector<16x24xf32>
    %23 = arith.maximumf %21, %22 : vector<16x24xf32>
    %24 = arith.addf %12, %23 : vector<16x24xf32>
    %c0_15 = arith.constant 0 : index
    %c0_16 = arith.constant 0 : index
    %c0_17 = arith.constant 0 : index
    %25 = vector.load %arg5[%c0_15, %c0_16, %c0_17] : memref<1x16x24xbf16, #tpu.memory_space<vmem>>, vector<1x16x24xbf16>
    %26 = vector.shape_cast %25 : vector<1x16x24xbf16> to vector<16x24xbf16>
    %27 = arith.extf %26 : vector<16x24xbf16> to vector<16x24xf32>
    %c0_18 = arith.constant 0 : index
    %c0_19 = arith.constant 0 : index
    %28 = vector.load %arg1[%c0_18, %c0_19] : memref<1x24xf32, #tpu.memory_space<vmem>>, vector<1x24xf32>
    %29 = vector.broadcast %28 : vector<1x24xf32> to vector<16x24xf32>
    %30 = arith.mulf %27, %29 : vector<16x24xf32>
    %c0_20 = arith.constant 0 : index
    %c0_21 = arith.constant 0 : index
    %31 = vector.load %arg2[%c0_20, %c0_21] : memref<1x24xf32, #tpu.memory_space<vmem>>, vector<1x24xf32>
    %32 = vector.broadcast %31 : vector<1x24xf32> to vector<16x24xf32>
    %33 = arith.addf %30, %32 : vector<16x24xf32>
    %cst_22 = arith.constant 0.000000e+00 : f32
    %34 = vector.broadcast %cst_22 : f32 to vector<16x24xf32>
    %35 = arith.maximumf %33, %34 : vector<16x24xf32>
    %36 = arith.addf %24, %35 : vector<16x24xf32>
    %c0_23 = arith.constant 0 : index
    %c0_24 = arith.constant 0 : index
    %c0_25 = arith.constant 0 : index
    %37 = vector.load %arg6[%c0_23, %c0_24, %c0_25] : memref<1x16x24xbf16, #tpu.memory_space<vmem>>, vector<1x16x24xbf16>
    %38 = vector.shape_cast %37 : vector<1x16x24xbf16> to vector<16x24xbf16>
    %39 = arith.extf %38 : vector<16x24xbf16> to vector<16x24xf32>
    %c0_26 = arith.constant 0 : index
    %c0_27 = arith.constant 0 : index
    %40 = vector.load %arg1[%c0_26, %c0_27] : memref<1x24xf32, #tpu.memory_space<vmem>>, vector<1x24xf32>
    %41 = vector.broadcast %40 : vector<1x24xf32> to vector<16x24xf32>
    %42 = arith.mulf %39, %41 : vector<16x24xf32>
    %c0_28 = arith.constant 0 : index
    %c0_29 = arith.constant 0 : index
    %43 = vector.load %arg2[%c0_28, %c0_29] : memref<1x24xf32, #tpu.memory_space<vmem>>, vector<1x24xf32>
    %44 = vector.broadcast %43 : vector<1x24xf32> to vector<16x24xf32>
    %45 = arith.addf %42, %44 : vector<16x24xf32>
    %cst_30 = arith.constant 0.000000e+00 : f32
    %46 = vector.broadcast %cst_30 : f32 to vector<16x24xf32>
    %47 = arith.maximumf %45, %46 : vector<16x24xf32>
    %48 = arith.addf %36, %47 : vector<16x24xf32>
    %cst_31 = arith.constant 2.500000e-01 : f32
    %49 = vector.broadcast %cst_31 : f32 to vector<16x24xf32>
    %50 = arith.mulf %48, %49 : vector<16x24xf32>
    %51 = arith.truncf %50 : vector<16x24xf32> to vector<16x24xbf16>
    %c0_32 = arith.constant 0 : index
    %c0_33 = arith.constant 0 : index
    %c0_34 = arith.constant 0 : index
    %52 = vector.load %arg7[%c0_32, %c0_33, %c0_34] : memref<1x24x24xbf16, #tpu.memory_space<vmem>>, vector<1x24x24xbf16>
    %53 = vector.shape_cast %52 : vector<1x24x24xbf16> to vector<24x24xbf16>
    %cst_35 = arith.constant dense<0.000000e+00> : vector<16x24xf32>
    %54 = tpu.matmul %51, %53, %cst_35 {dimension_numbers = #tpu.dot_dimension_numbers<[1], [0], [0], [1], [0, 0, 1, 1], [], []>} : vector<16x24xbf16>, vector<24x24xbf16>, vector<16x24xf32> -> vector<16x24xf32>
    %c0_36 = arith.constant 0 : index
    %c0_37 = arith.constant 0 : index
    %55 = vector.load %arg8[%c0_36, %c0_37] : memref<1x24xf32, #tpu.memory_space<vmem>>, vector<1x24xf32>
    %56 = vector.broadcast %55 : vector<1x24xf32> to vector<16x24xf32>
    %57 = arith.addf %54, %56 : vector<16x24xf32>
    %58 = arith.truncf %57 : vector<16x24xf32> to vector<16x24xbf16>
    %c0_38 = arith.constant 0 : index
    %c0_39 = arith.constant 0 : index
    %59 = vector.load %arg9[%c0_38, %c0_39] : memref<16x24xbf16, #tpu.memory_space<vmem>>, vector<16x24xbf16>
    tpu.vector_store %arg9[%c0_38, %c0_39], %58 {strides = array<i32>} : memref<16x24xbf16, #tpu.memory_space<vmem>>, vector<16x24xbf16>,
    return
  }
  func.func @transform_0(%arg0: i32) -> (i32, i32) {
    %c0_i32 = arith.constant 0 : i32
    %c0_i32_0 = arith.constant 0 : i32
    %c0_i32_1 = arith.constant 0 : i32
    return %c0_i32, %c0_i32_0 : i32, i32
  }
  func.func @transform_1(%arg0: i32) -> (i32, i32) {
    %c0_i32 = arith.constant 0 : i32
    %c0_i32_0 = arith.constant 0 : i32
    %c0_i32_1 = arith.constant 0 : i32
    return %c0_i32, %c0_i32_0 : i32, i32
  }
  func.func @transform_2(%arg0: i32) -> (i32, i32, i32) {
    %c0_i32 = arith.constant 0 : i32
    %c0_i32_0 = arith.constant 0 : i32
    %c0_i32_1 = arith.constant 0 : i32
    return %c0_i32, %arg0, %c0_i32_0 : i32, i32, i32
  }
  func.func @transform_3(%arg0: i32) -> (i32, i32, i32) {
    %c0_i32 = arith.constant 0 : i32
    %c0_i32_0 = arith.constant 0 : i32
    %c0_i32_1 = arith.constant 0 : i32
    return %c0_i32, %arg0, %c0_i32_0 : i32, i32, i32
  }
  func.func @transform_4(%arg0: i32) -> (i32, i32, i32) {
    %c0_i32 = arith.constant 0 : i32
    %c0_i32_0 = arith.constant 0 : i32
    %c0_i32_1 = arith.constant 0 : i32
    return %c0_i32, %arg0, %c0_i32_0 : i32, i32, i32
  }
  func.func @transform_5(%arg0: i32) -> (i32, i32, i32) {
    %c0_i32 = arith.constant 0 : i32
    %c0_i32_0 = arith.constant 0 : i32
    %c0_i32_1 = arith.constant 0 : i32
    return %c0_i32, %arg0, %c0_i32_0 : i32, i32, i32
  }
  func.func @transform_6(%arg0: i32) -> (i32, i32, i32) {
    %c0_i32 = arith.constant 0 : i32
    %c0_i32_0 = arith.constant 0 : i32
    %c0_i32_1 = arith.constant 0 : i32
    %c0_i32_2 = arith.constant 0 : i32
    return %c0_i32, %c0_i32_0, %c0_i32_1 : i32, i32, i32
  }
  func.func @transform_7(%arg0: i32) -> (i32, i32) {
    %c0_i32 = arith.constant 0 : i32
    %c0_i32_0 = arith.constant 0 : i32
    %c0_i32_1 = arith.constant 0 : i32
    return %c0_i32, %c0_i32_0 : i32, i32
  }
  func.func @transform_8(%arg0: i32) -> (i32, i32) {
    %c0_i32 = arith.constant 0 : i32
    %c0_i32_0 = arith.constant 0 : i32
    return %arg0, %c0_i32 : i32, i32
  }
}

module attributes {stable_mosaic.version = 11 : i64} {
  func.func @_matmul_kernel(%arg0: i32, %arg1: memref<9x16x24xbf16, #tpu.memory_space<vmem>>, %arg2: memref<9x24x8xbf16, #tpu.memory_space<vmem>>, %arg3: memref<1x8xf32, #tpu.memory_space<vmem>>, %arg4: memref<16x8xbf16, #tpu.memory_space<vmem>>) attributes {dimension_semantics = [#tpu.dimension_semantics<parallel>], iteration_bounds = array<i64: 2>, scalar_prefetch = 0 : i64, scratch_operands = 0 : i64, tpu.core_type = #tpu.core_type<tc>, window_params = [{transform_indices = @transform_0, window_bounds = array<i64: 9, 16, 24>}, {pipeline_mode = #tpu.pipeline_mode<synchronous>, transform_indices = @transform_1, window_bounds = array<i64: 9, 24, 8>}, {pipeline_mode = #tpu.pipeline_mode<synchronous>, transform_indices = @transform_2, window_bounds = array<i64: 1, 8>}, {transform_indices = @transform_3, window_bounds = array<i64: 16, 8>}]} {
    %cst = arith.constant 0.000000e+00 : f32
    %0 = vector.broadcast %cst : f32 to vector<16x8xf32>
    %c0 = arith.constant 0 : index
    %c0_0 = arith.constant 0 : index
    %c0_1 = arith.constant 0 : index
    %1 = vector.load %arg1[%c0, %c0_0, %c0_1] : memref<9x16x24xbf16, #tpu.memory_space<vmem>>, vector<1x16x24xbf16>
    %2 = vector.shape_cast %1 : vector<1x16x24xbf16> to vector<16x24xbf16>
    %c0_2 = arith.constant 0 : index
    %c0_3 = arith.constant 0 : index
    %c0_4 = arith.constant 0 : index
    %3 = vector.load %arg2[%c0_2, %c0_3, %c0_4] : memref<9x24x8xbf16, #tpu.memory_space<vmem>>, vector<1x24x8xbf16>
    %4 = vector.shape_cast %3 : vector<1x24x8xbf16> to vector<24x8xbf16>
    %cst_5 = arith.constant dense<0.000000e+00> : vector<16x8xf32>
    %5 = tpu.matmul %2, %4, %cst_5 {dimension_numbers = #tpu.dot_dimension_numbers<[1], [0], [0], [1], [0, 0, 1, 1], [], []>} : vector<16x24xbf16>, vector<24x8xbf16>, vector<16x8xf32> -> vector<16x8xf32>
    %6 = arith.addf %0, %5 : vector<16x8xf32>
    %c1 = arith.constant 1 : index
    %c0_6 = arith.constant 0 : index
    %c0_7 = arith.constant 0 : index
    %7 = vector.load %arg1[%c1, %c0_6, %c0_7] : memref<9x16x24xbf16, #tpu.memory_space<vmem>>, vector<1x16x24xbf16>
    %8 = vector.shape_cast %7 : vector<1x16x24xbf16> to vector<16x24xbf16>
    %c1_8 = arith.constant 1 : index
    %c0_9 = arith.constant 0 : index
    %c0_10 = arith.constant 0 : index
    %9 = vector.load %arg2[%c1_8, %c0_9, %c0_10] : memref<9x24x8xbf16, #tpu.memory_space<vmem>>, vector<1x24x8xbf16>
    %10 = vector.shape_cast %9 : vector<1x24x8xbf16> to vector<24x8xbf16>
    %cst_11 = arith.constant dense<0.000000e+00> : vector<16x8xf32>
    %11 = tpu.matmul %8, %10, %cst_11 {dimension_numbers = #tpu.dot_dimension_numbers<[1], [0], [0], [1], [0, 0, 1, 1], [], []>} : vector<16x24xbf16>, vector<24x8xbf16>, vector<16x8xf32> -> vector<16x8xf32>
    %12 = arith.addf %6, %11 : vector<16x8xf32>
    %c2 = arith.constant 2 : index
    %c0_12 = arith.constant 0 : index
    %c0_13 = arith.constant 0 : index
    %13 = vector.load %arg1[%c2, %c0_12, %c0_13] : memref<9x16x24xbf16, #tpu.memory_space<vmem>>, vector<1x16x24xbf16>
    %14 = vector.shape_cast %13 : vector<1x16x24xbf16> to vector<16x24xbf16>
    %c2_14 = arith.constant 2 : index
    %c0_15 = arith.constant 0 : index
    %c0_16 = arith.constant 0 : index
    %15 = vector.load %arg2[%c2_14, %c0_15, %c0_16] : memref<9x24x8xbf16, #tpu.memory_space<vmem>>, vector<1x24x8xbf16>
    %16 = vector.shape_cast %15 : vector<1x24x8xbf16> to vector<24x8xbf16>
    %cst_17 = arith.constant dense<0.000000e+00> : vector<16x8xf32>
    %17 = tpu.matmul %14, %16, %cst_17 {dimension_numbers = #tpu.dot_dimension_numbers<[1], [0], [0], [1], [0, 0, 1, 1], [], []>} : vector<16x24xbf16>, vector<24x8xbf16>, vector<16x8xf32> -> vector<16x8xf32>
    %18 = arith.addf %12, %17 : vector<16x8xf32>
    %c3 = arith.constant 3 : index
    %c0_18 = arith.constant 0 : index
    %c0_19 = arith.constant 0 : index
    %19 = vector.load %arg1[%c3, %c0_18, %c0_19] : memref<9x16x24xbf16, #tpu.memory_space<vmem>>, vector<1x16x24xbf16>
    %20 = vector.shape_cast %19 : vector<1x16x24xbf16> to vector<16x24xbf16>
    %c3_20 = arith.constant 3 : index
    %c0_21 = arith.constant 0 : index
    %c0_22 = arith.constant 0 : index
    %21 = vector.load %arg2[%c3_20, %c0_21, %c0_22] : memref<9x24x8xbf16, #tpu.memory_space<vmem>>, vector<1x24x8xbf16>
    %22 = vector.shape_cast %21 : vector<1x24x8xbf16> to vector<24x8xbf16>
    %cst_23 = arith.constant dense<0.000000e+00> : vector<16x8xf32>
    %23 = tpu.matmul %20, %22, %cst_23 {dimension_numbers = #tpu.dot_dimension_numbers<[1], [0], [0], [1], [0, 0, 1, 1], [], []>} : vector<16x24xbf16>, vector<24x8xbf16>, vector<16x8xf32> -> vector<16x8xf32>
    %24 = arith.addf %18, %23 : vector<16x8xf32>
    %c4 = arith.constant 4 : index
    %c0_24 = arith.constant 0 : index
    %c0_25 = arith.constant 0 : index
    %25 = vector.load %arg1[%c4, %c0_24, %c0_25] : memref<9x16x24xbf16, #tpu.memory_space<vmem>>, vector<1x16x24xbf16>
    %26 = vector.shape_cast %25 : vector<1x16x24xbf16> to vector<16x24xbf16>
    %c4_26 = arith.constant 4 : index
    %c0_27 = arith.constant 0 : index
    %c0_28 = arith.constant 0 : index
    %27 = vector.load %arg2[%c4_26, %c0_27, %c0_28] : memref<9x24x8xbf16, #tpu.memory_space<vmem>>, vector<1x24x8xbf16>
    %28 = vector.shape_cast %27 : vector<1x24x8xbf16> to vector<24x8xbf16>
    %cst_29 = arith.constant dense<0.000000e+00> : vector<16x8xf32>
    %29 = tpu.matmul %26, %28, %cst_29 {dimension_numbers = #tpu.dot_dimension_numbers<[1], [0], [0], [1], [0, 0, 1, 1], [], []>} : vector<16x24xbf16>, vector<24x8xbf16>, vector<16x8xf32> -> vector<16x8xf32>
    %30 = arith.addf %24, %29 : vector<16x8xf32>
    %c5 = arith.constant 5 : index
    %c0_30 = arith.constant 0 : index
    %c0_31 = arith.constant 0 : index
    %31 = vector.load %arg1[%c5, %c0_30, %c0_31] : memref<9x16x24xbf16, #tpu.memory_space<vmem>>, vector<1x16x24xbf16>
    %32 = vector.shape_cast %31 : vector<1x16x24xbf16> to vector<16x24xbf16>
    %c5_32 = arith.constant 5 : index
    %c0_33 = arith.constant 0 : index
    %c0_34 = arith.constant 0 : index
    %33 = vector.load %arg2[%c5_32, %c0_33, %c0_34] : memref<9x24x8xbf16, #tpu.memory_space<vmem>>, vector<1x24x8xbf16>
    %34 = vector.shape_cast %33 : vector<1x24x8xbf16> to vector<24x8xbf16>
    %cst_35 = arith.constant dense<0.000000e+00> : vector<16x8xf32>
    %35 = tpu.matmul %32, %34, %cst_35 {dimension_numbers = #tpu.dot_dimension_numbers<[1], [0], [0], [1], [0, 0, 1, 1], [], []>} : vector<16x24xbf16>, vector<24x8xbf16>, vector<16x8xf32> -> vector<16x8xf32>
    %36 = arith.addf %30, %35 : vector<16x8xf32>
    %c6 = arith.constant 6 : index
    %c0_36 = arith.constant 0 : index
    %c0_37 = arith.constant 0 : index
    %37 = vector.load %arg1[%c6, %c0_36, %c0_37] : memref<9x16x24xbf16, #tpu.memory_space<vmem>>, vector<1x16x24xbf16>
    %38 = vector.shape_cast %37 : vector<1x16x24xbf16> to vector<16x24xbf16>
    %c6_38 = arith.constant 6 : index
    %c0_39 = arith.constant 0 : index
    %c0_40 = arith.constant 0 : index
    %39 = vector.load %arg2[%c6_38, %c0_39, %c0_40] : memref<9x24x8xbf16, #tpu.memory_space<vmem>>, vector<1x24x8xbf16>
    %40 = vector.shape_cast %39 : vector<1x24x8xbf16> to vector<24x8xbf16>
    %cst_41 = arith.constant dense<0.000000e+00> : vector<16x8xf32>
    %41 = tpu.matmul %38, %40, %cst_41 {dimension_numbers = #tpu.dot_dimension_numbers<[1], [0], [0], [1], [0, 0, 1, 1], [], []>} : vector<16x24xbf16>, vector<24x8xbf16>, vector<16x8xf32> -> vector<16x8xf32>
    %42 = arith.addf %36, %41 : vector<16x8xf32>
    %c7 = arith.constant 7 : index
    %c0_42 = arith.constant 0 : index
    %c0_43 = arith.constant 0 : index
    %43 = vector.load %arg1[%c7, %c0_42, %c0_43] : memref<9x16x24xbf16, #tpu.memory_space<vmem>>, vector<1x16x24xbf16>
    %44 = vector.shape_cast %43 : vector<1x16x24xbf16> to vector<16x24xbf16>
    %c7_44 = arith.constant 7 : index
    %c0_45 = arith.constant 0 : index
    %c0_46 = arith.constant 0 : index
    %45 = vector.load %arg2[%c7_44, %c0_45, %c0_46] : memref<9x24x8xbf16, #tpu.memory_space<vmem>>, vector<1x24x8xbf16>
    %46 = vector.shape_cast %45 : vector<1x24x8xbf16> to vector<24x8xbf16>
    %cst_47 = arith.constant dense<0.000000e+00> : vector<16x8xf32>
    %47 = tpu.matmul %44, %46, %cst_47 {dimension_numbers = #tpu.dot_dimension_numbers<[1], [0], [0], [1], [0, 0, 1, 1], [], []>} : vector<16x24xbf16>, vector<24x8xbf16>, vector<16x8xf32> -> vector<16x8xf32>
    %48 = arith.addf %42, %47 : vector<16x8xf32>
    %c8 = arith.constant 8 : index
    %c0_48 = arith.constant 0 : index
    %c0_49 = arith.constant 0 : index
    %49 = vector.load %arg1[%c8, %c0_48, %c0_49] : memref<9x16x24xbf16, #tpu.memory_space<vmem>>, vector<1x16x24xbf16>
    %50 = vector.shape_cast %49 : vector<1x16x24xbf16> to vector<16x24xbf16>
    %c8_50 = arith.constant 8 : index
    %c0_51 = arith.constant 0 : index
    %c0_52 = arith.constant 0 : index
    %51 = vector.load %arg2[%c8_50, %c0_51, %c0_52] : memref<9x24x8xbf16, #tpu.memory_space<vmem>>, vector<1x24x8xbf16>
    %52 = vector.shape_cast %51 : vector<1x24x8xbf16> to vector<24x8xbf16>
    %cst_53 = arith.constant dense<0.000000e+00> : vector<16x8xf32>
    %53 = tpu.matmul %50, %52, %cst_53 {dimension_numbers = #tpu.dot_dimension_numbers<[1], [0], [0], [1], [0, 0, 1, 1], [], []>} : vector<16x24xbf16>, vector<24x8xbf16>, vector<16x8xf32> -> vector<16x8xf32>
    %54 = arith.addf %48, %53 : vector<16x8xf32>
    %c0_54 = arith.constant 0 : index
    %c0_55 = arith.constant 0 : index
    %55 = vector.load %arg3[%c0_54, %c0_55] : memref<1x8xf32, #tpu.memory_space<vmem>>, vector<1x8xf32>
    %56 = vector.broadcast %55 : vector<1x8xf32> to vector<16x8xf32>
    %57 = arith.addf %54, %56 : vector<16x8xf32>
    %58 = arith.truncf %57 : vector<16x8xf32> to vector<16x8xbf16>
    %c0_56 = arith.constant 0 : index
    %c0_57 = arith.constant 0 : index
    %59 = vector.load %arg4[%c0_56, %c0_57] : memref<16x8xbf16, #tpu.memory_space<vmem>>, vector<16x8xbf16>
    tpu.vector_store %arg4[%c0_56, %c0_57], %58 {strides = array<i32>} : memref<16x8xbf16, #tpu.memory_space<vmem>>, vector<16x8xbf16>,
    return
  }
  func.func @transform_0(%arg0: i32) -> (i32, i32, i32) {
    %c0_i32 = arith.constant 0 : i32
    %c0_i32_0 = arith.constant 0 : i32
    %c0_i32_1 = arith.constant 0 : i32
    return %c0_i32, %arg0, %c0_i32_0 : i32, i32, i32
  }
  func.func @transform_1(%arg0: i32) -> (i32, i32, i32) {
    %c0_i32 = arith.constant 0 : i32
    %c0_i32_0 = arith.constant 0 : i32
    %c0_i32_1 = arith.constant 0 : i32
    %c0_i32_2 = arith.constant 0 : i32
    return %c0_i32, %c0_i32_0, %c0_i32_1 : i32, i32, i32
  }
  func.func @transform_2(%arg0: i32) -> (i32, i32) {
    %c0_i32 = arith.constant 0 : i32
    %c0_i32_0 = arith.constant 0 : i32
    %c0_i32_1 = arith.constant 0 : i32
    return %c0_i32, %c0_i32_0 : i32, i32
  }
  func.func @transform_3(%arg0: i32) -> (i32, i32) {
    %c0_i32 = arith.constant 0 : i32
    %c0_i32_0 = arith.constant 0 : i32
    return %arg0, %c0_i32 : i32, i32
  }
}

module attributes {stable_mosaic.version = 11 : i64} {
  func.func @_matmul_kernel(%arg0: i32, %arg1: memref<1x32xf32, #tpu.memory_space<vmem>>, %arg2: memref<1x32xf32, #tpu.memory_space<vmem>>, %arg3: memref<1x8x32xbf16, #tpu.memory_space<vmem>>, %arg4: memref<1x8x32xbf16, #tpu.memory_space<vmem>>, %arg5: memref<1x8x32xbf16, #tpu.memory_space<vmem>>, %arg6: memref<1x8x32xbf16, #tpu.memory_space<vmem>>, %arg7: memref<1x32x32xbf16, #tpu.memory_space<vmem>>, %arg8: memref<1x32xf32, #tpu.memory_space<vmem>>, %arg9: memref<8x32xbf16, #tpu.memory_space<vmem>>) attributes {dimension_semantics = [#tpu.dimension_semantics<parallel>], iteration_bounds = array<i64: 1>, scalar_prefetch = 0 : i64, scratch_operands = 0 : i64, tpu.core_type = #tpu.core_type<tc>, window_params = [{pipeline_mode = #tpu.pipeline_mode<synchronous>, transform_indices = @transform_0, window_bounds = array<i64: 1, 32>}, {pipeline_mode = #tpu.pipeline_mode<synchronous>, transform_indices = @transform_1, window_bounds = array<i64: 1, 32>}, {transform_indices = @transform_2, window_bounds = array<i64: 1, 8, 32>}, {transform_indices = @transform_3, window_bounds = array<i64: 1, 8, 32>}, {transform_indices = @transform_4, window_bounds = array<i64: 1, 8, 32>}, {transform_indices = @transform_5, window_bounds = array<i64: 1, 8, 32>}, {pipeline_mode = #tpu.pipeline_mode<synchronous>, transform_indices = @transform_6, window_bounds = array<i64: 1, 32, 32>}, {pipeline_mode = #tpu.pipeline_mode<synchronous>, transform_indices = @transform_7, window_bounds = array<i64: 1, 32>}, {transform_indices = @transform_8, window_bounds = array<i64: 8, 32>}]} {
    %cst = arith.constant 0.000000e+00 : f32
    %0 = vector.broadcast %cst : f32 to vector<8x32xf32>
    %c0 = arith.constant 0 : index
    %c0_0 = arith.constant 0 : index
    %c0_1 = arith.constant 0 : index
    %1 = vector.load %arg3[%c0, %c0_0, %c0_1] : memref<1x8x32xbf16, #tpu.memory_space<vmem>>, vector<1x8x32xbf16>
    %2 = vector.shape_cast %1 : vector<1x8x32xbf16> to vector<8x32xbf16>
    %3 = arith.extf %2 : vector<8x32xbf16> to vector<8x32xf32>
    %c0_2 = arith.constant 0 : index
    %c0_3 = arith.constant 0 : index
    %4 = vector.load %arg1[%c0_2, %c0_3] : memref<1x32xf32, #tpu.memory_space<vmem>>, vector<1x32xf32>
    %5 = vector.broadcast %4 : vector<1x32xf32> to vector<8x32xf32>
    %6 = arith.mulf %3, %5 : vector<8x32xf32>
    %c0_4 = arith.constant 0 : index
    %c0_5 = arith.constant 0 : index
    %7 = vector.load %arg2[%c0_4, %c0_5] : memref<1x32xf32, #tpu.memory_space<vmem>>, vector<1x32xf32>
    %8 = vector.broadcast %7 : vector<1x32xf32> to vector<8x32xf32>
    %9 = arith.addf %6, %8 : vector<8x32xf32>
    %cst_6 = arith.constant 0.000000e+00 : f32
    %10 = vector.broadcast %cst_6 : f32 to vector<8x32xf32>
    %11 = arith.maximumf %9, %10 : vector<8x32xf32>
    %12 = arith.addf %0, %11 : vector<8x32xf32>
    %c0_7 = arith.constant 0 : index
    %c0_8 = arith.constant 0 : index
    %c0_9 = arith.constant 0 : index
    %13 = vector.load %arg4[%c0_7, %c0_8, %c0_9] : memref<1x8x32xbf16, #tpu.memory_space<vmem>>, vector<1x8x32xbf16>
    %14 = vector.shape_cast %13 : vector<1x8x32xbf16> to vector<8x32xbf16>
    %15 = arith.extf %14 : vector<8x32xbf16> to vector<8x32xf32>
    %c0_10 = arith.constant 0 : index
    %c0_11 = arith.constant 0 : index
    %16 = vector.load %arg1[%c0_10, %c0_11] : memref<1x32xf32, #tpu.memory_space<vmem>>, vector<1x32xf32>
    %17 = vector.broadcast %16 : vector<1x32xf32> to vector<8x32xf32>
    %18 = arith.mulf %15, %17 : vector<8x32xf32>
    %c0_12 = arith.constant 0 : index
    %c0_13 = arith.constant 0 : index
    %19 = vector.load %arg2[%c0_12, %c0_13] : memref<1x32xf32, #tpu.memory_space<vmem>>, vector<1x32xf32>
    %20 = vector.broadcast %19 : vector<1x32xf32> to vector<8x32xf32>
    %21 = arith.addf %18, %20 : vector<8x32xf32>
    %cst_14 = arith.constant 0.000000e+00 : f32
    %22 = vector.broadcast %cst_14 : f32 to vector<8x32xf32>
    %23 = arith.maximumf %21, %22 : vector<8x32xf32>
    %24 = arith.addf %12, %23 : vector<8x32xf32>
    %c0_15 = arith.constant 0 : index
    %c0_16 = arith.constant 0 : index
    %c0_17 = arith.constant 0 : index
    %25 = vector.load %arg5[%c0_15, %c0_16, %c0_17] : memref<1x8x32xbf16, #tpu.memory_space<vmem>>, vector<1x8x32xbf16>
    %26 = vector.shape_cast %25 : vector<1x8x32xbf16> to vector<8x32xbf16>
    %27 = arith.extf %26 : vector<8x32xbf16> to vector<8x32xf32>
    %c0_18 = arith.constant 0 : index
    %c0_19 = arith.constant 0 : index
    %28 = vector.load %arg1[%c0_18, %c0_19] : memref<1x32xf32, #tpu.memory_space<vmem>>, vector<1x32xf32>
    %29 = vector.broadcast %28 : vector<1x32xf32> to vector<8x32xf32>
    %30 = arith.mulf %27, %29 : vector<8x32xf32>
    %c0_20 = arith.constant 0 : index
    %c0_21 = arith.constant 0 : index
    %31 = vector.load %arg2[%c0_20, %c0_21] : memref<1x32xf32, #tpu.memory_space<vmem>>, vector<1x32xf32>
    %32 = vector.broadcast %31 : vector<1x32xf32> to vector<8x32xf32>
    %33 = arith.addf %30, %32 : vector<8x32xf32>
    %cst_22 = arith.constant 0.000000e+00 : f32
    %34 = vector.broadcast %cst_22 : f32 to vector<8x32xf32>
    %35 = arith.maximumf %33, %34 : vector<8x32xf32>
    %36 = arith.addf %24, %35 : vector<8x32xf32>
    %c0_23 = arith.constant 0 : index
    %c0_24 = arith.constant 0 : index
    %c0_25 = arith.constant 0 : index
    %37 = vector.load %arg6[%c0_23, %c0_24, %c0_25] : memref<1x8x32xbf16, #tpu.memory_space<vmem>>, vector<1x8x32xbf16>
    %38 = vector.shape_cast %37 : vector<1x8x32xbf16> to vector<8x32xbf16>
    %39 = arith.extf %38 : vector<8x32xbf16> to vector<8x32xf32>
    %c0_26 = arith.constant 0 : index
    %c0_27 = arith.constant 0 : index
    %40 = vector.load %arg1[%c0_26, %c0_27] : memref<1x32xf32, #tpu.memory_space<vmem>>, vector<1x32xf32>
    %41 = vector.broadcast %40 : vector<1x32xf32> to vector<8x32xf32>
    %42 = arith.mulf %39, %41 : vector<8x32xf32>
    %c0_28 = arith.constant 0 : index
    %c0_29 = arith.constant 0 : index
    %43 = vector.load %arg2[%c0_28, %c0_29] : memref<1x32xf32, #tpu.memory_space<vmem>>, vector<1x32xf32>
    %44 = vector.broadcast %43 : vector<1x32xf32> to vector<8x32xf32>
    %45 = arith.addf %42, %44 : vector<8x32xf32>
    %cst_30 = arith.constant 0.000000e+00 : f32
    %46 = vector.broadcast %cst_30 : f32 to vector<8x32xf32>
    %47 = arith.maximumf %45, %46 : vector<8x32xf32>
    %48 = arith.addf %36, %47 : vector<8x32xf32>
    %cst_31 = arith.constant 2.500000e-01 : f32
    %49 = vector.broadcast %cst_31 : f32 to vector<8x32xf32>
    %50 = arith.mulf %48, %49 : vector<8x32xf32>
    %51 = arith.truncf %50 : vector<8x32xf32> to vector<8x32xbf16>
    %c0_32 = arith.constant 0 : index
    %c0_33 = arith.constant 0 : index
    %c0_34 = arith.constant 0 : index
    %52 = vector.load %arg7[%c0_32, %c0_33, %c0_34] : memref<1x32x32xbf16, #tpu.memory_space<vmem>>, vector<1x32x32xbf16>
    %53 = vector.shape_cast %52 : vector<1x32x32xbf16> to vector<32x32xbf16>
    %cst_35 = arith.constant dense<0.000000e+00> : vector<8x32xf32>
    %54 = tpu.matmul %51, %53, %cst_35 {dimension_numbers = #tpu.dot_dimension_numbers<[1], [0], [0], [1], [0, 0, 1, 1], [], []>} : vector<8x32xbf16>, vector<32x32xbf16>, vector<8x32xf32> -> vector<8x32xf32>
    %c0_36 = arith.constant 0 : index
    %c0_37 = arith.constant 0 : index
    %55 = vector.load %arg8[%c0_36, %c0_37] : memref<1x32xf32, #tpu.memory_space<vmem>>, vector<1x32xf32>
    %56 = vector.broadcast %55 : vector<1x32xf32> to vector<8x32xf32>
    %57 = arith.addf %54, %56 : vector<8x32xf32>
    %58 = arith.truncf %57 : vector<8x32xf32> to vector<8x32xbf16>
    %c0_38 = arith.constant 0 : index
    %c0_39 = arith.constant 0 : index
    %59 = vector.load %arg9[%c0_38, %c0_39] : memref<8x32xbf16, #tpu.memory_space<vmem>>, vector<8x32xbf16>
    tpu.vector_store %arg9[%c0_38, %c0_39], %58 {strides = array<i32>} : memref<8x32xbf16, #tpu.memory_space<vmem>>, vector<8x32xbf16>,
    return
  }
  func.func @transform_0(%arg0: i32) -> (i32, i32) {
    %c0_i32 = arith.constant 0 : i32
    %c0_i32_0 = arith.constant 0 : i32
    %c0_i32_1 = arith.constant 0 : i32
    return %c0_i32, %c0_i32_0 : i32, i32
  }
  func.func @transform_1(%arg0: i32) -> (i32, i32) {
    %c0_i32 = arith.constant 0 : i32
    %c0_i32_0 = arith.constant 0 : i32
    %c0_i32_1 = arith.constant 0 : i32
    return %c0_i32, %c0_i32_0 : i32, i32
  }
  func.func @transform_2(%arg0: i32) -> (i32, i32, i32) {
    %c0_i32 = arith.constant 0 : i32
    %c0_i32_0 = arith.constant 0 : i32
    %c0_i32_1 = arith.constant 0 : i32
    return %c0_i32, %arg0, %c0_i32_0 : i32, i32, i32
  }
  func.func @transform_3(%arg0: i32) -> (i32, i32, i32) {
    %c0_i32 = arith.constant 0 : i32
    %c0_i32_0 = arith.constant 0 : i32
    %c0_i32_1 = arith.constant 0 : i32
    return %c0_i32, %arg0, %c0_i32_0 : i32, i32, i32
  }
  func.func @transform_4(%arg0: i32) -> (i32, i32, i32) {
    %c0_i32 = arith.constant 0 : i32
    %c0_i32_0 = arith.constant 0 : i32
    %c0_i32_1 = arith.constant 0 : i32
    return %c0_i32, %arg0, %c0_i32_0 : i32, i32, i32
  }
  func.func @transform_5(%arg0: i32) -> (i32, i32, i32) {
    %c0_i32 = arith.constant 0 : i32
    %c0_i32_0 = arith.constant 0 : i32
    %c0_i32_1 = arith.constant 0 : i32
    return %c0_i32, %arg0, %c0_i32_0 : i32, i32, i32
  }
  func.func @transform_6(%arg0: i32) -> (i32, i32, i32) {
    %c0_i32 = arith.constant 0 : i32
    %c0_i32_0 = arith.constant 0 : i32
    %c0_i32_1 = arith.constant 0 : i32
    %c0_i32_2 = arith.constant 0 : i32
    return %c0_i32, %c0_i32_0, %c0_i32_1 : i32, i32, i32
  }
  func.func @transform_7(%arg0: i32) -> (i32, i32) {
    %c0_i32 = arith.constant 0 : i32
    %c0_i32_0 = arith.constant 0 : i32
    %c0_i32_1 = arith.constant 0 : i32
    return %c0_i32, %c0_i32_0 : i32, i32
  }
  func.func @transform_8(%arg0: i32) -> (i32, i32) {
    %c0_i32 = arith.constant 0 : i32
    %c0_i32_0 = arith.constant 0 : i32
    return %arg0, %c0_i32 : i32, i32
  }
}

module attributes {stable_mosaic.version = 11 : i64} {
  func.func @_matmul_kernel(%arg0: i32, %arg1: memref<9x8x32xbf16, #tpu.memory_space<vmem>>, %arg2: memref<9x32x8xbf16, #tpu.memory_space<vmem>>, %arg3: memref<1x8xf32, #tpu.memory_space<vmem>>, %arg4: memref<8x8xbf16, #tpu.memory_space<vmem>>) attributes {dimension_semantics = [#tpu.dimension_semantics<parallel>], iteration_bounds = array<i64: 1>, scalar_prefetch = 0 : i64, scratch_operands = 0 : i64, tpu.core_type = #tpu.core_type<tc>, window_params = [{transform_indices = @transform_0, window_bounds = array<i64: 9, 8, 32>}, {pipeline_mode = #tpu.pipeline_mode<synchronous>, transform_indices = @transform_1, window_bounds = array<i64: 9, 32, 8>}, {pipeline_mode = #tpu.pipeline_mode<synchronous>, transform_indices = @transform_2, window_bounds = array<i64: 1, 8>}, {transform_indices = @transform_3, window_bounds = array<i64: 8, 8>}]} {
    %cst = arith.constant 0.000000e+00 : f32
    %0 = vector.broadcast %cst : f32 to vector<8x8xf32>
    %c0 = arith.constant 0 : index
    %c0_0 = arith.constant 0 : index
    %c0_1 = arith.constant 0 : index
    %1 = vector.load %arg1[%c0, %c0_0, %c0_1] : memref<9x8x32xbf16, #tpu.memory_space<vmem>>, vector<1x8x32xbf16>
    %2 = vector.shape_cast %1 : vector<1x8x32xbf16> to vector<8x32xbf16>
    %c0_2 = arith.constant 0 : index
    %c0_3 = arith.constant 0 : index
    %c0_4 = arith.constant 0 : index
    %3 = vector.load %arg2[%c0_2, %c0_3, %c0_4] : memref<9x32x8xbf16, #tpu.memory_space<vmem>>, vector<1x32x8xbf16>
    %4 = vector.shape_cast %3 : vector<1x32x8xbf16> to vector<32x8xbf16>
    %cst_5 = arith.constant dense<0.000000e+00> : vector<8x8xf32>
    %5 = tpu.matmul %2, %4, %cst_5 {dimension_numbers = #tpu.dot_dimension_numbers<[1], [0], [0], [1], [0, 0, 1, 1], [], []>} : vector<8x32xbf16>, vector<32x8xbf16>, vector<8x8xf32> -> vector<8x8xf32>
    %6 = arith.addf %0, %5 : vector<8x8xf32>
    %c1 = arith.constant 1 : index
    %c0_6 = arith.constant 0 : index
    %c0_7 = arith.constant 0 : index
    %7 = vector.load %arg1[%c1, %c0_6, %c0_7] : memref<9x8x32xbf16, #tpu.memory_space<vmem>>, vector<1x8x32xbf16>
    %8 = vector.shape_cast %7 : vector<1x8x32xbf16> to vector<8x32xbf16>
    %c1_8 = arith.constant 1 : index
    %c0_9 = arith.constant 0 : index
    %c0_10 = arith.constant 0 : index
    %9 = vector.load %arg2[%c1_8, %c0_9, %c0_10] : memref<9x32x8xbf16, #tpu.memory_space<vmem>>, vector<1x32x8xbf16>
    %10 = vector.shape_cast %9 : vector<1x32x8xbf16> to vector<32x8xbf16>
    %cst_11 = arith.constant dense<0.000000e+00> : vector<8x8xf32>
    %11 = tpu.matmul %8, %10, %cst_11 {dimension_numbers = #tpu.dot_dimension_numbers<[1], [0], [0], [1], [0, 0, 1, 1], [], []>} : vector<8x32xbf16>, vector<32x8xbf16>, vector<8x8xf32> -> vector<8x8xf32>
    %12 = arith.addf %6, %11 : vector<8x8xf32>
    %c2 = arith.constant 2 : index
    %c0_12 = arith.constant 0 : index
    %c0_13 = arith.constant 0 : index
    %13 = vector.load %arg1[%c2, %c0_12, %c0_13] : memref<9x8x32xbf16, #tpu.memory_space<vmem>>, vector<1x8x32xbf16>
    %14 = vector.shape_cast %13 : vector<1x8x32xbf16> to vector<8x32xbf16>
    %c2_14 = arith.constant 2 : index
    %c0_15 = arith.constant 0 : index
    %c0_16 = arith.constant 0 : index
    %15 = vector.load %arg2[%c2_14, %c0_15, %c0_16] : memref<9x32x8xbf16, #tpu.memory_space<vmem>>, vector<1x32x8xbf16>
    %16 = vector.shape_cast %15 : vector<1x32x8xbf16> to vector<32x8xbf16>
    %cst_17 = arith.constant dense<0.000000e+00> : vector<8x8xf32>
    %17 = tpu.matmul %14, %16, %cst_17 {dimension_numbers = #tpu.dot_dimension_numbers<[1], [0], [0], [1], [0, 0, 1, 1], [], []>} : vector<8x32xbf16>, vector<32x8xbf16>, vector<8x8xf32> -> vector<8x8xf32>
    %18 = arith.addf %12, %17 : vector<8x8xf32>
    %c3 = arith.constant 3 : index
    %c0_18 = arith.constant 0 : index
    %c0_19 = arith.constant 0 : index
    %19 = vector.load %arg1[%c3, %c0_18, %c0_19] : memref<9x8x32xbf16, #tpu.memory_space<vmem>>, vector<1x8x32xbf16>
    %20 = vector.shape_cast %19 : vector<1x8x32xbf16> to vector<8x32xbf16>
    %c3_20 = arith.constant 3 : index
    %c0_21 = arith.constant 0 : index
    %c0_22 = arith.constant 0 : index
    %21 = vector.load %arg2[%c3_20, %c0_21, %c0_22] : memref<9x32x8xbf16, #tpu.memory_space<vmem>>, vector<1x32x8xbf16>
    %22 = vector.shape_cast %21 : vector<1x32x8xbf16> to vector<32x8xbf16>
    %cst_23 = arith.constant dense<0.000000e+00> : vector<8x8xf32>
    %23 = tpu.matmul %20, %22, %cst_23 {dimension_numbers = #tpu.dot_dimension_numbers<[1], [0], [0], [1], [0, 0, 1, 1], [], []>} : vector<8x32xbf16>, vector<32x8xbf16>, vector<8x8xf32> -> vector<8x8xf32>
    %24 = arith.addf %18, %23 : vector<8x8xf32>
    %c4 = arith.constant 4 : index
    %c0_24 = arith.constant 0 : index
    %c0_25 = arith.constant 0 : index
    %25 = vector.load %arg1[%c4, %c0_24, %c0_25] : memref<9x8x32xbf16, #tpu.memory_space<vmem>>, vector<1x8x32xbf16>
    %26 = vector.shape_cast %25 : vector<1x8x32xbf16> to vector<8x32xbf16>
    %c4_26 = arith.constant 4 : index
    %c0_27 = arith.constant 0 : index
    %c0_28 = arith.constant 0 : index
    %27 = vector.load %arg2[%c4_26, %c0_27, %c0_28] : memref<9x32x8xbf16, #tpu.memory_space<vmem>>, vector<1x32x8xbf16>
    %28 = vector.shape_cast %27 : vector<1x32x8xbf16> to vector<32x8xbf16>
    %cst_29 = arith.constant dense<0.000000e+00> : vector<8x8xf32>
    %29 = tpu.matmul %26, %28, %cst_29 {dimension_numbers = #tpu.dot_dimension_numbers<[1], [0], [0], [1], [0, 0, 1, 1], [], []>} : vector<8x32xbf16>, vector<32x8xbf16>, vector<8x8xf32> -> vector<8x8xf32>
    %30 = arith.addf %24, %29 : vector<8x8xf32>
    %c5 = arith.constant 5 : index
    %c0_30 = arith.constant 0 : index
    %c0_31 = arith.constant 0 : index
    %31 = vector.load %arg1[%c5, %c0_30, %c0_31] : memref<9x8x32xbf16, #tpu.memory_space<vmem>>, vector<1x8x32xbf16>
    %32 = vector.shape_cast %31 : vector<1x8x32xbf16> to vector<8x32xbf16>
    %c5_32 = arith.constant 5 : index
    %c0_33 = arith.constant 0 : index
    %c0_34 = arith.constant 0 : index
    %33 = vector.load %arg2[%c5_32, %c0_33, %c0_34] : memref<9x32x8xbf16, #tpu.memory_space<vmem>>, vector<1x32x8xbf16>
    %34 = vector.shape_cast %33 : vector<1x32x8xbf16> to vector<32x8xbf16>
    %cst_35 = arith.constant dense<0.000000e+00> : vector<8x8xf32>
    %35 = tpu.matmul %32, %34, %cst_35 {dimension_numbers = #tpu.dot_dimension_numbers<[1], [0], [0], [1], [0, 0, 1, 1], [], []>} : vector<8x32xbf16>, vector<32x8xbf16>, vector<8x8xf32> -> vector<8x8xf32>
    %36 = arith.addf %30, %35 : vector<8x8xf32>
    %c6 = arith.constant 6 : index
    %c0_36 = arith.constant 0 : index
    %c0_37 = arith.constant 0 : index
    %37 = vector.load %arg1[%c6, %c0_36, %c0_37] : memref<9x8x32xbf16, #tpu.memory_space<vmem>>, vector<1x8x32xbf16>
    %38 = vector.shape_cast %37 : vector<1x8x32xbf16> to vector<8x32xbf16>
    %c6_38 = arith.constant 6 : index
    %c0_39 = arith.constant 0 : index
    %c0_40 = arith.constant 0 : index
    %39 = vector.load %arg2[%c6_38, %c0_39, %c0_40] : memref<9x32x8xbf16, #tpu.memory_space<vmem>>, vector<1x32x8xbf16>
    %40 = vector.shape_cast %39 : vector<1x32x8xbf16> to vector<32x8xbf16>
    %cst_41 = arith.constant dense<0.000000e+00> : vector<8x8xf32>
    %41 = tpu.matmul %38, %40, %cst_41 {dimension_numbers = #tpu.dot_dimension_numbers<[1], [0], [0], [1], [0, 0, 1, 1], [], []>} : vector<8x32xbf16>, vector<32x8xbf16>, vector<8x8xf32> -> vector<8x8xf32>
    %42 = arith.addf %36, %41 : vector<8x8xf32>
    %c7 = arith.constant 7 : index
    %c0_42 = arith.constant 0 : index
    %c0_43 = arith.constant 0 : index
    %43 = vector.load %arg1[%c7, %c0_42, %c0_43] : memref<9x8x32xbf16, #tpu.memory_space<vmem>>, vector<1x8x32xbf16>
    %44 = vector.shape_cast %43 : vector<1x8x32xbf16> to vector<8x32xbf16>
    %c7_44 = arith.constant 7 : index
    %c0_45 = arith.constant 0 : index
    %c0_46 = arith.constant 0 : index
    %45 = vector.load %arg2[%c7_44, %c0_45, %c0_46] : memref<9x32x8xbf16, #tpu.memory_space<vmem>>, vector<1x32x8xbf16>
    %46 = vector.shape_cast %45 : vector<1x32x8xbf16> to vector<32x8xbf16>
    %cst_47 = arith.constant dense<0.000000e+00> : vector<8x8xf32>
    %47 = tpu.matmul %44, %46, %cst_47 {dimension_numbers = #tpu.dot_dimension_numbers<[1], [0], [0], [1], [0, 0, 1, 1], [], []>} : vector<8x32xbf16>, vector<32x8xbf16>, vector<8x8xf32> -> vector<8x8xf32>
    %48 = arith.addf %42, %47 : vector<8x8xf32>
    %c8 = arith.constant 8 : index
    %c0_48 = arith.constant 0 : index
    %c0_49 = arith.constant 0 : index
    %49 = vector.load %arg1[%c8, %c0_48, %c0_49] : memref<9x8x32xbf16, #tpu.memory_space<vmem>>, vector<1x8x32xbf16>
    %50 = vector.shape_cast %49 : vector<1x8x32xbf16> to vector<8x32xbf16>
    %c8_50 = arith.constant 8 : index
    %c0_51 = arith.constant 0 : index
    %c0_52 = arith.constant 0 : index
    %51 = vector.load %arg2[%c8_50, %c0_51, %c0_52] : memref<9x32x8xbf16, #tpu.memory_space<vmem>>, vector<1x32x8xbf16>
    %52 = vector.shape_cast %51 : vector<1x32x8xbf16> to vector<32x8xbf16>
    %cst_53 = arith.constant dense<0.000000e+00> : vector<8x8xf32>
    %53 = tpu.matmul %50, %52, %cst_53 {dimension_numbers = #tpu.dot_dimension_numbers<[1], [0], [0], [1], [0, 0, 1, 1], [], []>} : vector<8x32xbf16>, vector<32x8xbf16>, vector<8x8xf32> -> vector<8x8xf32>
    %54 = arith.addf %48, %53 : vector<8x8xf32>
    %c0_54 = arith.constant 0 : index
    %c0_55 = arith.constant 0 : index
    %55 = vector.load %arg3[%c0_54, %c0_55] : memref<1x8xf32, #tpu.memory_space<vmem>>, vector<1x8xf32>
    %56 = vector.broadcast %55 : vector<1x8xf32> to vector<8x8xf32>
    %57 = arith.addf %54, %56 : vector<8x8xf32>
    %58 = arith.truncf %57 : vector<8x8xf32> to vector<8x8xbf16>
    %c0_56 = arith.constant 0 : index
    %c0_57 = arith.constant 0 : index
    %59 = vector.load %arg4[%c0_56, %c0_57] : memref<8x8xbf16, #tpu.memory_space<vmem>>, vector<8x8xbf16>
    tpu.vector_store %arg4[%c0_56, %c0_57], %58 {strides = array<i32>} : memref<8x8xbf16, #tpu.memory_space<vmem>>, vector<8x8xbf16>,
    return
  }
  func.func @transform_0(%arg0: i32) -> (i32, i32, i32) {
    %c0_i32 = arith.constant 0 : i32
    %c0_i32_0 = arith.constant 0 : i32
    %c0_i32_1 = arith.constant 0 : i32
    return %c0_i32, %arg0, %c0_i32_0 : i32, i32, i32
  }
  func.func @transform_1(%arg0: i32) -> (i32, i32, i32) {
    %c0_i32 = arith.constant 0 : i32
    %c0_i32_0 = arith.constant 0 : i32
    %c0_i32_1 = arith.constant 0 : i32
    %c0_i32_2 = arith.constant 0 : i32
    return %c0_i32, %c0_i32_0, %c0_i32_1 : i32, i32, i32
  }
  func.func @transform_2(%arg0: i32) -> (i32, i32) {
    %c0_i32 = arith.constant 0 : i32
    %c0_i32_0 = arith.constant 0 : i32
    %c0_i32_1 = arith.constant 0 : i32
    return %c0_i32, %c0_i32_0 : i32, i32
  }
  func.func @transform_3(%arg0: i32) -> (i32, i32) {
    %c0_i32 = arith.constant 0 : i32
    %c0_i32_0 = arith.constant 0 : i32
    return %arg0, %c0_i32 : i32, i32
  }
}

module attributes {stable_mosaic.version = 11 : i64} {
  func.func @_matmul_kernel(%arg0: i32, %arg1: memref<1x40xf32, #tpu.memory_space<vmem>>, %arg2: memref<1x40xf32, #tpu.memory_space<vmem>>, %arg3: memref<1x8x40xbf16, #tpu.memory_space<vmem>>, %arg4: memref<1x8x40xbf16, #tpu.memory_space<vmem>>, %arg5: memref<1x8x40xbf16, #tpu.memory_space<vmem>>, %arg6: memref<1x8x40xbf16, #tpu.memory_space<vmem>>, %arg7: memref<1x40x40xbf16, #tpu.memory_space<vmem>>, %arg8: memref<1x40xf32, #tpu.memory_space<vmem>>, %arg9: memref<8x40xbf16, #tpu.memory_space<vmem>>) attributes {dimension_semantics = [#tpu.dimension_semantics<parallel>], iteration_bounds = array<i64: 1>, scalar_prefetch = 0 : i64, scratch_operands = 0 : i64, tpu.core_type = #tpu.core_type<tc>, window_params = [{pipeline_mode = #tpu.pipeline_mode<synchronous>, transform_indices = @transform_0, window_bounds = array<i64: 1, 40>}, {pipeline_mode = #tpu.pipeline_mode<synchronous>, transform_indices = @transform_1, window_bounds = array<i64: 1, 40>}, {transform_indices = @transform_2, window_bounds = array<i64: 1, 8, 40>}, {transform_indices = @transform_3, window_bounds = array<i64: 1, 8, 40>}, {transform_indices = @transform_4, window_bounds = array<i64: 1, 8, 40>}, {transform_indices = @transform_5, window_bounds = array<i64: 1, 8, 40>}, {pipeline_mode = #tpu.pipeline_mode<synchronous>, transform_indices = @transform_6, window_bounds = array<i64: 1, 40, 40>}, {pipeline_mode = #tpu.pipeline_mode<synchronous>, transform_indices = @transform_7, window_bounds = array<i64: 1, 40>}, {transform_indices = @transform_8, window_bounds = array<i64: 8, 40>}]} {
    %cst = arith.constant 0.000000e+00 : f32
    %0 = vector.broadcast %cst : f32 to vector<8x40xf32>
    %c0 = arith.constant 0 : index
    %c0_0 = arith.constant 0 : index
    %c0_1 = arith.constant 0 : index
    %1 = vector.load %arg3[%c0, %c0_0, %c0_1] : memref<1x8x40xbf16, #tpu.memory_space<vmem>>, vector<1x8x40xbf16>
    %2 = vector.shape_cast %1 : vector<1x8x40xbf16> to vector<8x40xbf16>
    %3 = arith.extf %2 : vector<8x40xbf16> to vector<8x40xf32>
    %c0_2 = arith.constant 0 : index
    %c0_3 = arith.constant 0 : index
    %4 = vector.load %arg1[%c0_2, %c0_3] : memref<1x40xf32, #tpu.memory_space<vmem>>, vector<1x40xf32>
    %5 = vector.broadcast %4 : vector<1x40xf32> to vector<8x40xf32>
    %6 = arith.mulf %3, %5 : vector<8x40xf32>
    %c0_4 = arith.constant 0 : index
    %c0_5 = arith.constant 0 : index
    %7 = vector.load %arg2[%c0_4, %c0_5] : memref<1x40xf32, #tpu.memory_space<vmem>>, vector<1x40xf32>
    %8 = vector.broadcast %7 : vector<1x40xf32> to vector<8x40xf32>
    %9 = arith.addf %6, %8 : vector<8x40xf32>
    %cst_6 = arith.constant 0.000000e+00 : f32
    %10 = vector.broadcast %cst_6 : f32 to vector<8x40xf32>
    %11 = arith.maximumf %9, %10 : vector<8x40xf32>
    %12 = arith.addf %0, %11 : vector<8x40xf32>
    %c0_7 = arith.constant 0 : index
    %c0_8 = arith.constant 0 : index
    %c0_9 = arith.constant 0 : index
    %13 = vector.load %arg4[%c0_7, %c0_8, %c0_9] : memref<1x8x40xbf16, #tpu.memory_space<vmem>>, vector<1x8x40xbf16>
    %14 = vector.shape_cast %13 : vector<1x8x40xbf16> to vector<8x40xbf16>
    %15 = arith.extf %14 : vector<8x40xbf16> to vector<8x40xf32>
    %c0_10 = arith.constant 0 : index
    %c0_11 = arith.constant 0 : index
    %16 = vector.load %arg1[%c0_10, %c0_11] : memref<1x40xf32, #tpu.memory_space<vmem>>, vector<1x40xf32>
    %17 = vector.broadcast %16 : vector<1x40xf32> to vector<8x40xf32>
    %18 = arith.mulf %15, %17 : vector<8x40xf32>
    %c0_12 = arith.constant 0 : index
    %c0_13 = arith.constant 0 : index
    %19 = vector.load %arg2[%c0_12, %c0_13] : memref<1x40xf32, #tpu.memory_space<vmem>>, vector<1x40xf32>
    %20 = vector.broadcast %19 : vector<1x40xf32> to vector<8x40xf32>
    %21 = arith.addf %18, %20 : vector<8x40xf32>
    %cst_14 = arith.constant 0.000000e+00 : f32
    %22 = vector.broadcast %cst_14 : f32 to vector<8x40xf32>
    %23 = arith.maximumf %21, %22 : vector<8x40xf32>
    %24 = arith.addf %12, %23 : vector<8x40xf32>
    %c0_15 = arith.constant 0 : index
    %c0_16 = arith.constant 0 : index
    %c0_17 = arith.constant 0 : index
    %25 = vector.load %arg5[%c0_15, %c0_16, %c0_17] : memref<1x8x40xbf16, #tpu.memory_space<vmem>>, vector<1x8x40xbf16>
    %26 = vector.shape_cast %25 : vector<1x8x40xbf16> to vector<8x40xbf16>
    %27 = arith.extf %26 : vector<8x40xbf16> to vector<8x40xf32>
    %c0_18 = arith.constant 0 : index
    %c0_19 = arith.constant 0 : index
    %28 = vector.load %arg1[%c0_18, %c0_19] : memref<1x40xf32, #tpu.memory_space<vmem>>, vector<1x40xf32>
    %29 = vector.broadcast %28 : vector<1x40xf32> to vector<8x40xf32>
    %30 = arith.mulf %27, %29 : vector<8x40xf32>
    %c0_20 = arith.constant 0 : index
    %c0_21 = arith.constant 0 : index
    %31 = vector.load %arg2[%c0_20, %c0_21] : memref<1x40xf32, #tpu.memory_space<vmem>>, vector<1x40xf32>
    %32 = vector.broadcast %31 : vector<1x40xf32> to vector<8x40xf32>
    %33 = arith.addf %30, %32 : vector<8x40xf32>
    %cst_22 = arith.constant 0.000000e+00 : f32
    %34 = vector.broadcast %cst_22 : f32 to vector<8x40xf32>
    %35 = arith.maximumf %33, %34 : vector<8x40xf32>
    %36 = arith.addf %24, %35 : vector<8x40xf32>
    %c0_23 = arith.constant 0 : index
    %c0_24 = arith.constant 0 : index
    %c0_25 = arith.constant 0 : index
    %37 = vector.load %arg6[%c0_23, %c0_24, %c0_25] : memref<1x8x40xbf16, #tpu.memory_space<vmem>>, vector<1x8x40xbf16>
    %38 = vector.shape_cast %37 : vector<1x8x40xbf16> to vector<8x40xbf16>
    %39 = arith.extf %38 : vector<8x40xbf16> to vector<8x40xf32>
    %c0_26 = arith.constant 0 : index
    %c0_27 = arith.constant 0 : index
    %40 = vector.load %arg1[%c0_26, %c0_27] : memref<1x40xf32, #tpu.memory_space<vmem>>, vector<1x40xf32>
    %41 = vector.broadcast %40 : vector<1x40xf32> to vector<8x40xf32>
    %42 = arith.mulf %39, %41 : vector<8x40xf32>
    %c0_28 = arith.constant 0 : index
    %c0_29 = arith.constant 0 : index
    %43 = vector.load %arg2[%c0_28, %c0_29] : memref<1x40xf32, #tpu.memory_space<vmem>>, vector<1x40xf32>
    %44 = vector.broadcast %43 : vector<1x40xf32> to vector<8x40xf32>
    %45 = arith.addf %42, %44 : vector<8x40xf32>
    %cst_30 = arith.constant 0.000000e+00 : f32
    %46 = vector.broadcast %cst_30 : f32 to vector<8x40xf32>
    %47 = arith.maximumf %45, %46 : vector<8x40xf32>
    %48 = arith.addf %36, %47 : vector<8x40xf32>
    %cst_31 = arith.constant 2.500000e-01 : f32
    %49 = vector.broadcast %cst_31 : f32 to vector<8x40xf32>
    %50 = arith.mulf %48, %49 : vector<8x40xf32>
    %51 = arith.truncf %50 : vector<8x40xf32> to vector<8x40xbf16>
    %c0_32 = arith.constant 0 : index
    %c0_33 = arith.constant 0 : index
    %c0_34 = arith.constant 0 : index
    %52 = vector.load %arg7[%c0_32, %c0_33, %c0_34] : memref<1x40x40xbf16, #tpu.memory_space<vmem>>, vector<1x40x40xbf16>
    %53 = vector.shape_cast %52 : vector<1x40x40xbf16> to vector<40x40xbf16>
    %cst_35 = arith.constant dense<0.000000e+00> : vector<8x40xf32>
    %54 = tpu.matmul %51, %53, %cst_35 {dimension_numbers = #tpu.dot_dimension_numbers<[1], [0], [0], [1], [0, 0, 1, 1], [], []>} : vector<8x40xbf16>, vector<40x40xbf16>, vector<8x40xf32> -> vector<8x40xf32>
    %c0_36 = arith.constant 0 : index
    %c0_37 = arith.constant 0 : index
    %55 = vector.load %arg8[%c0_36, %c0_37] : memref<1x40xf32, #tpu.memory_space<vmem>>, vector<1x40xf32>
    %56 = vector.broadcast %55 : vector<1x40xf32> to vector<8x40xf32>
    %57 = arith.addf %54, %56 : vector<8x40xf32>
    %58 = arith.truncf %57 : vector<8x40xf32> to vector<8x40xbf16>
    %c0_38 = arith.constant 0 : index
    %c0_39 = arith.constant 0 : index
    %59 = vector.load %arg9[%c0_38, %c0_39] : memref<8x40xbf16, #tpu.memory_space<vmem>>, vector<8x40xbf16>
    tpu.vector_store %arg9[%c0_38, %c0_39], %58 {strides = array<i32>} : memref<8x40xbf16, #tpu.memory_space<vmem>>, vector<8x40xbf16>,
    return
  }
  func.func @transform_0(%arg0: i32) -> (i32, i32) {
    %c0_i32 = arith.constant 0 : i32
    %c0_i32_0 = arith.constant 0 : i32
    %c0_i32_1 = arith.constant 0 : i32
    return %c0_i32, %c0_i32_0 : i32, i32
  }
  func.func @transform_1(%arg0: i32) -> (i32, i32) {
    %c0_i32 = arith.constant 0 : i32
    %c0_i32_0 = arith.constant 0 : i32
    %c0_i32_1 = arith.constant 0 : i32
    return %c0_i32, %c0_i32_0 : i32, i32
  }
  func.func @transform_2(%arg0: i32) -> (i32, i32, i32) {
    %c0_i32 = arith.constant 0 : i32
    %c0_i32_0 = arith.constant 0 : i32
    %c0_i32_1 = arith.constant 0 : i32
    return %c0_i32, %arg0, %c0_i32_0 : i32, i32, i32
  }
  func.func @transform_3(%arg0: i32) -> (i32, i32, i32) {
    %c0_i32 = arith.constant 0 : i32
    %c0_i32_0 = arith.constant 0 : i32
    %c0_i32_1 = arith.constant 0 : i32
    return %c0_i32, %arg0, %c0_i32_0 : i32, i32, i32
  }
  func.func @transform_4(%arg0: i32) -> (i32, i32, i32) {
    %c0_i32 = arith.constant 0 : i32
    %c0_i32_0 = arith.constant 0 : i32
    %c0_i32_1 = arith.constant 0 : i32
    return %c0_i32, %arg0, %c0_i32_0 : i32, i32, i32
  }
  func.func @transform_5(%arg0: i32) -> (i32, i32, i32) {
    %c0_i32 = arith.constant 0 : i32
    %c0_i32_0 = arith.constant 0 : i32
    %c0_i32_1 = arith.constant 0 : i32
    return %c0_i32, %arg0, %c0_i32_0 : i32, i32, i32
  }
  func.func @transform_6(%arg0: i32) -> (i32, i32, i32) {
    %c0_i32 = arith.constant 0 : i32
    %c0_i32_0 = arith.constant 0 : i32
    %c0_i32_1 = arith.constant 0 : i32
    %c0_i32_2 = arith.constant 0 : i32
    return %c0_i32, %c0_i32_0, %c0_i32_1 : i32, i32, i32
  }
  func.func @transform_7(%arg0: i32) -> (i32, i32) {
    %c0_i32 = arith.constant 0 : i32
    %c0_i32_0 = arith.constant 0 : i32
    %c0_i32_1 = arith.constant 0 : i32
    return %c0_i32, %c0_i32_0 : i32, i32
  }
  func.func @transform_8(%arg0: i32) -> (i32, i32) {
    %c0_i32 = arith.constant 0 : i32
    %c0_i32_0 = arith.constant 0 : i32
    return %arg0, %c0_i32 : i32, i32
  }
}

module attributes {stable_mosaic.version = 11 : i64} {
  func.func @_matmul_kernel(%arg0: i32, %arg1: memref<9x8x40xbf16, #tpu.memory_space<vmem>>, %arg2: memref<9x40x8xbf16, #tpu.memory_space<vmem>>, %arg3: memref<1x8xf32, #tpu.memory_space<vmem>>, %arg4: memref<8x8xbf16, #tpu.memory_space<vmem>>) attributes {dimension_semantics = [#tpu.dimension_semantics<parallel>], iteration_bounds = array<i64: 1>, scalar_prefetch = 0 : i64, scratch_operands = 0 : i64, tpu.core_type = #tpu.core_type<tc>, window_params = [{transform_indices = @transform_0, window_bounds = array<i64: 9, 8, 40>}, {pipeline_mode = #tpu.pipeline_mode<synchronous>, transform_indices = @transform_1, window_bounds = array<i64: 9, 40, 8>}, {pipeline_mode = #tpu.pipeline_mode<synchronous>, transform_indices = @transform_2, window_bounds = array<i64: 1, 8>}, {transform_indices = @transform_3, window_bounds = array<i64: 8, 8>}]} {
    %cst = arith.constant 0.000000e+00 : f32
    %0 = vector.broadcast %cst : f32 to vector<8x8xf32>
    %c0 = arith.constant 0 : index
    %c0_0 = arith.constant 0 : index
    %c0_1 = arith.constant 0 : index
    %1 = vector.load %arg1[%c0, %c0_0, %c0_1] : memref<9x8x40xbf16, #tpu.memory_space<vmem>>, vector<1x8x40xbf16>
    %2 = vector.shape_cast %1 : vector<1x8x40xbf16> to vector<8x40xbf16>
    %c0_2 = arith.constant 0 : index
    %c0_3 = arith.constant 0 : index
    %c0_4 = arith.constant 0 : index
    %3 = vector.load %arg2[%c0_2, %c0_3, %c0_4] : memref<9x40x8xbf16, #tpu.memory_space<vmem>>, vector<1x40x8xbf16>
    %4 = vector.shape_cast %3 : vector<1x40x8xbf16> to vector<40x8xbf16>
    %cst_5 = arith.constant dense<0.000000e+00> : vector<8x8xf32>
    %5 = tpu.matmul %2, %4, %cst_5 {dimension_numbers = #tpu.dot_dimension_numbers<[1], [0], [0], [1], [0, 0, 1, 1], [], []>} : vector<8x40xbf16>, vector<40x8xbf16>, vector<8x8xf32> -> vector<8x8xf32>
    %6 = arith.addf %0, %5 : vector<8x8xf32>
    %c1 = arith.constant 1 : index
    %c0_6 = arith.constant 0 : index
    %c0_7 = arith.constant 0 : index
    %7 = vector.load %arg1[%c1, %c0_6, %c0_7] : memref<9x8x40xbf16, #tpu.memory_space<vmem>>, vector<1x8x40xbf16>
    %8 = vector.shape_cast %7 : vector<1x8x40xbf16> to vector<8x40xbf16>
    %c1_8 = arith.constant 1 : index
    %c0_9 = arith.constant 0 : index
    %c0_10 = arith.constant 0 : index
    %9 = vector.load %arg2[%c1_8, %c0_9, %c0_10] : memref<9x40x8xbf16, #tpu.memory_space<vmem>>, vector<1x40x8xbf16>
    %10 = vector.shape_cast %9 : vector<1x40x8xbf16> to vector<40x8xbf16>
    %cst_11 = arith.constant dense<0.000000e+00> : vector<8x8xf32>
    %11 = tpu.matmul %8, %10, %cst_11 {dimension_numbers = #tpu.dot_dimension_numbers<[1], [0], [0], [1], [0, 0, 1, 1], [], []>} : vector<8x40xbf16>, vector<40x8xbf16>, vector<8x8xf32> -> vector<8x8xf32>
    %12 = arith.addf %6, %11 : vector<8x8xf32>
    %c2 = arith.constant 2 : index
    %c0_12 = arith.constant 0 : index
    %c0_13 = arith.constant 0 : index
    %13 = vector.load %arg1[%c2, %c0_12, %c0_13] : memref<9x8x40xbf16, #tpu.memory_space<vmem>>, vector<1x8x40xbf16>
    %14 = vector.shape_cast %13 : vector<1x8x40xbf16> to vector<8x40xbf16>
    %c2_14 = arith.constant 2 : index
    %c0_15 = arith.constant 0 : index
    %c0_16 = arith.constant 0 : index
    %15 = vector.load %arg2[%c2_14, %c0_15, %c0_16] : memref<9x40x8xbf16, #tpu.memory_space<vmem>>, vector<1x40x8xbf16>
    %16 = vector.shape_cast %15 : vector<1x40x8xbf16> to vector<40x8xbf16>
    %cst_17 = arith.constant dense<0.000000e+00> : vector<8x8xf32>
    %17 = tpu.matmul %14, %16, %cst_17 {dimension_numbers = #tpu.dot_dimension_numbers<[1], [0], [0], [1], [0, 0, 1, 1], [], []>} : vector<8x40xbf16>, vector<40x8xbf16>, vector<8x8xf32> -> vector<8x8xf32>
    %18 = arith.addf %12, %17 : vector<8x8xf32>
    %c3 = arith.constant 3 : index
    %c0_18 = arith.constant 0 : index
    %c0_19 = arith.constant 0 : index
    %19 = vector.load %arg1[%c3, %c0_18, %c0_19] : memref<9x8x40xbf16, #tpu.memory_space<vmem>>, vector<1x8x40xbf16>
    %20 = vector.shape_cast %19 : vector<1x8x40xbf16> to vector<8x40xbf16>
    %c3_20 = arith.constant 3 : index
    %c0_21 = arith.constant 0 : index
    %c0_22 = arith.constant 0 : index
    %21 = vector.load %arg2[%c3_20, %c0_21, %c0_22] : memref<9x40x8xbf16, #tpu.memory_space<vmem>>, vector<1x40x8xbf16>
    %22 = vector.shape_cast %21 : vector<1x40x8xbf16> to vector<40x8xbf16>
    %cst_23 = arith.constant dense<0.000000e+00> : vector<8x8xf32>
    %23 = tpu.matmul %20, %22, %cst_23 {dimension_numbers = #tpu.dot_dimension_numbers<[1], [0], [0], [1], [0, 0, 1, 1], [], []>} : vector<8x40xbf16>, vector<40x8xbf16>, vector<8x8xf32> -> vector<8x8xf32>
    %24 = arith.addf %18, %23 : vector<8x8xf32>
    %c4 = arith.constant 4 : index
    %c0_24 = arith.constant 0 : index
    %c0_25 = arith.constant 0 : index
    %25 = vector.load %arg1[%c4, %c0_24, %c0_25] : memref<9x8x40xbf16, #tpu.memory_space<vmem>>, vector<1x8x40xbf16>
    %26 = vector.shape_cast %25 : vector<1x8x40xbf16> to vector<8x40xbf16>
    %c4_26 = arith.constant 4 : index
    %c0_27 = arith.constant 0 : index
    %c0_28 = arith.constant 0 : index
    %27 = vector.load %arg2[%c4_26, %c0_27, %c0_28] : memref<9x40x8xbf16, #tpu.memory_space<vmem>>, vector<1x40x8xbf16>
    %28 = vector.shape_cast %27 : vector<1x40x8xbf16> to vector<40x8xbf16>
    %cst_29 = arith.constant dense<0.000000e+00> : vector<8x8xf32>
    %29 = tpu.matmul %26, %28, %cst_29 {dimension_numbers = #tpu.dot_dimension_numbers<[1], [0], [0], [1], [0, 0, 1, 1], [], []>} : vector<8x40xbf16>, vector<40x8xbf16>, vector<8x8xf32> -> vector<8x8xf32>
    %30 = arith.addf %24, %29 : vector<8x8xf32>
    %c5 = arith.constant 5 : index
    %c0_30 = arith.constant 0 : index
    %c0_31 = arith.constant 0 : index
    %31 = vector.load %arg1[%c5, %c0_30, %c0_31] : memref<9x8x40xbf16, #tpu.memory_space<vmem>>, vector<1x8x40xbf16>
    %32 = vector.shape_cast %31 : vector<1x8x40xbf16> to vector<8x40xbf16>
    %c5_32 = arith.constant 5 : index
    %c0_33 = arith.constant 0 : index
    %c0_34 = arith.constant 0 : index
    %33 = vector.load %arg2[%c5_32, %c0_33, %c0_34] : memref<9x40x8xbf16, #tpu.memory_space<vmem>>, vector<1x40x8xbf16>
    %34 = vector.shape_cast %33 : vector<1x40x8xbf16> to vector<40x8xbf16>
    %cst_35 = arith.constant dense<0.000000e+00> : vector<8x8xf32>
    %35 = tpu.matmul %32, %34, %cst_35 {dimension_numbers = #tpu.dot_dimension_numbers<[1], [0], [0], [1], [0, 0, 1, 1], [], []>} : vector<8x40xbf16>, vector<40x8xbf16>, vector<8x8xf32> -> vector<8x8xf32>
    %36 = arith.addf %30, %35 : vector<8x8xf32>
    %c6 = arith.constant 6 : index
    %c0_36 = arith.constant 0 : index
    %c0_37 = arith.constant 0 : index
    %37 = vector.load %arg1[%c6, %c0_36, %c0_37] : memref<9x8x40xbf16, #tpu.memory_space<vmem>>, vector<1x8x40xbf16>
    %38 = vector.shape_cast %37 : vector<1x8x40xbf16> to vector<8x40xbf16>
    %c6_38 = arith.constant 6 : index
    %c0_39 = arith.constant 0 : index
    %c0_40 = arith.constant 0 : index
    %39 = vector.load %arg2[%c6_38, %c0_39, %c0_40] : memref<9x40x8xbf16, #tpu.memory_space<vmem>>, vector<1x40x8xbf16>
    %40 = vector.shape_cast %39 : vector<1x40x8xbf16> to vector<40x8xbf16>
    %cst_41 = arith.constant dense<0.000000e+00> : vector<8x8xf32>
    %41 = tpu.matmul %38, %40, %cst_41 {dimension_numbers = #tpu.dot_dimension_numbers<[1], [0], [0], [1], [0, 0, 1, 1], [], []>} : vector<8x40xbf16>, vector<40x8xbf16>, vector<8x8xf32> -> vector<8x8xf32>
    %42 = arith.addf %36, %41 : vector<8x8xf32>
    %c7 = arith.constant 7 : index
    %c0_42 = arith.constant 0 : index
    %c0_43 = arith.constant 0 : index
    %43 = vector.load %arg1[%c7, %c0_42, %c0_43] : memref<9x8x40xbf16, #tpu.memory_space<vmem>>, vector<1x8x40xbf16>
    %44 = vector.shape_cast %43 : vector<1x8x40xbf16> to vector<8x40xbf16>
    %c7_44 = arith.constant 7 : index
    %c0_45 = arith.constant 0 : index
    %c0_46 = arith.constant 0 : index
    %45 = vector.load %arg2[%c7_44, %c0_45, %c0_46] : memref<9x40x8xbf16, #tpu.memory_space<vmem>>, vector<1x40x8xbf16>
    %46 = vector.shape_cast %45 : vector<1x40x8xbf16> to vector<40x8xbf16>
    %cst_47 = arith.constant dense<0.000000e+00> : vector<8x8xf32>
    %47 = tpu.matmul %44, %46, %cst_47 {dimension_numbers = #tpu.dot_dimension_numbers<[1], [0], [0], [1], [0, 0, 1, 1], [], []>} : vector<8x40xbf16>, vector<40x8xbf16>, vector<8x8xf32> -> vector<8x8xf32>
    %48 = arith.addf %42, %47 : vector<8x8xf32>
    %c8 = arith.constant 8 : index
    %c0_48 = arith.constant 0 : index
    %c0_49 = arith.constant 0 : index
    %49 = vector.load %arg1[%c8, %c0_48, %c0_49] : memref<9x8x40xbf16, #tpu.memory_space<vmem>>, vector<1x8x40xbf16>
    %50 = vector.shape_cast %49 : vector<1x8x40xbf16> to vector<8x40xbf16>
    %c8_50 = arith.constant 8 : index
    %c0_51 = arith.constant 0 : index
    %c0_52 = arith.constant 0 : index
    %51 = vector.load %arg2[%c8_50, %c0_51, %c0_52] : memref<9x40x8xbf16, #tpu.memory_space<vmem>>, vector<1x40x8xbf16>
    %52 = vector.shape_cast %51 : vector<1x40x8xbf16> to vector<40x8xbf16>
    %cst_53 = arith.constant dense<0.000000e+00> : vector<8x8xf32>
    %53 = tpu.matmul %50, %52, %cst_53 {dimension_numbers = #tpu.dot_dimension_numbers<[1], [0], [0], [1], [0, 0, 1, 1], [], []>} : vector<8x40xbf16>, vector<40x8xbf16>, vector<8x8xf32> -> vector<8x8xf32>
    %54 = arith.addf %48, %53 : vector<8x8xf32>
    %c0_54 = arith.constant 0 : index
    %c0_55 = arith.constant 0 : index
    %55 = vector.load %arg3[%c0_54, %c0_55] : memref<1x8xf32, #tpu.memory_space<vmem>>, vector<1x8xf32>
    %56 = vector.broadcast %55 : vector<1x8xf32> to vector<8x8xf32>
    %57 = arith.addf %54, %56 : vector<8x8xf32>
    %58 = arith.truncf %57 : vector<8x8xf32> to vector<8x8xbf16>
    %c0_56 = arith.constant 0 : index
    %c0_57 = arith.constant 0 : index
    %59 = vector.load %arg4[%c0_56, %c0_57] : memref<8x8xbf16, #tpu.memory_space<vmem>>, vector<8x8xbf16>
    tpu.vector_store %arg4[%c0_56, %c0_57], %58 {strides = array<i32>} : memref<8x8xbf16, #tpu.memory_space<vmem>>, vector<8x8xbf16>,
    return
  }
  func.func @transform_0(%arg0: i32) -> (i32, i32, i32) {
    %c0_i32 = arith.constant 0 : i32
    %c0_i32_0 = arith.constant 0 : i32
    %c0_i32_1 = arith.constant 0 : i32
    return %c0_i32, %arg0, %c0_i32_0 : i32, i32, i32
  }
  func.func @transform_1(%arg0: i32) -> (i32, i32, i32) {
    %c0_i32 = arith.constant 0 : i32
    %c0_i32_0 = arith.constant 0 : i32
    %c0_i32_1 = arith.constant 0 : i32
    %c0_i32_2 = arith.constant 0 : i32
    return %c0_i32, %c0_i32_0, %c0_i32_1 : i32, i32, i32
  }
  func.func @transform_2(%arg0: i32) -> (i32, i32) {
    %c0_i32 = arith.constant 0 : i32
    %c0_i32_0 = arith.constant 0 : i32
    %c0_i32_1 = arith.constant 0 : i32
    return %c0_i32, %c0_i32_0 : i32, i32
  }
  func.func @transform_3(%arg0: i32) -> (i32, i32) {
    %c0_i32 = arith.constant 0 : i32
    %c0_i32_0 = arith.constant 0 : i32
    return %arg0, %c0_i32 : i32, i32
  }
}

module attributes {stable_mosaic.version = 11 : i64} {
  func.func @_gap_kernel(%arg0: i32, %arg1: memref<2x1x48xbf16, #tpu.memory_space<vmem>>, %arg2: memref<2x48xf32, #tpu.memory_space<vmem>>) attributes {dimension_semantics = [#tpu.dimension_semantics<arbitrary>], iteration_bounds = array<i64: 1>, scalar_prefetch = 0 : i64, scratch_operands = 0 : i64, tpu.core_type = #tpu.core_type<tc>, window_params = [{pipeline_mode = #tpu.pipeline_mode<synchronous>, transform_indices = @transform_0, window_bounds = array<i64: 2, 1, 48>}, {pipeline_mode = #tpu.pipeline_mode<synchronous>, transform_indices = @transform_1, window_bounds = array<i64: 2, 48>}]} {
    %c0 = arith.constant 0 : index
    %c0_0 = arith.constant 0 : index
    %c0_1 = arith.constant 0 : index
    %0 = vector.load %arg1[%c0, %c0_0, %c0_1] : memref<2x1x48xbf16, #tpu.memory_space<vmem>>, vector<2x1x48xbf16>
    %1 = arith.extf %0 : vector<2x1x48xbf16> to vector<2x1x48xf32>
    %cst = arith.constant dense<0.000000e+00> : vector<2x48xf32>
    %2 = vector.multi_reduction <add>, %1, %cst [1] : vector<2x1x48xf32> to vector<2x48xf32>
    %cst_2 = arith.constant 1.000000e+00 : f32
    %3 = vector.broadcast %cst_2 : f32 to vector<2x48xf32>
    %4 = arith.divf %2, %3 : vector<2x48xf32>
    %c0_3 = arith.constant 0 : index
    %c0_4 = arith.constant 0 : index
    %5 = vector.load %arg2[%c0_3, %c0_4] : memref<2x48xf32, #tpu.memory_space<vmem>>, vector<2x48xf32>
    tpu.vector_store %arg2[%c0_3, %c0_4], %4 {strides = array<i32>} : memref<2x48xf32, #tpu.memory_space<vmem>>, vector<2x48xf32>,
    return
  }
  func.func @transform_0(%arg0: i32) -> (i32, i32, i32) {
    %c0_i32 = arith.constant 0 : i32
    %c0_i32_0 = arith.constant 0 : i32
    %c0_i32_1 = arith.constant 0 : i32
    %c0_i32_2 = arith.constant 0 : i32
    return %c0_i32, %c0_i32_0, %c0_i32_1 : i32, i32, i32
  }
  func.func @transform_1(%arg0: i32) -> (i32, i32) {
    %c0_i32 = arith.constant 0 : i32
    %c0_i32_0 = arith.constant 0 : i32
    %c0_i32_1 = arith.constant 0 : i32
    return %c0_i32, %c0_i32_0 : i32, i32
  }
}

module attributes {stable_mosaic.version = 11 : i64} {
  func.func @_matmul_kernel(%arg0: i32, %arg1: memref<1x8x48xbf16, #tpu.memory_space<vmem>>, %arg2: memref<1x48x10xbf16, #tpu.memory_space<vmem>>, %arg3: memref<1x10xf32, #tpu.memory_space<vmem>>, %arg4: memref<8x10xf32, #tpu.memory_space<vmem>>) attributes {dimension_semantics = [#tpu.dimension_semantics<parallel>], iteration_bounds = array<i64: 1>, scalar_prefetch = 0 : i64, scratch_operands = 0 : i64, tpu.core_type = #tpu.core_type<tc>, window_params = [{transform_indices = @transform_0, window_bounds = array<i64: 1, 8, 48>}, {pipeline_mode = #tpu.pipeline_mode<synchronous>, transform_indices = @transform_1, window_bounds = array<i64: 1, 48, 10>}, {pipeline_mode = #tpu.pipeline_mode<synchronous>, transform_indices = @transform_2, window_bounds = array<i64: 1, 10>}, {transform_indices = @transform_3, window_bounds = array<i64: 8, 10>}]} {
    %cst = arith.constant 0.000000e+00 : f32
    %0 = vector.broadcast %cst : f32 to vector<8x10xf32>
    %c0 = arith.constant 0 : index
    %c0_0 = arith.constant 0 : index
    %c0_1 = arith.constant 0 : index
    %1 = vector.load %arg1[%c0, %c0_0, %c0_1] : memref<1x8x48xbf16, #tpu.memory_space<vmem>>, vector<1x8x48xbf16>
    %2 = vector.shape_cast %1 : vector<1x8x48xbf16> to vector<8x48xbf16>
    %c0_2 = arith.constant 0 : index
    %c0_3 = arith.constant 0 : index
    %c0_4 = arith.constant 0 : index
    %3 = vector.load %arg2[%c0_2, %c0_3, %c0_4] : memref<1x48x10xbf16, #tpu.memory_space<vmem>>, vector<1x48x10xbf16>
    %4 = vector.shape_cast %3 : vector<1x48x10xbf16> to vector<48x10xbf16>
    %cst_5 = arith.constant dense<0.000000e+00> : vector<8x10xf32>
    %5 = tpu.matmul %2, %4, %cst_5 {dimension_numbers = #tpu.dot_dimension_numbers<[1], [0], [0], [1], [0, 0, 1, 1], [], []>} : vector<8x48xbf16>, vector<48x10xbf16>, vector<8x10xf32> -> vector<8x10xf32>
    %6 = arith.addf %0, %5 : vector<8x10xf32>
    %c0_6 = arith.constant 0 : index
    %c0_7 = arith.constant 0 : index
    %7 = vector.load %arg3[%c0_6, %c0_7] : memref<1x10xf32, #tpu.memory_space<vmem>>, vector<1x10xf32>
    %8 = vector.broadcast %7 : vector<1x10xf32> to vector<8x10xf32>
    %9 = arith.addf %6, %8 : vector<8x10xf32>
    %c0_8 = arith.constant 0 : index
    %c0_9 = arith.constant 0 : index
    %10 = vector.load %arg4[%c0_8, %c0_9] : memref<8x10xf32, #tpu.memory_space<vmem>>, vector<8x10xf32>
    tpu.vector_store %arg4[%c0_8, %c0_9], %9 {strides = array<i32>} : memref<8x10xf32, #tpu.memory_space<vmem>>, vector<8x10xf32>,
    return
  }
  func.func @transform_0(%arg0: i32) -> (i32, i32, i32) {
    %c0_i32 = arith.constant 0 : i32
    %c0_i32_0 = arith.constant 0 : i32
    %c0_i32_1 = arith.constant 0 : i32
    return %c0_i32, %arg0, %c0_i32_0 : i32, i32, i32
  }
  func.func @transform_1(%arg0: i32) -> (i32, i32, i32) {
    %c0_i32 = arith.constant 0 : i32
    %c0_i32_0 = arith.constant 0 : i32
    %c0_i32_1 = arith.constant 0 : i32
    %c0_i32_2 = arith.constant 0 : i32
    return %c0_i32, %c0_i32_0, %c0_i32_1 : i32, i32, i32
  }
  func.func @transform_2(%arg0: i32) -> (i32, i32) {
    %c0_i32 = arith.constant 0 : i32
    %c0_i32_0 = arith.constant 0 : i32
    %c0_i32_1 = arith.constant 0 : i32
    return %c0_i32, %c0_i32_0 : i32, i32
  }
  func.func @transform_3(%arg0: i32) -> (i32, i32) {
    %c0_i32 = arith.constant 0 : i32
    %c0_i32_0 = arith.constant 0 : i32
    return %arg0, %c0_i32 : i32, i32
  }
}

</mosaic_0001>

<bundles_post_ra>
// kernel: densenet_forward.11
= control target key start
LH: loop header
LB: loop body
LE: loop exit
PB: predicated region body
PF: predicated region fallthrough
CT: control target
= control target key end

     0   :  { %s1125_s12 = smov 0   ;;  %s1329_s0 = inlined_call_operand.vmem [shape: bf16[1,512,147], index: 0, kind: input, shape index: {}]   ;;  %s1330_s1 = inlined_call_operand.vmem [shape: bf16[1,147,16], index: 1, kind: input, shape index: {}]   ;;  %s1331_s2 = inlined_call_operand.vmem [shape: f32[1,16], index: 2, kind: input, shape index: {}]   ;;  %s1332_s3 = inlined_call_operand.vmem [shape: bf16[512,16], index: 3, kind: output, shape index: {}]  }
   0x1 LB: > { %s871_s13 = sadd.s32 4294967295, %s1101_s12   ;;  %p875_p0 = scmp.ge.s32.totalorder %s1101_s12, 1  ;;  %s1101_s12 = sphi %s1125_s12, %s13_s12  }
   0x2   : > { %p139_p1 = scmp.lt.s32.totalorder %s1101_s12, 3 }
   0x4   : > { %p140_p2 = pnand %p875_p0, %p139_p1 }
   0x5   : > { %s876_s20 = sshll.u32 (!%p140_p2), %s871_s13, 5 }
   0x6   : > { %143 = sbr.rel (%p140_p2) target bundleno = 310 (0x136), region = 32  ;;  %p165_p3 = scmp.lt.s32.totalorder (!%p140_p2), %s876_s20, 63 }
   0xb   : > { %v1037_v0 = vld [vmem:[%s1330_s1 + $0x38] sm:$0xff]   ;;  %v1103_v1 = vmov 0   ;;  %v1038_v2 = vld [vmem:[%s1330_s1 + $0x30] sm:$0xff]   ;;  %v1039_v3 = vld [vmem:[%s1330_s1 + $0x28] sm:$0xff]   ;;  %s1334_s20 = smov (!%p165_p3, %s876_s20), 63  ;;  %vm437_vm0 = vcmask 154624  }
   0xc   : > { %493 = vmatprep.subr.bf16.mxu0 %v1103_v1  ;;  %1007 = vmatprep.subr.bf16.mxu1 %v1103_v1  ;;  %v1040_v4 = vld [vmem:[%s1330_s1 + $0x20] sm:$0xff]   ;;  %s974_s23 = sshll.u32 %s1334_s20, 3  ;;  %v1041_v5 = vld [vmem:[%s1330_s1 + $0x18] sm:$0xff]   ;;  %v1042_v8 = vld [vmem:[%s1330_s1 + $0x10] sm:$0xff]   ;;  %vm486_vm1 = vcmask 1040384   ;;  %vm487_vm2 = vcmask 1041408  }
   0xd   : > { %494 = vmatpush1.bf16.msra.mxu0 %v1037_v0  ;;  %1017 = vmatpush1.bf16.msra.mxu1 %v1037_v0  ;;  %s1151_s26 = scalar_lea.vmem %s1329_s0, %s974_s23  ;;  %v1043_v9 = vld [vmem:[%s1330_s1 + $0x8] sm:$0xff]   ;;  %v1104_v10 = vmov 65535   ;;  %v1044_v12 = vld [vmem:[%s1330_s1] sm:$0xff]   ;;  %s880_s15 = sshll.u32 %s1334_s20, 2  ;;  %vm782_vm3 = vcmask 125952  }
   0xe   : > { %495 = vmatprep.subr.bf16.mxu0 %v1103_v1  ;;  %1008 = vmatprep.subr.bf16.mxu1 %v1103_v1  ;;  %v1049_v6 = vld [vmem:[%s1151_s26 + $0x4] ss:$8 sps:$4 sm:$0xff]   ;;  %v488_v11 = vsel %vm486_vm1, 4294967295, %v1104_v10  ;;  %v1045_v13 = vld [vmem:[%s1330_s1 + $0x48] ss:$0 sps:$4 sm:$0x33]   ;;  %s1230_s18 = scalar_lea.vmem %s1332_s3, %s880_s15 }
   0xf   : > { %v1052_v7 = vld [vmem:[%s1151_s26 + $0x84] ss:$8 sps:$4 sm:$0xff]   ;;  %924 = vmatprep.mubr.msk.bf16.mxu0 %vm437_vm0, %v1049_v6  ;;  %v489_v14 = vsel %vm487_vm2, %v488_v11, 0  ;;  %v1047_v17 = vld [vmem:[%s1151_s26] ss:$8 sps:$4 sm:$0xff]  }
  0x10   : > { %932 = vmatprep.mubr.msk.bf16.mxu1 %vm437_vm0, %v1052_v7  ;;  %v491_v15 = vand.u32 %v1045_v13, %v489_v14  ;;  %v1046_v16 = vld [vmem:[%s1330_s1 + $0x40] sm:$0xff]   ;;  %v1053_v19 = vld [vmem:[%s1151_s26 + $0x14] ss:$8 sps:$4 sm:$0xff]   ;;  %v1057_v21 = vld [vmem:[%s1151_s26 + $0x10] ss:$8 sps:$4 sm:$0xff]  }
  0x11   : > { %496 = vmatpush1.bf16.msra.mxu0 %v1038_v2  ;;  %1018 = vmatpush1.bf16.msra.mxu1 %v1038_v2  ;;  %v1050_v18 = vld [vmem:[%s1151_s26 + $0x80] ss:$8 sps:$4 sm:$0xff]   ;;  %v1055_v20 = vld [vmem:[%s1151_s26 + $0x94] ss:$8 sps:$4 sm:$0xff]   ;;  %v1058_v22 = vld [vmem:[%s1151_s26 + $0x90] ss:$8 sps:$4 sm:$0xff]  }
  0x12   : > { %497 = vmatprep.subr.bf16.mxu0 %v1103_v1  ;;  %1009 = vmatprep.subr.bf16.mxu1 %v1103_v1  ;;  %v1059_v23 = vld [vmem:[%s1151_s26 + $0x24] ss:$8 sps:$4 sm:$0xff]   ;;  %v1063_v25 = vld [vmem:[%s1151_s26 + $0x20] ss:$8 sps:$4 sm:$0xff]   ;;  %v1065_v27 = vld [vmem:[%s1151_s26 + $0x34] ss:$8 sps:$4 sm:$0xff]  }
  0x13   : > { %v1061_v24 = vld [vmem:[%s1151_s26 + $0xa4] ss:$8 sps:$4 sm:$0xff]   ;;  %v1064_v26 = vld [vmem:[%s1151_s26 + $0xa0] ss:$8 sps:$4 sm:$0xff]   ;;  %v1067_v28 = vld [vmem:[%s1151_s26 + $0xb4] ss:$8 sps:$4 sm:$0xff]  }
  0x14   : > { %v1069_v29 = vld [vmem:[%s1151_s26 + $0x30] ss:$8 sps:$4 sm:$0xff]   ;;  %v1071_v31 = vld [vmem:[%s1151_s26 + $0x44] ss:$8 sps:$4 sm:$0xff]   ;;  %v1075_v33 = vld [vmem:[%s1151_s26 + $0x40] ss:$8 sps:$4 sm:$0xff]  }
  0x15   : > { %498 = vmatpush1.bf16.msra.mxu0 %v1039_v3  ;;  %1019 = vmatpush1.bf16.msra.mxu1 %v1039_v3  ;;  %v1070_v30 = vld [vmem:[%s1151_s26 + $0xb0] ss:$8 sps:$4 sm:$0xff]   ;;  %v1073_v32 = vld [vmem:[%s1151_s26 + $0xc4] ss:$8 sps:$4 sm:$0xff]   ;;  %v1076_v34 = vld [vmem:[%s1151_s26 + $0xc0] ss:$8 sps:$4 sm:$0xff]  }
  0x16   : > { %499 = vmatprep.subr.bf16.mxu0 %v1103_v1  ;;  %1010 = vmatprep.subr.bf16.mxu1 %v1103_v1  ;;  %v1077_v35 = vld [vmem:[%s1151_s26 + $0x54] ss:$8 sps:$4 sm:$0xff]   ;;  %v1081_v37 = vld [vmem:[%s1151_s26 + $0x50] ss:$8 sps:$4 sm:$0xff]   ;;  %v1083_v39 = vld [vmem:[%s1151_s26 + $0x64] ss:$8 sps:$4 sm:$0xff]  }
  0x17   : > { %v1079_v36 = vld [vmem:[%s1151_s26 + $0xd4] ss:$8 sps:$4 sm:$0xff]   ;;  %v1082_v38 = vld [vmem:[%s1151_s26 + $0xd0] ss:$8 sps:$4 sm:$0xff]   ;;  %v1085_v40 = vld [vmem:[%s1151_s26 + $0xe4] ss:$8 sps:$4 sm:$0xff]  }
  0x18   : > { %v1087_v41 = vld [vmem:[%s1151_s26 + $0x60] ss:$8 sps:$4 sm:$0xff]   ;;  %v1089_v43 = vld [vmem:[%s1151_s26 + $0x74] ss:$8 sps:$4 sm:$0xff]   ;;  %v1093_v45 = vld [vmem:[%s1151_s26 + $0x70] ss:$8 sps:$4 sm:$0xff]  }
  0x19   : > { %500 = vmatpush1.bf16.msra.mxu0 %v1040_v4  ;;  %1020 = vmatpush1.bf16.msra.mxu1 %v1040_v4  ;;  %v1088_v42 = vld [vmem:[%s1151_s26 + $0xe0] ss:$8 sps:$4 sm:$0xff]   ;;  %v1091_v44 = vld [vmem:[%s1151_s26 + $0xf4] ss:$8 sps:$4 sm:$0xff]   ;;  %v1094_v46 = vld [vmem:[%s1151_s26 + $0xf0] ss:$8 sps:$4 sm:$0xff]  }
  0x1a   : > { %501 = vmatprep.subr.bf16.mxu0 %v1103_v1  ;;  %1011 = vmatprep.subr.bf16.mxu1 %v1103_v1  ;;  %v1222_v47 = vld [vmem:[%s1331_s2] ss:$0 sm:$0xff] }
  0x1d   : > { %502 = vmatpush1.bf16.msra.mxu0 %v1041_v5  ;;  %1021 = vmatpush1.bf16.msra.mxu1 %v1041_v5 }
  0x1e   : > { %503 = vmatprep.subr.bf16.mxu0 %v1103_v1  ;;  %1012 = vmatprep.subr.bf16.mxu1 %v1103_v1 }
  0x21   : > { %504 = vmatpush1.bf16.msra.mxu0 %v1042_v8  ;;  %1022 = vmatpush1.bf16.msra.mxu1 %v1042_v8 }
  0x22   : > { %505 = vmatprep.subr.bf16.mxu0 %v1103_v1  ;;  %1013 = vmatprep.subr.bf16.mxu1 %v1103_v1 }
  0x25   : > { %506 = vmatpush1.bf16.msra.mxu0 %v1043_v9  ;;  %1023 = vmatpush1.bf16.msra.mxu1 %v1043_v9 }
  0x26   : > { %507 = vmatprep.subr.bf16.mxu0 %v1103_v1  ;;  %1014 = vmatprep.subr.bf16.mxu1 %v1103_v1 }
  0x29   : > { %508 = vmatpush1.bf16.msra.mxu0 %v1044_v12  ;;  %1024 = vmatpush1.bf16.msra.mxu1 %v1044_v12 }
  0x2a   : > { %521 = vmatprep.subr.bf16.mxu0 %v1103_v1  ;;  %1015 = vmatprep.subr.bf16.mxu1 %v1103_v1 }
  0x2d   : > { %522 = vmatpush2.bf16.msra.mxu0 %v491_v15  ;;  %1025 = vmatpush2.bf16.msra.mxu1 %v491_v15 }
  0x2e   : > { %523 = vmatprep.subr.bf16.mxu0 %v1103_v1  ;;  %1016 = vmatprep.subr.bf16.mxu1 %v1103_v1 }
  0x31   : > { %524 = vmatpush2.bf16.msra.mxu0 %v1046_v16  ;;  %1026 = vmatpush2.bf16.msra.mxu1 %v1046_v16 }
  0x34   : > { %526 = vmatmul.mubr.bf16.vlgmr.msra.gmra.mxu0 %v1047_v17  ;;  %590 = vmatmul.mubr.bf16.vlgmr.msra.gmra.mxu1 %v1050_v18 }
  0x35   : > { %925 = vmatprep.mubr.msk.bf16.mxu0 %vm437_vm0, %v1053_v19  ;;  %933 = vmatprep.mubr.msk.bf16.mxu1 %vm437_vm0, %v1055_v20 }
  0x3c   : > { %534 = vmatmul.mubr.bf16.gmra.mxu0 %v1057_v21  ;;  %598 = vmatmul.mubr.bf16.gmra.mxu1 %v1058_v22 }
  0x3d   : > { %926 = vmatprep.mubr.msk.bf16.mxu0 %vm437_vm0, %v1059_v23  ;;  %934 = vmatprep.mubr.msk.bf16.mxu1 %vm437_vm0, %v1061_v24 }
  0x44   : > { %542 = vmatmul.mubr.bf16.gmra.mxu0 %v1063_v25  ;;  %606 = vmatmul.mubr.bf16.gmra.mxu1 %v1064_v26 }
  0x45   : > { %927 = vmatprep.mubr.msk.bf16.mxu0 %vm437_vm0, %v1065_v27  ;;  %935 = vmatprep.mubr.msk.bf16.mxu1 %vm437_vm0, %v1067_v28 }
  0x4c   : > { %550 = vmatmul.mubr.bf16.gmra.mxu0 %v1069_v29  ;;  %614 = vmatmul.mubr.bf16.gmra.mxu1 %v1070_v30 }
  0x4d   : > { %928 = vmatprep.mubr.msk.bf16.mxu0 %vm437_vm0, %v1071_v31  ;;  %936 = vmatprep.mubr.msk.bf16.mxu1 %vm437_vm0, %v1073_v32 }
  0x54   : > { %558 = vmatmul.mubr.bf16.gmra.mxu0 %v1075_v33  ;;  %622 = vmatmul.mubr.bf16.gmra.mxu1 %v1076_v34 }
  0x55   : > { %929 = vmatprep.mubr.msk.bf16.mxu0 %vm437_vm0, %v1077_v35  ;;  %937 = vmatprep.mubr.msk.bf16.mxu1 %vm437_vm0, %v1079_v36 }
  0x5c   : > { %566 = vmatmul.mubr.bf16.gmra.mxu0 %v1081_v37  ;;  %630 = vmatmul.mubr.bf16.gmra.mxu1 %v1082_v38 }
  0x5d   : > { %930 = vmatprep.mubr.msk.bf16.mxu0 %vm437_vm0, %v1083_v39  ;;  %938 = vmatprep.mubr.msk.bf16.mxu1 %vm437_vm0, %v1085_v40 }
  0x64   : > { %574 = vmatmul.mubr.bf16.gmra.mxu0 %v1087_v41  ;;  %638 = vmatmul.mubr.bf16.gmra.mxu1 %v1088_v42 }
  0x65   : > { %931 = vmatprep.mubr.msk.bf16.mxu0 %vm437_vm0, %v1089_v43  ;;  %939 = vmatprep.mubr.msk.bf16.mxu1 %vm437_vm0, %v1091_v44 }
  0x6c   : > { %582 = vmatmul.mubr.bf16.gmra.mxu0 %v1093_v45  ;;  %646 = vmatmul.mubr.bf16.gmra.mxu1 %v1094_v46 }
  0xf4   : > { %v527_v48 = vpop.f32.mrf.mxu0  ;;  %v591_v49 = vpop.f32.mrf.mxu1 }
  0xf5   : > { %v528_v50 = vadd.f32 %v1222_v47, %v527_v48  ;;  %v592_v51 = vadd.f32 %v1222_v47, %v591_v49 }
  0xf6   : > { %v529_v52 = vpop.f32.mrf.mxu0  ;;  %v593_v53 = vpop.f32.mrf.mxu1 }
  0xf7   : > { %v975_v54 = vpack.c.bf16 %v528_v50, %v528_v50  ;;  %v991_v55 = vpack.c.bf16 %v592_v51, %v592_v51 }
  0xf8   : > { %v530_v56 = vpop.f32.mrf.mxu0  ;;  %v594_v57 = vpop.f32.mrf.mxu1 }
  0xf9   : > { %783 = vst.msk [vmem:[%s1230_s18] sm:$0xf] %vm782_vm3, %v975_v54  ;;  %799 = vst.msk [vmem:[%s1230_s18 + $0x40] sm:$0xf] %vm782_vm3, %v991_v55  ;;  %v531_v58 = vadd.f32 %v1222_v47, %v530_v56  ;;  %v595_v59 = vadd.f32 %v1222_v47, %v594_v57 }
  0xfa   : > { %v532_v60 = vpop.f32.mrf.mxu0  ;;  %v596_v61 = vpop.f32.mrf.mxu1 }
  0xfb   : > { %v976_v62 = vpack.c.bf16 %v531_v58, %v531_v58  ;;  %v992_v63 = vpack.c.bf16 %v595_v59, %v595_v59 }
  0xfc   : > { %v535_v0 = vpop.f32.mrf.mxu0  ;;  %v599_v1 = vpop.f32.mrf.mxu1 }
  0xfd   : > { %784 = vst.msk [vmem:[%s1230_s18 + $0x4] sm:$0xf] %vm782_vm3, %v976_v62  ;;  %800 = vst.msk [vmem:[%s1230_s18 + $0x44] sm:$0xf] %vm782_vm3, %v992_v63  ;;  %v536_v2 = vadd.f32 %v1222_v47, %v535_v0  ;;  %v600_v3 = vadd.f32 %v1222_v47, %v599_v1 }
  0xfe   : > { %v537_v4 = vpop.f32.mrf.mxu0  ;;  %v601_v5 = vpop.f32.mrf.mxu1 }
  0xff   : > { %v977_v6 = vpack.c.bf16 %v536_v2, %v536_v2  ;;  %v993_v7 = vpack.c.bf16 %v600_v3, %v600_v3 }
 0x100   : > { %v538_v8 = vpop.f32.mrf.mxu0  ;;  %v602_v9 = vpop.f32.mrf.mxu1 }
 0x101   : > { %785 = vst.msk [vmem:[%s1230_s18 + $0x8] sm:$0xf] %vm782_vm3, %v977_v6  ;;  %801 = vst.msk [vmem:[%s1230_s18 + $0x48] sm:$0xf] %vm782_vm3, %v993_v7  ;;  %v539_v10 = vadd.f32 %v1222_v47, %v538_v8  ;;  %v603_v11 = vadd.f32 %v1222_v47, %v602_v9 }
 0x102   : > { %v540_v12 = vpop.f32.mrf.mxu0  ;;  %v604_v13 = vpop.f32.mrf.mxu1 }
 0x103   : > { %v978_v14 = vpack.c.bf16 %v539_v10, %v539_v10  ;;  %v994_v15 = vpack.c.bf16 %v603_v11, %v603_v11 }
 0x104   : > { %v543_v16 = vpop.f32.mrf.mxu0  ;;  %v607_v17 = vpop.f32.mrf.mxu1 }
 0x105   : > { %786 = vst.msk [vmem:[%s1230_s18 + $0xc] sm:$0xf] %vm782_vm3, %v978_v14  ;;  %802 = vst.msk [vmem:[%s1230_s18 + $0x4c] sm:$0xf] %vm782_vm3, %v994_v15  ;;  %v544_v18 = vadd.f32 %v1222_v47, %v543_v16  ;;  %v608_v19 = vadd.f32 %v1222_v47, %v607_v17 }
 0x106   : > { %v545_v20 = vpop.f32.mrf.mxu0  ;;  %v609_v21 = vpop.f32.mrf.mxu1 }
 0x107   : > { %v979_v22 = vpack.c.bf16 %v544_v18, %v544_v18  ;;  %v995_v23 = vpack.c.bf16 %v608_v19, %v608_v19 }
 0x108   : > { %v546_v24 = vpop.f32.mrf.mxu0  ;;  %v610_v25 = vpop.f32.mrf.mxu1 }
 0x109   : > { %787 = vst.msk [vmem:[%s1230_s18 + $0x10] sm:$0xf] %vm782_vm3, %v979_v22  ;;  %803 = vst.msk [vmem:[%s1230_s18 + $0x50] sm:$0xf] %vm782_vm3, %v995_v23  ;;  %v547_v26 = vadd.f32 %v1222_v47, %v546_v24  ;;  %v611_v27 = vadd.f32 %v1222_v47, %v610_v25 }
 0x10a   : > { %v548_v28 = vpop.f32.mrf.mxu0  ;;  %v612_v29 = vpop.f32.mrf.mxu1 }
 0x10b   : > { %v980_v30 = vpack.c.bf16 %v547_v26, %v547_v26  ;;  %v996_v31 = vpack.c.bf16 %v611_v27, %v611_v27 }
 0x10c   : > { %v551_v32 = vpop.f32.mrf.mxu0  ;;  %v615_v33 = vpop.f32.mrf.mxu1 }
 0x10d   : > { %788 = vst.msk [vmem:[%s1230_s18 + $0x14] sm:$0xf] %vm782_vm3, %v980_v30  ;;  %804 = vst.msk [vmem:[%s1230_s18 + $0x54] sm:$0xf] %vm782_vm3, %v996_v31  ;;  %v552_v34 = vadd.f32 %v1222_v47, %v551_v32  ;;  %v616_v35 = vadd.f32 %v1222_v47, %v615_v33 }
 0x10e   : > { %v553_v36 = vpop.f32.mrf.mxu0  ;;  %v617_v37 = vpop.f32.mrf.mxu1 }
 0x10f   : > { %v981_v38 = vpack.c.bf16 %v552_v34, %v552_v34  ;;  %v997_v39 = vpack.c.bf16 %v616_v35, %v616_v35 }
 0x110   : > { %v554_v40 = vpop.f32.mrf.mxu0  ;;  %v618_v41 = vpop.f32.mrf.mxu1 }
 0x111   : > { %789 = vst.msk [vmem:[%s1230_s18 + $0x18] sm:$0xf] %vm782_vm3, %v981_v38  ;;  %805 = vst.msk [vmem:[%s1230_s18 + $0x58] sm:$0xf] %vm782_vm3, %v997_v39  ;;  %v555_v42 = vadd.f32 %v1222_v47, %v554_v40  ;;  %v619_v43 = vadd.f32 %v1222_v47, %v618_v41 }
 0x112   : > { %v556_v44 = vpop.f32.mrf.mxu0  ;;  %v620_v45 = vpop.f32.mrf.mxu1 }
 0x113   : > { %v982_v46 = vpack.c.bf16 %v555_v42, %v555_v42  ;;  %v998_v48 = vpack.c.bf16 %v619_v43, %v619_v43 }
 0x114   : > { %v559_v49 = vpop.f32.mrf.mxu0  ;;  %v623_v50 = vpop.f32.mrf.mxu1 }
 0x115   : > { %790 = vst.msk [vmem:[%s1230_s18 + $0x1c] sm:$0xf] %vm782_vm3, %v982_v46  ;;  %806 = vst.msk [vmem:[%s1230_s18 + $0x5c] sm:$0xf] %vm782_vm3, %v998_v48  ;;  %v560_v51 = vadd.f32 %v1222_v47, %v559_v49  ;;  %v624_v52 = vadd.f32 %v1222_v47, %v623_v50 }
 0x116   : > { %v561_v53 = vpop.f32.mrf.mxu0  ;;  %v625_v54 = vpop.f32.mrf.mxu1 }
 0x117   : > { %v983_v55 = vpack.c.bf16 %v560_v51, %v560_v51  ;;  %v999_v56 = vpack.c.bf16 %v624_v52, %v624_v52 }
 0x118   : > { %v562_v57 = vpop.f32.mrf.mxu0  ;;  %v626_v58 = vpop.f32.mrf.mxu1 }
 0x119   : > { %791 = vst.msk [vmem:[%s1230_s18 + $0x20] sm:$0xf] %vm782_vm3, %v983_v55  ;;  %807 = vst.msk [vmem:[%s1230_s18 + $0x60] sm:$0xf] %vm782_vm3, %v999_v56  ;;  %v563_v59 = vadd.f32 %v1222_v47, %v562_v57  ;;  %v627_v60 = vadd.f32 %v1222_v47, %v626_v58 }
 0x11a   : > { %v564_v61 = vpop.f32.mrf.mxu0  ;;  %v628_v62 = vpop.f32.mrf.mxu1 }
 0x11b   : > { %v984_v63 = vpack.c.bf16 %v563_v59, %v563_v59  ;;  %v1000_v0 = vpack.c.bf16 %v627_v60, %v627_v60 }
 0x11c   : > { %v567_v1 = vpop.f32.mrf.mxu0  ;;  %v631_v2 = vpop.f32.mrf.mxu1 }
 0x11d   : > { %792 = vst.msk [vmem:[%s1230_s18 + $0x24] sm:$0xf] %vm782_vm3, %v984_v63  ;;  %808 = vst.msk [vmem:[%s1230_s18 + $0x64] sm:$0xf] %vm782_vm3, %v1000_v0  ;;  %v568_v3 = vadd.f32 %v1222_v47, %v567_v1  ;;  %v632_v4 = vadd.f32 %v1222_v47, %v631_v2 }
 0x11e   : > { %v569_v5 = vpop.f32.mrf.mxu0  ;;  %v633_v6 = vpop.f32.mrf.mxu1 }
 0x11f   : > { %v985_v7 = vpack.c.bf16 %v568_v3, %v568_v3  ;;  %v1001_v8 = vpack.c.bf16 %v632_v4, %v632_v4 }
 0x120   : > { %v570_v9 = vpop.f32.mrf.mxu0  ;;  %v634_v10 = vpop.f32.mrf.mxu1 }
 0x121   : > { %793 = vst.msk [vmem:[%s1230_s18 + $0x28] sm:$0xf] %vm782_vm3, %v985_v7  ;;  %809 = vst.msk [vmem:[%s1230_s18 + $0x68] sm:$0xf] %vm782_vm3, %v1001_v8  ;;  %v571_v11 = vadd.f32 %v1222_v47, %v570_v9  ;;  %v635_v12 = vadd.f32 %v1222_v47, %v634_v10 }
 0x122   : > { %v572_v13 = vpop.f32.mrf.mxu0  ;;  %v636_v14 = vpop.f32.mrf.mxu1 }
 0x123   : > { %v986_v15 = vpack.c.bf16 %v571_v11, %v571_v11  ;;  %v1002_v16 = vpack.c.bf16 %v635_v12, %v635_v12 }
 0x124   : > { %v575_v17 = vpop.f32.mrf.mxu0  ;;  %v639_v18 = vpop.f32.mrf.mxu1 }
 0x125   : > { %794 = vst.msk [vmem:[%s1230_s18 + $0x2c] sm:$0xf] %vm782_vm3, %v986_v15  ;;  %810 = vst.msk [vmem:[%s1230_s18 + $0x6c] sm:$0xf] %vm782_vm3, %v1002_v16  ;;  %v576_v19 = vadd.f32 %v1222_v47, %v575_v17  ;;  %v640_v20 = vadd.f32 %v1222_v47, %v639_v18 }
 0x126   : > { %v577_v21 = vpop.f32.mrf.mxu0  ;;  %v641_v22 = vpop.f32.mrf.mxu1 }
 0x127   : > { %v987_v23 = vpack.c.bf16 %v576_v19, %v576_v19  ;;  %v1003_v24 = vpack.c.bf16 %v640_v20, %v640_v20 }
 0x128   : > { %v578_v25 = vpop.f32.mrf.mxu0  ;;  %v642_v26 = vpop.f32.mrf.mxu1 }
 0x129   : > { %795 = vst.msk [vmem:[%s1230_s18 + $0x30] sm:$0xf] %vm782_vm3, %v987_v23  ;;  %811 = vst.msk [vmem:[%s1230_s18 + $0x70] sm:$0xf] %vm782_vm3, %v1003_v24  ;;  %v579_v27 = vadd.f32 %v1222_v47, %v578_v25  ;;  %v643_v28 = vadd.f32 %v1222_v47, %v642_v26 }
 0x12a   : > { %v580_v29 = vpop.f32.mrf.mxu0  ;;  %v644_v30 = vpop.f32.mrf.mxu1 }
 0x12b   : > { %v988_v31 = vpack.c.bf16 %v579_v27, %v579_v27  ;;  %v1004_v32 = vpack.c.bf16 %v643_v28, %v643_v28 }
 0x12c   : > { %v583_v33 = vpop.f32.mrf.mxu0  ;;  %v647_v34 = vpop.f32.mrf.mxu1 }
 0x12d   : > { %796 = vst.msk [vmem:[%s1230_s18 + $0x34] sm:$0xf] %vm782_vm3, %v988_v31  ;;  %812 = vst.msk [vmem:[%s1230_s18 + $0x74] sm:$0xf] %vm782_vm3, %v1004_v32  ;;  %v584_v35 = vadd.f32 %v1222_v47, %v583_v33  ;;  %v648_v36 = vadd.f32 %v1222_v47, %v647_v34 }
 0x12e   : > { %v585_v37 = vpop.f32.mrf.mxu0  ;;  %v649_v38 = vpop.f32.mrf.mxu1 }
 0x12f   : > { %v989_v39 = vpack.c.bf16 %v584_v35, %v584_v35  ;;  %v1005_v40 = vpack.c.bf16 %v648_v36, %v648_v36 }
 0x130   : > { %v586_v41 = vpop.f32.mrf.mxu0  ;;  %v650_v42 = vpop.f32.mrf.mxu1 }
 0x131   : > { %797 = vst.msk [vmem:[%s1230_s18 + $0x38] sm:$0xf] %vm782_vm3, %v989_v39  ;;  %813 = vst.msk [vmem:[%s1230_s18 + $0x78] sm:$0xf] %vm782_vm3, %v1005_v40  ;;  %v587_v43 = vadd.f32 %v1222_v47, %v586_v41  ;;  %v651_v44 = vadd.f32 %v1222_v47, %v650_v42 }
 0x132   : > { %v588_v45 = vpop.f32.mrf.mxu0  ;;  %v652_v46 = vpop.f32.mrf.mxu1 }
 0x133   : > { %v990_v48 = vpack.c.bf16 %v587_v43, %v587_v43  ;;  %v1006_v49 = vpack.c.bf16 %v651_v44, %v651_v44 }
 0x135   : > { %798 = vst.msk [vmem:[%s1230_s18 + $0x3c] sm:$0xf] %vm782_vm3, %v990_v48  ;;  %814 = vst.msk [vmem:[%s1230_s18 + $0x7c] sm:$0xf] %vm782_vm3, %v1006_v49 }
 0x136 PF: > { %s13_s12 = sadd.s32 1, %s1101_s12  }
 0x137   : > { %p10_p4 = scmp.ge.s32.totalorder %s13_s12, 4  }
 0x139   :  { %12 = sbr.rel (!%p10_p4) target bundleno = 1 (0x1), region = 62 }

// kernel: densenet_forward.12
= control target key start
LH: loop header
LB: loop body
LE: loop exit
PB: predicated region body
PF: predicated region fallthrough
CT: control target
= control target key end

     0   :  { %s1098_s6 = smov 0   ;;  %s1100_s7 = smov 0   ;;  %s1439_s0 = inlined_call_operand.vmem [shape: bf16[9,128,16], index: 0, kind: input, shape index: {}]   ;;  %s1440_s1 = inlined_call_operand.vmem [shape: bf16[128,16], index: 1, kind: output, shape index: {}]  }
   0x1   :  { %s1102_s8 = smov 0  }
   0x2 LB: > { %s831_s9 = sadd.s32 4294967295, %s1086_s8   ;;  %s1115_s10 = sadd.s32 1, %s1086_s8   ;;  %s1086_s8 = sphi %s1102_s8, %s1443_s8   ;;  %s1082_s7 = sphi %s1100_s7, %s1442_s7   ;;  %s1078_s6 = sphi %s1098_s6, %s1441_s6  }
   0x3   : > { %s15_s11 = ssub.s32 %s1086_s8, %s1115_s10  ;;  %s18_s12 = sadd.s32 1, %s1082_s7 }
   0x4   : > { %p16_p0 = scmp.eq.s32.totalorder %s15_s11, 0  ;;  %p25_p1 = scmp.ne.s32.totalorder %s1082_s7, %s1078_s6 }
   0x5   : > { %p26_p2 = scmp.eq.s32.totalorder %s1086_s8, 0  ;;  %p834_p4 = scmp.ge.s32.totalorder %s1086_s8, 2 }
   0x6   : > { %s1124_s13 = scalar_select %p16_p0, %s1082_s7, %s18_s12  }
   0x7   : > { %p27_p3 = por %p26_p2, %p25_p1  ;;  %77 = sbr.rel (%p834_p4) target bundleno = 35 (0x23), region = 16 }
   0xc   : > { %80 = sbr.rel (!%p27_p3) target bundleno = 35 (0x23), region = 20  ;;  %s82_s14 = sand.u32 (%p27_p3), 1, %s1082_s7  }
   0xd   : > { %s850_s15 = sshll.u32 (%p27_p3), %s1086_s8, 5  ;;  %s1038_s16 = smul.u32 (%p27_p3), 288, %s82_s14 }
   0xe   : > { %s1132_s19 = scalar_lea.vmem (%p27_p3), %s1439_s0, %s850_s15 }
   0xf   : > { %v104_v0 = vld [vmem:[%s1132_s19] sm:$0xff] (%p27_p3)   ;;  %v108_v1 = vld [vmem:[%s1132_s19 + $0x8] sm:$0xff] (%p27_p3)   ;;  %v112_v2 = vld [vmem:[%s1132_s19 + $0x10] sm:$0xff] (%p27_p3)   ;;  %s1140_s20 = scalar_lea.vmem (%p27_p3), [#allocation2], %s1038_s16 }
  0x10   : > { %v116_v3 = vld [vmem:[%s1132_s19 + $0x18] sm:$0xff] (%p27_p3)   ;;  %v120_v4 = vld [vmem:[%s1132_s19 + $0x40] sm:$0xff] (%p27_p3)   ;;  %v124_v5 = vld [vmem:[%s1132_s19 + $0x48] sm:$0xff] (%p27_p3)   ;;  %105 = vst [vmem:[%s1140_s20] sm:$0xff] (%p27_p3), %v104_v0  }
  0x11   : > { %109 = vst [vmem:[%s1140_s20 + $0x8] sm:$0xff] %v108_v1   ;;  %113 = vst [vmem:[%s1140_s20 + $0x10] sm:$0xff] %v112_v2   ;;  %v128_v6 = vld [vmem:[%s1132_s19 + $0x50] sm:$0xff]   ;;  %v132_v7 = vld [vmem:[%s1132_s19 + $0x58] sm:$0xff]  }
  0x12   : > { %117 = vst [vmem:[%s1140_s20 + $0x18] sm:$0xff] %v116_v3   ;;  %121 = vst [vmem:[%s1140_s20 + $0x20] sm:$0xff] %v120_v4   ;;  %v136_v8 = vld [vmem:[%s1132_s19 + $0x80] sm:$0xff]   ;;  %v140_v9 = vld [vmem:[%s1132_s19 + $0x88] sm:$0xff]  }
  0x13   : > { %125 = vst [vmem:[%s1140_s20 + $0x28] sm:$0xff] %v124_v5   ;;  %129 = vst [vmem:[%s1140_s20 + $0x30] sm:$0xff] %v128_v6   ;;  %v144_v10 = vld [vmem:[%s1132_s19 + $0x90] sm:$0xff]   ;;  %v148_v11 = vld [vmem:[%s1132_s19 + $0x98] sm:$0xff]  }
  0x14   : > { %133 = vst [vmem:[%s1140_s20 + $0x38] sm:$0xff] %v132_v7   ;;  %137 = vst [vmem:[%s1140_s20 + $0x40] sm:$0xff] %v136_v8   ;;  %v152_v12 = vld [vmem:[%s1132_s19 + $0xc0] sm:$0xff]   ;;  %v156_v13 = vld [vmem:[%s1132_s19 + $0xc8] sm:$0xff]  }
  0x15   : > { %141 = vst [vmem:[%s1140_s20 + $0x48] sm:$0xff] %v140_v9   ;;  %145 = vst [vmem:[%s1140_s20 + $0x50] sm:$0xff] %v144_v10   ;;  %v160_v14 = vld [vmem:[%s1132_s19 + $0xd0] sm:$0xff]   ;;  %v164_v15 = vld [vmem:[%s1132_s19 + $0xd8] sm:$0xff]  }
  0x16   : > { %149 = vst [vmem:[%s1140_s20 + $0x58] sm:$0xff] %v148_v11   ;;  %153 = vst [vmem:[%s1140_s20 + $0x60] sm:$0xff] %v152_v12   ;;  %v168_v16 = vld [vmem:[%s1132_s19 + $0x100] sm:$0xff]   ;;  %v172_v17 = vld [vmem:[%s1132_s19 + $0x108] sm:$0xff]  }
  0x17   : > { %157 = vst [vmem:[%s1140_s20 + $0x68] sm:$0xff] %v156_v13   ;;  %161 = vst [vmem:[%s1140_s20 + $0x70] sm:$0xff] %v160_v14   ;;  %v176_v18 = vld [vmem:[%s1132_s19 + $0x110] sm:$0xff]   ;;  %v180_v19 = vld [vmem:[%s1132_s19 + $0x118] sm:$0xff]  }
  0x18   : > { %165 = vst [vmem:[%s1140_s20 + $0x78] sm:$0xff] %v164_v15   ;;  %169 = vst [vmem:[%s1140_s20 + $0x80] sm:$0xff] %v168_v16   ;;  %v184_v20 = vld [vmem:[%s1132_s19 + $0x140] sm:$0xff]   ;;  %v188_v21 = vld [vmem:[%s1132_s19 + $0x148] sm:$0xff]  }
  0x19   : > { %173 = vst [vmem:[%s1140_s20 + $0x88] sm:$0xff] %v172_v17   ;;  %177 = vst [vmem:[%s1140_s20 + $0x90] sm:$0xff] %v176_v18   ;;  %v192_v22 = vld [vmem:[%s1132_s19 + $0x150] sm:$0xff]   ;;  %v196_v23 = vld [vmem:[%s1132_s19 + $0x158] sm:$0xff]  }
  0x1a   : > { %181 = vst [vmem:[%s1140_s20 + $0x98] sm:$0xff] %v180_v19   ;;  %185 = vst [vmem:[%s1140_s20 + $0xa0] sm:$0xff] %v184_v20   ;;  %v200_v24 = vld [vmem:[%s1132_s19 + $0x180] sm:$0xff]   ;;  %v204_v25 = vld [vmem:[%s1132_s19 + $0x188] sm:$0xff]  }
  0x1b   : > { %189 = vst [vmem:[%s1140_s20 + $0xa8] sm:$0xff] %v188_v21   ;;  %193 = vst [vmem:[%s1140_s20 + $0xb0] sm:$0xff] %v192_v22   ;;  %v208_v26 = vld [vmem:[%s1132_s19 + $0x190] sm:$0xff]   ;;  %v212_v27 = vld [vmem:[%s1132_s19 + $0x198] sm:$0xff]  }
  0x1c   : > { %197 = vst [vmem:[%s1140_s20 + $0xb8] sm:$0xff] %v196_v23   ;;  %201 = vst [vmem:[%s1140_s20 + $0xc0] sm:$0xff] %v200_v24   ;;  %v216_v28 = vld [vmem:[%s1132_s19 + $0x1c0] sm:$0xff]   ;;  %v220_v29 = vld [vmem:[%s1132_s19 + $0x1c8] sm:$0xff]  }
  0x1d   : > { %205 = vst [vmem:[%s1140_s20 + $0xc8] sm:$0xff] %v204_v25   ;;  %209 = vst [vmem:[%s1140_s20 + $0xd0] sm:$0xff] %v208_v26   ;;  %v224_v30 = vld [vmem:[%s1132_s19 + $0x1d0] sm:$0xff]   ;;  %v228_v31 = vld [vmem:[%s1132_s19 + $0x1d8] sm:$0xff]  }
  0x1e   : > { %213 = vst [vmem:[%s1140_s20 + $0xd8] sm:$0xff] %v212_v27   ;;  %217 = vst [vmem:[%s1140_s20 + $0xe0] sm:$0xff] %v216_v28   ;;  %v232_v32 = vld [vmem:[%s1132_s19 + $0x200] sm:$0xff]   ;;  %v236_v33 = vld [vmem:[%s1132_s19 + $0x208] sm:$0xff]  }
  0x1f   : > { %221 = vst [vmem:[%s1140_s20 + $0xe8] sm:$0xff] %v220_v29   ;;  %225 = vst [vmem:[%s1140_s20 + $0xf0] sm:$0xff] %v224_v30   ;;  %v240_v34 = vld [vmem:[%s1132_s19 + $0x210] sm:$0xff]   ;;  %v244_v35 = vld [vmem:[%s1132_s19 + $0x218] sm:$0xff]  }
  0x20   : > { %229 = vst [vmem:[%s1140_s20 + $0xf8] sm:$0xff] %v228_v31   ;;  %233 = vst [vmem:[%s1140_s20 + $0x100] sm:$0xff] %v232_v32  }
  0x21   : > { %237 = vst [vmem:[%s1140_s20 + $0x108] sm:$0xff] %v236_v33   ;;  %241 = vst [vmem:[%s1140_s20 + $0x110] sm:$0xff] %v240_v34  }
  0x22   : > { %245 = vst [vmem:[%s1140_s20 + $0x118] sm:$0xff] %v244_v35  }
  0x23 PF: > { %p837_p5 = scmp.ge.s32.totalorder %s1086_s8, 1  ;;  %p414_p6 = scmp.lt.s32.totalorder %s1086_s8, 3 }
  0x25   : > { %p415_p7 = pnand %p837_p5, %p414_p6 }
  0x26   : > { %s421_s21 = sand.u32 (!%p415_p7), 1, %s1078_s6   ;;  %s1235_s24 = sshll.u32 (!%p415_p7), %s831_s9, 3 }
  0x27   : > { %418 = sbr.rel (%p415_p7) target bundleno = 111 (0x6f), region = 61  ;;  %p442_p8 = scmp.lt.s32.totalorder (!%p415_p7), %s1235_s24, 15 }
  0x28   : > { %s1039_s22 = smul.u32 (!%p415_p7), 288, %s421_s21 }
  0x2a   : > { %s1211_s23 = scalar_lea.vmem (!%p415_p7), [#allocation2], %s1039_s22 }
  0x2c   : > { %v860_v36 = vld [vmem:[%s1211_s23] sm:$0xff]   ;;  %vm591_vm0 = vcmask 130048   ;;  %v1245_v6 = vld [vmem:[%s1211_s23 + $0x8] sm:$0xff]   ;;  %vm760_vm1 = vcmask 125952   ;;  %s1445_s24 = smov (!%p442_p8, %s1235_s24), 15 }
  0x2d   : > { %v1006_v37 = vld [vmem:[%s1211_s23 + $0x20] sm:$0xff]   ;;  %v861_v39 = vunpack.c.l.bf16 %v860_v36  ;;  %v862_v54 = vunpack.c.h.bf16 %v860_v36  ;;  %v1248_v7 = vld [vmem:[%s1211_s23 + $0x28] sm:$0xff]   ;;  %v865_v20 = vunpack.c.l.bf16 %v1245_v6  ;;  %s839_s25 = sshll.u32 %s1445_s24, 2 }
  0x2e   : > { %v1010_v38 = vld [vmem:[%s1211_s23 + $0x40] sm:$0xff]   ;;  %v877_v40 = vunpack.c.l.bf16 %v1006_v37  ;;  %v878_v55 = vunpack.c.h.bf16 %v1006_v37  ;;  %v1253_v12 = vld [vmem:[%s1211_s23 + $0x48] sm:$0xff]   ;;  %v881_v21 = vunpack.c.l.bf16 %v1248_v7  ;;  %s1309_s28 = scalar_lea.vmem %s1440_s1, %s839_s25 }
  0x2f   : > { %v893_v41 = vunpack.c.l.bf16 %v1010_v38  ;;  %v1014_v42 = vld [vmem:[%s1211_s23 + $0x60] sm:$0xff]   ;;  %v592_v51 = vsel %vm591_vm0, %v861_v39, -inf  ;;  %v894_v61 = vunpack.c.h.bf16 %v1010_v38  ;;  %v609_v3 = vsel %vm591_vm0, %v862_v54, -inf  ;;  %v1256_v13 = vld [vmem:[%s1211_s23 + $0x68] sm:$0xff]  }
  0x30   : > { %v1018_v43 = vld [vmem:[%s1211_s23 + $0x80] sm:$0xff]   ;;  %v909_v45 = vunpack.c.l.bf16 %v1014_v42  ;;  %v593_v52 = vsel %vm591_vm0, %v877_v40, -inf  ;;  %v910_v62 = vunpack.c.h.bf16 %v1014_v42  ;;  %v610_v4 = vsel %vm591_vm0, %v878_v55, -inf  ;;  %v1265_v22 = vld [vmem:[%s1211_s23 + $0x88] sm:$0xff]  }
  0x31   : > { %v1022_v44 = vld [vmem:[%s1211_s23 + $0xa0] sm:$0xff]   ;;  %v925_v48 = vunpack.c.l.bf16 %v1018_v43  ;;  %v595_v53 = vsel %vm591_vm0, %v893_v41, -inf  ;;  %v594_v58 = vmax.f32 %v592_v51, %v593_v52  ;;  %v926_v2 = vunpack.c.h.bf16 %v1018_v43  ;;  %v1279_v31 = vld [vmem:[%s1211_s23 + $0xa8] sm:$0xff]  }
  0x32   : > { %v1220_v46 = vld [vmem:[%s1211_s23 + $0xc0] sm:$0xff]   ;;  %v941_v49 = vunpack.c.l.bf16 %v1022_v44  ;;  %v597_v60 = vsel %vm591_vm0, %v909_v45, -inf  ;;  %v612_v5 = vsel %vm591_vm0, %v894_v61, -inf  ;;  %v942_v10 = vunpack.c.h.bf16 %v1022_v44  ;;  %v1282_v32 = vld [vmem:[%s1211_s23 + $0xc8] sm:$0xff]  }
  0x33   : > { %v1223_v47 = vld [vmem:[%s1211_s23 + $0xe0] sm:$0xff]   ;;  %v957_v56 = vunpack.c.l.bf16 %v1220_v46  ;;  %v596_v63 = vmax.f32 %v594_v58, %v595_v53  ;;  %v599_v0 = vsel %vm591_vm0, %v925_v48, -inf  ;;  %v611_v11 = vmax.f32 %v609_v3, %v610_v4  ;;  %v1286_v34 = vld [vmem:[%s1211_s23 + $0xe8] sm:$0xff]   ;;  %v1317_v3 = vld [vmem:[%s1211_s23 + $0x10] sm:$0xff]  }
  0x34   : > { %v1226_v50 = vld [vmem:[%s1211_s23 + $0x100] sm:$0xff]   ;;  %v973_v57 = vunpack.c.l.bf16 %v1223_v47  ;;  %v601_v1 = vsel %vm591_vm0, %v941_v49, -inf  ;;  %v958_v16 = vunpack.c.h.bf16 %v1220_v46  ;;  %v614_v17 = vsel %vm591_vm0, %v910_v62, -inf  ;;  %v1299_v49 = vld [vmem:[%s1211_s23 + $0x108] sm:$0xff]  }
  0x35   : > { %v989_v59 = vunpack.c.l.bf16 %v1226_v50  ;;  %v598_v8 = vmax.f32 %v596_v63, %v597_v60  ;;  %v603_v9 = vsel %vm591_vm0, %v957_v56, -inf  ;;  %v613_v19 = vmax.f32 %v611_v11, %v612_v5 }
  0x36   : > { %v605_v14 = vsel %vm591_vm0, %v973_v57, -inf  ;;  %v974_v23 = vunpack.c.h.bf16 %v1223_v47  ;;  %v616_v24 = vsel %vm591_vm0, %v926_v2, -inf  ;;  %v897_v25 = vunpack.c.l.bf16 %v1253_v12 }
  0x37   : > { %v607_v15 = vsel %vm591_vm0, %v989_v59, -inf  ;;  %v600_v18 = vmax.f32 %v598_v8, %v599_v0  ;;  %v913_v26 = vunpack.c.l.bf16 %v1256_v13  ;;  %v990_v28 = vunpack.c.h.bf16 %v1226_v50  ;;  %v1008_v8 = vld [vmem:[%s1211_s23 + $0x30] sm:$0xff]  }
  0x38   : > { %v615_v29 = vmax.f32 %v613_v19, %v614_v17  ;;  %v618_v30 = vsel %vm591_vm0, %v942_v10, -inf  ;;  %v929_v33 = vunpack.c.l.bf16 %v1265_v22  ;;  %v626_v35 = vsel %vm591_vm0, %v865_v20, -inf }
  0x39   : > { %v602_v27 = vmax.f32 %v600_v18, %v601_v1  ;;  %v627_v36 = vsel %vm591_vm0, %v881_v21, -inf  ;;  %v629_v37 = vsel %vm591_vm0, %v897_v25, -inf  ;;  %v620_v40 = vsel %vm591_vm0, %v958_v16, -inf }
  0x3a   : > { %v617_v39 = vmax.f32 %v615_v29, %v616_v24  ;;  %v628_v41 = vmax.f32 %v626_v35, %v627_v36  ;;  %v622_v42 = vsel %vm591_vm0, %v974_v23, -inf  ;;  %v945_v43 = vunpack.c.l.bf16 %v1279_v31  ;;  %v1336_v23 = vld [vmem:[%s1211_s23 + $0x90] sm:$0xff]  }
  0x3b   : > { %v604_v38 = vmax.f32 %v602_v27, %v603_v9  ;;  %v961_v44 = vunpack.c.l.bf16 %v1282_v32  ;;  %v631_v45 = vsel %vm591_vm0, %v913_v26, -inf  ;;  %v977_v48 = vunpack.c.l.bf16 %v1286_v34 }
  0x3c   : > { %v619_v47 = vmax.f32 %v617_v39, %v618_v30  ;;  %v630_v50 = vmax.f32 %v628_v41, %v629_v37  ;;  %v633_v51 = vsel %vm591_vm0, %v929_v33, -inf  ;;  %v866_v52 = vunpack.c.h.bf16 %v1245_v6  ;;  %v1349_v33 = vld [vmem:[%s1211_s23 + $0xd0] sm:$0xff]  }
  0x3d   : > { %v606_v46 = vmax.f32 %v604_v38, %v605_v14  ;;  %v882_v53 = vunpack.c.h.bf16 %v1248_v7  ;;  %v898_v54 = vunpack.c.h.bf16 %v1253_v12  ;;  %v624_v57 = vsel %vm591_vm0, %v990_v28, -inf  ;;  %v1329_v14 = vld [vmem:[%s1211_s23 + $0x70] sm:$0xff]  }
  0x3e   : > { %v621_v56 = vmax.f32 %v619_v47, %v620_v40  ;;  %v632_v58 = vmax.f32 %v630_v50, %v631_v45  ;;  %v993_v59 = vunpack.c.l.bf16 %v1299_v49  ;;  %v635_v60 = vsel %vm591_vm0, %v945_v43, -inf }
  0x3f   : > { %v608_v55 = vmax.f32 %v606_v46, %v607_v15  ;;  %v637_v61 = vsel %vm591_vm0, %v961_v44, -inf  ;;  %v914_v62 = vunpack.c.h.bf16 %v1256_v13  ;;  %v643_v2 = vsel %vm591_vm0, %v866_v52, -inf  ;;  %v1012_v13 = vld [vmem:[%s1211_s23 + $0x50] sm:$0xff]  }
  0x40   : > { %v623_v0 = vmax.f32 %v621_v56, %v622_v42  ;;  %v634_v1 = vmax.f32 %v632_v58, %v633_v51  ;;  %v639_v4 = vsel %vm591_vm0, %v977_v48, -inf  ;;  %v930_v5 = vunpack.c.h.bf16 %v1265_v22  ;;  %v1369_v56 = vld [vmem:[%s1211_s23 + $0x110] sm:$0xff]  }
  0x41   : > { %v851_v63 = vpack.c.bf16 %v608_v55, %v608_v55  ;;  %v644_v6 = vsel %vm591_vm0, %v882_v53, -inf  ;;  %v646_v7 = vsel %vm591_vm0, %v898_v54, -inf  ;;  %v946_v11 = vunpack.c.h.bf16 %v1279_v31 }
  0x42   : > { %v625_v9 = vmax.f32 %v623_v0, %v624_v57  ;;  %v636_v10 = vmax.f32 %v634_v1, %v635_v60  ;;  %v645_v12 = vmax.f32 %v643_v2, %v644_v6  ;;  %v641_v15 = vsel %vm591_vm0, %v993_v59, -inf }
  0x43   : > { %761 = vst.msk [vmem:[%s1309_s28] sm:$0xf] %vm760_vm1, %v851_v63  ;;  %v962_v16 = vunpack.c.h.bf16 %v1282_v32  ;;  %v648_v17 = vsel %vm591_vm0, %v914_v62, -inf  ;;  %v869_v18 = vunpack.c.l.bf16 %v1317_v3  ;;  %v885_v22 = vunpack.c.l.bf16 %v1008_v8  ;;  %v1346_v32 = vld [vmem:[%s1211_s23 + $0xb0] sm:$0xff]  }
  0x44   : > { %v852_v19 = vpack.c.bf16 %v625_v9, %v625_v9  ;;  %v638_v20 = vmax.f32 %v636_v10, %v637_v61  ;;  %v647_v21 = vmax.f32 %v645_v12, %v646_v7  ;;  %v978_v24 = vunpack.c.h.bf16 %v1286_v34  ;;  %v1353_v34 = vld [vmem:[%s1211_s23 + $0xf0] sm:$0xff]   ;;  %v1013_v9 = vld [vmem:[%s1211_s23 + $0x58] sm:$0xff]  }
  0x45   : > { %v650_v25 = vsel %vm591_vm0, %v930_v5, -inf  ;;  %v901_v26 = vunpack.c.l.bf16 %v1012_v13  ;;  %v917_v27 = vunpack.c.l.bf16 %v1329_v14  ;;  %v994_v29 = vunpack.c.h.bf16 %v1299_v49 }
  0x46   : > { %762 = vst.msk [vmem:[%s1309_s28 + $0x4] sm:$0xf] %vm760_vm1, %v852_v19  ;;  %v640_v28 = vmax.f32 %v638_v20, %v639_v4  ;;  %v649_v30 = vmax.f32 %v647_v21, %v648_v17  ;;  %v652_v31 = vsel %vm591_vm0, %v946_v11, -inf  ;;  %v933_v35 = vunpack.c.l.bf16 %v1336_v23  ;;  %v1009_v4 = vld [vmem:[%s1211_s23 + $0x38] sm:$0xff]  }
  0x47   : > { %v660_v36 = vsel %vm591_vm0, %v869_v18, -inf  ;;  %v661_v37 = vsel %vm591_vm0, %v885_v22, -inf  ;;  %v663_v38 = vsel %vm591_vm0, %v901_v26, -inf  ;;  %v654_v41 = vsel %vm591_vm0, %v962_v16, -inf }
  0x48   : > { %v642_v39 = vmax.f32 %v640_v28, %v641_v15  ;;  %v651_v40 = vmax.f32 %v649_v30, %v650_v25  ;;  %v662_v42 = vmax.f32 %v660_v36, %v661_v37  ;;  %v656_v43 = vsel %vm591_vm0, %v978_v24, -inf  ;;  %v1025_v28 = vld [vmem:[%s1211_s23 + $0xb8] sm:$0xff]  }
  0x49   : > { %v949_v44 = vunpack.c.l.bf16 %v1346_v32  ;;  %v965_v45 = vunpack.c.l.bf16 %v1349_v33  ;;  %v665_v46 = vsel %vm591_vm0, %v917_v27, -inf  ;;  %v981_v49 = vunpack.c.l.bf16 %v1353_v34 }
  0x4a   : > { %v853_v47 = vpack.c.bf16 %v642_v39, %v642_v39  ;;  %v653_v48 = vmax.f32 %v651_v40, %v652_v31  ;;  %v664_v50 = vmax.f32 %v662_v42, %v663_v38  ;;  %v667_v51 = vsel %vm591_vm0, %v933_v35, -inf }
  0x4b   : > { %v870_v52 = vunpack.c.h.bf16 %v1317_v3  ;;  %v886_v53 = vunpack.c.h.bf16 %v1008_v8  ;;  %v902_v54 = vunpack.c.h.bf16 %v1012_v13  ;;  %v918_v58 = vunpack.c.h.bf16 %v1329_v14  ;;  %v1005_v3 = vld [vmem:[%s1211_s23 + $0x18] sm:$0xff]  }
  0x4c   : > { %763 = vst.msk [vmem:[%s1309_s28 + $0x8] sm:$0xf] %vm760_vm1, %v853_v47  ;;  %v655_v55 = vmax.f32 %v653_v48, %v654_v41  ;;  %v666_v57 = vmax.f32 %v664_v50, %v665_v46  ;;  %v658_v59 = vsel %vm591_vm0, %v994_v29, -inf  ;;  %v669_v60 = vsel %vm591_vm0, %v949_v44, -inf  ;;  %v1017_v14 = vld [vmem:[%s1211_s23 + $0x78] sm:$0xff]  }
  0x4d   : > { %v934_v61 = vunpack.c.h.bf16 %v1336_v23  ;;  %v677_v62 = vsel %vm591_vm0, %v870_v52, -inf  ;;  %v678_v1 = vsel %vm591_vm0, %v886_v53, -inf  ;;  %v680_v2 = vsel %vm591_vm0, %v902_v54, -inf  ;;  %v1021_v23 = vld [vmem:[%s1211_s23 + $0x98] sm:$0xff]  }
  0x4e   : > { %v657_v63 = vmax.f32 %v655_v55, %v656_v43  ;;  %v668_v0 = vmax.f32 %v666_v57, %v667_v51  ;;  %v997_v5 = vunpack.c.l.bf16 %v1369_v56  ;;  %v671_v6 = vsel %vm591_vm0, %v965_v45, -inf  ;;  %v1033_v45 = vld [vmem:[%s1211_s23 + $0xf8] sm:$0xff]  }
  0x4f   : > { %v673_v7 = vsel %vm591_vm0, %v981_v49, -inf  ;;  %v679_v8 = vmax.f32 %v677_v62, %v678_v1  ;;  %v950_v12 = vunpack.c.h.bf16 %v1346_v32  ;;  %v682_v13 = vsel %vm591_vm0, %v918_v58, -inf  ;;  %v1029_v32 = vld [vmem:[%s1211_s23 + $0xd8] sm:$0xff]  }
  0x50   : > { %v659_v10 = vmax.f32 %v657_v63, %v658_v59  ;;  %v670_v11 = vmax.f32 %v668_v0, %v669_v60  ;;  %v966_v15 = vunpack.c.h.bf16 %v1349_v33  ;;  %v873_v17 = vunpack.c.l.bf16 %v1005_v3  ;;  %v1037_v52 = vld [vmem:[%s1211_s23 + $0x118] sm:$0xff]  }
  0x51   : > { %v681_v16 = vmax.f32 %v679_v8, %v680_v2  ;;  %v889_v18 = vunpack.c.l.bf16 %v1009_v4  ;;  %v684_v21 = vsel %vm591_vm0, %v934_v61, -inf  ;;  %v905_v22 = vunpack.c.l.bf16 %v1013_v9 }
  0x52   : > { %v854_v19 = vpack.c.bf16 %v659_v10, %v659_v10  ;;  %v672_v20 = vmax.f32 %v670_v11, %v671_v6  ;;  %v675_v24 = vsel %vm591_vm0, %v997_v5, -inf  ;;  %v982_v25 = vunpack.c.h.bf16 %v1353_v34 }
  0x53   : > { %v683_v26 = vmax.f32 %v681_v16, %v682_v13  ;;  %v921_v27 = vunpack.c.l.bf16 %v1017_v14  ;;  %v998_v30 = vunpack.c.h.bf16 %v1369_v56  ;;  %v686_v31 = vsel %vm591_vm0, %v950_v12, -inf }
  0x54   : > { %764 = vst.msk [vmem:[%s1309_s28 + $0xc] sm:$0xf] %vm760_vm1, %v854_v19  ;;  %v674_v29 = vmax.f32 %v672_v20, %v673_v7  ;;  %v694_v33 = vsel %vm591_vm0, %v873_v17, -inf  ;;  %v937_v36 = vunpack.c.l.bf16 %v1021_v23  ;;  %v695_v37 = vsel %vm591_vm0, %v889_v18, -inf }
  0x55   : > { %v685_v35 = vmax.f32 %v683_v26, %v684_v21  ;;  %v697_v34 = vsel %vm591_vm0, %v905_v22, -inf  ;;  %v688_v39 = vsel %vm591_vm0, %v966_v15, -inf  ;;  %v953_v40 = vunpack.c.l.bf16 %v1025_v28 }
  0x56   : > { %v676_v38 = vmax.f32 %v674_v29, %v675_v24  ;;  %v696_v41 = vmax.f32 %v694_v33, %v695_v37  ;;  %v690_v43 = vsel %vm591_vm0, %v982_v25, -inf  ;;  %v969_v44 = vunpack.c.l.bf16 %v1029_v32 }
  0x57   : > { %v687_v42 = vmax.f32 %v685_v35, %v686_v31  ;;  %v699_v46 = vsel %vm591_vm0, %v921_v27, -inf  ;;  %v874_v49 = vunpack.c.h.bf16 %v1005_v3  ;;  %v890_v50 = vunpack.c.h.bf16 %v1009_v4 }
  0x58   : > { %v855_v47 = vpack.c.bf16 %v676_v38, %v676_v38  ;;  %v698_v48 = vmax.f32 %v696_v41, %v697_v34  ;;  %v701_v53 = vsel %vm591_vm0, %v937_v36, -inf  ;;  %v906_v54 = vunpack.c.h.bf16 %v1013_v9 }
  0x59   : > { %v689_v51 = vmax.f32 %v687_v42, %v688_v39  ;;  %v922_v55 = vunpack.c.h.bf16 %v1017_v14  ;;  %v692_v56 = vsel %vm591_vm0, %v998_v30, -inf  ;;  %v985_v57 = vunpack.c.l.bf16 %v1033_v45 }
  0x5a   : > { %765 = vst.msk [vmem:[%s1309_s28 + $0x10] sm:$0xf] %vm760_vm1, %v855_v47  ;;  %v700_v58 = vmax.f32 %v698_v48, %v699_v46  ;;  %v703_v59 = vsel %vm591_vm0, %v953_v40, -inf  ;;  %v938_v61 = vunpack.c.h.bf16 %v1021_v23  ;;  %v711_v62 = vsel %vm591_vm0, %v874_v49, -inf }
  0x5b   : > { %v691_v60 = vmax.f32 %v689_v51, %v690_v43  ;;  %v712_v63 = vsel %vm591_vm0, %v890_v50, -inf  ;;  %v1001_v0 = vunpack.c.l.bf16 %v1037_v52  ;;  %v714_v3 = vsel %vm591_vm0, %v906_v54, -inf }
  0x5c   : > { %v702_v1 = vmax.f32 %v700_v58, %v701_v53  ;;  %v713_v2 = vmax.f32 %v711_v62, %v712_v63  ;;  %v705_v5 = vsel %vm591_vm0, %v969_v44, -inf  ;;  %v954_v6 = vunpack.c.h.bf16 %v1025_v28 }
  0x5d   : > { %v693_v4 = vmax.f32 %v691_v60, %v692_v56  ;;  %v716_v7 = vsel %vm591_vm0, %v922_v55, -inf  ;;  %v707_v11 = vsel %vm591_vm0, %v985_v57, -inf  ;;  %v970_v12 = vunpack.c.h.bf16 %v1029_v32 }
  0x5e   : > { %v704_v8 = vmax.f32 %v702_v1, %v703_v59  ;;  %v715_v9 = vmax.f32 %v713_v2, %v714_v3  ;;  %v718_v13 = vsel %vm591_vm0, %v938_v61, -inf  ;;  %v709_v16 = vsel %vm591_vm0, %v1001_v0, -inf }
  0x5f   : > { %v856_v10 = vpack.c.bf16 %v693_v4, %v693_v4  ;;  %v986_v17 = vunpack.c.h.bf16 %v1033_v45  ;;  %v720_v18 = vsel %vm591_vm0, %v954_v6, -inf  ;;  %v1002_v21 = vunpack.c.h.bf16 %v1037_v52 }
  0x60   : > { %v706_v14 = vmax.f32 %v704_v8, %v705_v5  ;;  %v717_v15 = vmax.f32 %v715_v9, %v716_v7  ;;  %v722_v22 = vsel %vm591_vm0, %v970_v12, -inf }
  0x61   : > { %766 = vst.msk [vmem:[%s1309_s28 + $0x14] sm:$0xf] %vm760_vm1, %v856_v10  ;;  %v724_v25 = vsel %vm591_vm0, %v986_v17, -inf  ;;  %v726_v28 = vsel %vm591_vm0, %v1002_v21, -inf }
  0x62   : > { %v708_v19 = vmax.f32 %v706_v14, %v707_v11  ;;  %v719_v20 = vmax.f32 %v717_v15, %v718_v13 }
  0x64   : > { %v710_v23 = vmax.f32 %v708_v19, %v709_v16  ;;  %v721_v24 = vmax.f32 %v719_v20, %v720_v18 }
  0x66   : > { %v857_v26 = vpack.c.bf16 %v710_v23, %v710_v23  ;;  %v723_v27 = vmax.f32 %v721_v24, %v722_v22 }
  0x68   : > { %767 = vst.msk [vmem:[%s1309_s28 + $0x18] sm:$0xf] %vm760_vm1, %v857_v26  ;;  %v725_v29 = vmax.f32 %v723_v27, %v724_v25 }
  0x6a   : > { %v727_v30 = vmax.f32 %v725_v29, %v726_v28 }
  0x6c   : > { %v858_v31 = vpack.c.bf16 %v727_v30, %v727_v30 }
  0x6e   : > { %768 = vst.msk [vmem:[%s1309_s28 + $0x1c] sm:$0xf] %vm760_vm1, %v858_v31 }
  0x6f PF: > { %p8_p9 = scmp.ge.s32.totalorder %s1115_s10, 4   ;;  %s1441_s6 = smov %s1082_s7 }
  0x70   : > { %s1442_s7 = smov %s1124_s13  ;;  %s1443_s8 = smov %s1115_s10 }
  0x71   :  { %10 = sbr.rel (!%p8_p9) target bundleno = 2 (0x2), region = 100 }

// kernel: densenet_forward.13
= control target key start
LH: loop header
LB: loop body
LE: loop exit
PB: predicated region body
PF: predicated region fallthrough
CT: control target
= control target key end

     0   :  { %s2152_s12 = smov 0   ;;  %s2154_s13 = smov 0   ;;  %s2434_s0 = inlined_call_operand.vmem [shape: bf16[9,128,16], index: 0, kind: input, shape index: {}]   ;;  %s2435_s1 = inlined_call_operand.vmem [shape: bf16[9,16,8], index: 1, kind: input, shape index: {}]   ;;  %s2436_s2 = inlined_call_operand.vmem [shape: f32[1,8], index: 2, kind: input, shape index: {}]   ;;  %s2437_s3 = inlined_call_operand.vmem [shape: bf16[128,8], index: 3, kind: output, shape index: {}]  }
   0x1   :  { %s2156_s14 = smov 0  }
   0x2 LB: > { %s1710_s15 = sadd.s32 4294967295, %s2130_s14   ;;  %s2169_s16 = sadd.s32 1, %s2130_s14   ;;  %s2130_s14 = sphi %s2156_s14, %s2440_s14   ;;  %s2126_s13 = sphi %s2154_s13, %s2439_s13   ;;  %s2122_s12 = sphi %s2152_s12, %s2438_s12  }
   0x3   : > { %s17_s17 = ssub.s32 %s2130_s14, %s2169_s16  ;;  %s20_s18 = sadd.s32 1, %s2126_s13 }
   0x4   : > { %p18_p0 = scmp.eq.s32.totalorder %s17_s17, 0  ;;  %p27_p1 = scmp.ne.s32.totalorder %s2126_s13, %s2122_s12 }
   0x5   : > { %p28_p2 = scmp.eq.s32.totalorder %s2130_s14, 0  ;;  %p1713_p4 = scmp.ge.s32.totalorder %s2130_s14, 2 }
   0x6   : > { %s2178_s19 = scalar_select %p18_p0, %s2126_s13, %s20_s18  }
   0x7   : > { %p29_p3 = por %p28_p2, %p27_p1  ;;  %127 = sbr.rel (%p1713_p4) target bundleno = 35 (0x23), region = 24 }
   0xc   : > { %130 = sbr.rel (!%p29_p3) target bundleno = 35 (0x23), region = 28  ;;  %s132_s20 = sand.u32 (%p29_p3), 1, %s2126_s13  }
   0xd   : > { %s1891_s21 = sshll.u32 (%p29_p3), %s2130_s14, 5  ;;  %s2037_s22 = smul.u32 (%p29_p3), 288, %s132_s20 }
   0xe   : > { %s2186_s25 = scalar_lea.vmem (%p29_p3), %s2434_s0, %s1891_s21 }
   0xf   : > { %v154_v0 = vld [vmem:[%s2186_s25] sm:$0xff] (%p29_p3)   ;;  %v158_v1 = vld [vmem:[%s2186_s25 + $0x8] sm:$0xff] (%p29_p3)   ;;  %v162_v2 = vld [vmem:[%s2186_s25 + $0x10] sm:$0xff] (%p29_p3)   ;;  %s2194_s26 = scalar_lea.vmem (%p29_p3), [#allocation2], %s2037_s22 }
  0x10   : > { %v166_v3 = vld [vmem:[%s2186_s25 + $0x18] sm:$0xff] (%p29_p3)   ;;  %v170_v4 = vld [vmem:[%s2186_s25 + $0x40] sm:$0xff] (%p29_p3)   ;;  %v174_v5 = vld [vmem:[%s2186_s25 + $0x48] sm:$0xff] (%p29_p3)   ;;  %155 = vst [vmem:[%s2194_s26] sm:$0xff] (%p29_p3), %v154_v0  }
  0x11   : > { %159 = vst [vmem:[%s2194_s26 + $0x8] sm:$0xff] %v158_v1   ;;  %163 = vst [vmem:[%s2194_s26 + $0x10] sm:$0xff] %v162_v2   ;;  %v178_v6 = vld [vmem:[%s2186_s25 + $0x50] sm:$0xff]   ;;  %v182_v7 = vld [vmem:[%s2186_s25 + $0x58] sm:$0xff]  }
  0x12   : > { %167 = vst [vmem:[%s2194_s26 + $0x18] sm:$0xff] %v166_v3   ;;  %171 = vst [vmem:[%s2194_s26 + $0x20] sm:$0xff] %v170_v4   ;;  %v186_v8 = vld [vmem:[%s2186_s25 + $0x80] sm:$0xff]   ;;  %v190_v9 = vld [vmem:[%s2186_s25 + $0x88] sm:$0xff]  }
  0x13   : > { %175 = vst [vmem:[%s2194_s26 + $0x28] sm:$0xff] %v174_v5   ;;  %179 = vst [vmem:[%s2194_s26 + $0x30] sm:$0xff] %v178_v6   ;;  %v194_v10 = vld [vmem:[%s2186_s25 + $0x90] sm:$0xff]   ;;  %v198_v11 = vld [vmem:[%s2186_s25 + $0x98] sm:$0xff]  }
  0x14   : > { %183 = vst [vmem:[%s2194_s26 + $0x38] sm:$0xff] %v182_v7   ;;  %187 = vst [vmem:[%s2194_s26 + $0x40] sm:$0xff] %v186_v8   ;;  %v202_v12 = vld [vmem:[%s2186_s25 + $0xc0] sm:$0xff]   ;;  %v206_v13 = vld [vmem:[%s2186_s25 + $0xc8] sm:$0xff]  }
  0x15   : > { %191 = vst [vmem:[%s2194_s26 + $0x48] sm:$0xff] %v190_v9   ;;  %195 = vst [vmem:[%s2194_s26 + $0x50] sm:$0xff] %v194_v10   ;;  %v210_v14 = vld [vmem:[%s2186_s25 + $0xd0] sm:$0xff]   ;;  %v214_v15 = vld [vmem:[%s2186_s25 + $0xd8] sm:$0xff]  }
  0x16   : > { %199 = vst [vmem:[%s2194_s26 + $0x58] sm:$0xff] %v198_v11   ;;  %203 = vst [vmem:[%s2194_s26 + $0x60] sm:$0xff] %v202_v12   ;;  %v218_v16 = vld [vmem:[%s2186_s25 + $0x100] sm:$0xff]   ;;  %v222_v17 = vld [vmem:[%s2186_s25 + $0x108] sm:$0xff]  }
  0x17   : > { %207 = vst [vmem:[%s2194_s26 + $0x68] sm:$0xff] %v206_v13   ;;  %211 = vst [vmem:[%s2194_s26 + $0x70] sm:$0xff] %v210_v14   ;;  %v226_v18 = vld [vmem:[%s2186_s25 + $0x110] sm:$0xff]   ;;  %v230_v19 = vld [vmem:[%s2186_s25 + $0x118] sm:$0xff]  }
  0x18   : > { %215 = vst [vmem:[%s2194_s26 + $0x78] sm:$0xff] %v214_v15   ;;  %219 = vst [vmem:[%s2194_s26 + $0x80] sm:$0xff] %v218_v16   ;;  %v234_v20 = vld [vmem:[%s2186_s25 + $0x140] sm:$0xff]   ;;  %v238_v21 = vld [vmem:[%s2186_s25 + $0x148] sm:$0xff]  }
  0x19   : > { %223 = vst [vmem:[%s2194_s26 + $0x88] sm:$0xff] %v222_v17   ;;  %227 = vst [vmem:[%s2194_s26 + $0x90] sm:$0xff] %v226_v18   ;;  %v242_v22 = vld [vmem:[%s2186_s25 + $0x150] sm:$0xff]   ;;  %v246_v23 = vld [vmem:[%s2186_s25 + $0x158] sm:$0xff]  }
  0x1a   : > { %231 = vst [vmem:[%s2194_s26 + $0x98] sm:$0xff] %v230_v19   ;;  %235 = vst [vmem:[%s2194_s26 + $0xa0] sm:$0xff] %v234_v20   ;;  %v250_v24 = vld [vmem:[%s2186_s25 + $0x180] sm:$0xff]   ;;  %v254_v25 = vld [vmem:[%s2186_s25 + $0x188] sm:$0xff]  }
  0x1b   : > { %239 = vst [vmem:[%s2194_s26 + $0xa8] sm:$0xff] %v238_v21   ;;  %243 = vst [vmem:[%s2194_s26 + $0xb0] sm:$0xff] %v242_v22   ;;  %v258_v26 = vld [vmem:[%s2186_s25 + $0x190] sm:$0xff]   ;;  %v262_v27 = vld [vmem:[%s2186_s25 + $0x198] sm:$0xff]  }
  0x1c   : > { %247 = vst [vmem:[%s2194_s26 + $0xb8] sm:$0xff] %v246_v23   ;;  %251 = vst [vmem:[%s2194_s26 + $0xc0] sm:$0xff] %v250_v24   ;;  %v266_v28 = vld [vmem:[%s2186_s25 + $0x1c0] sm:$0xff]   ;;  %v270_v29 = vld [vmem:[%s2186_s25 + $0x1c8] sm:$0xff]  }
  0x1d   : > { %255 = vst [vmem:[%s2194_s26 + $0xc8] sm:$0xff] %v254_v25   ;;  %259 = vst [vmem:[%s2194_s26 + $0xd0] sm:$0xff] %v258_v26   ;;  %v274_v30 = vld [vmem:[%s2186_s25 + $0x1d0] sm:$0xff]   ;;  %v278_v31 = vld [vmem:[%s2186_s25 + $0x1d8] sm:$0xff]  }
  0x1e   : > { %263 = vst [vmem:[%s2194_s26 + $0xd8] sm:$0xff] %v262_v27   ;;  %267 = vst [vmem:[%s2194_s26 + $0xe0] sm:$0xff] %v266_v28   ;;  %v282_v32 = vld [vmem:[%s2186_s25 + $0x200] sm:$0xff]   ;;  %v286_v33 = vld [vmem:[%s2186_s25 + $0x208] sm:$0xff]  }
  0x1f   : > { %271 = vst [vmem:[%s2194_s26 + $0xe8] sm:$0xff] %v270_v29   ;;  %275 = vst [vmem:[%s2194_s26 + $0xf0] sm:$0xff] %v274_v30   ;;  %v290_v34 = vld [vmem:[%s2186_s25 + $0x210] sm:$0xff]   ;;  %v294_v35 = vld [vmem:[%s2186_s25 + $0x218] sm:$0xff]  }
  0x20   : > { %279 = vst [vmem:[%s2194_s26 + $0xf8] sm:$0xff] %v278_v31   ;;  %283 = vst [vmem:[%s2194_s26 + $0x100] sm:$0xff] %v282_v32  }
  0x21   : > { %287 = vst [vmem:[%s2194_s26 + $0x108] sm:$0xff] %v286_v33   ;;  %291 = vst [vmem:[%s2194_s26 + $0x110] sm:$0xff] %v290_v34  }
  0x22   : > { %295 = vst [vmem:[%s2194_s26 + $0x118] sm:$0xff] %v294_v35  }
  0x23 PF: > { %p1716_p5 = scmp.ge.s32.totalorder %s2130_s14, 1  ;;  %p464_p6 = scmp.lt.s32.totalorder %s2130_s14, 3 }
  0x25   : > { %p465_p7 = pnand %p1716_p5, %p464_p6 }
  0x26   : > { %s471_s29 = sand.u32 (!%p465_p7), 1, %s2122_s12   ;;  %s1717_s26 = sshll.u32 (!%p465_p7), %s1710_s15, 3 }
  0x27   : > { %468 = sbr.rel (%p465_p7) target bundleno = 321 (0x141), region = 69  ;;  %p496_p8 = scmp.lt.s32.totalorder (!%p465_p7), %s1717_s26, 15 }
  0x28   : > { %s2038_s30 = smul.u32 (!%p465_p7), 288, %s471_s29 }
  0x2a   : > { %s2274_s8 = scalar_lea.vmem (!%p465_p7), [#allocation2], %s2038_s30 }
  0x2c   : > { %v2063_v36 = vld [vmem:[%s2435_s1 + $0x8] sm:$0xff]   ;;  %vm550_vm0 = vcmask 130048   ;;  %v2066_v37 = vld [vmem:[%s2435_s1] sm:$0xff]   ;;  %v2069_v38 = vld [vmem:[%s2435_s1 + $0x10] sm:$0xff]   ;;  %s2442_s26 = smov (!%p496_p8, %s1717_s26), 15  ;;  %vm1639_vm1 = vcmask 60416  }
  0x2d   : > { %2035 = vmatprep.subr.bf16.mxu1 %v2063_v36  ;;  %1945 = vmatprep.subr.bf16.mxu0 %v2063_v36  ;;  %v2064_v39 = vld [vmem:[%s2274_s8 + $0x20] sm:$0xff]   ;;  %v2065_v40 = vld [vmem:[%s2274_s8 + $0x30] sm:$0xff]   ;;  %v2067_v41 = vld [vmem:[%s2274_s8 + $0x28] sm:$0xff]   ;;  %s1718_s27 = sshll.u32 %s2442_s26, 2 }
  0x2e   : > { %2036 = vmatpush3.bf16.msra.mxu1 %v2063_v36  ;;  %1946 = vmatpush3.bf16.msra.mxu0 %v2063_v36  ;;  %v2068_v42 = vld [vmem:[%s2274_s8 + $0x38] sm:$0xff]   ;;  %v2070_v43 = vld [vmem:[%s2274_s8] sm:$0xff]   ;;  %v2073_v46 = vld [vmem:[%s2274_s8 + $0x8] sm:$0xff]   ;;  %s2398_s30 = scalar_lea.vmem %s2437_s3, %s1718_s27 }
  0x2f   : > { %1955 = vmatprep.subr.bf16.mxu1 %v2066_v37  ;;  %1965 = vmatprep.subr.bf16.mxu0 %v2069_v38  ;;  %v2071_v44 = vld [vmem:[%s2274_s8 + $0x40] sm:$0xff]   ;;  %v2072_v45 = vld [vmem:[%s2435_s1 + $0x18] sm:$0xff]   ;;  %v2074_v47 = vld [vmem:[%s2274_s8 + $0x48] sm:$0xff]  }
  0x30   : > { %1947 = vmatprep.mubr.msk.bf16.mxu0 %vm550_vm0, %v2064_v39  ;;  %1951 = vmatprep.mubr.msk.bf16.mxu1 %vm550_vm0, %v2065_v40  ;;  %v2075_v48 = vld [vmem:[%s2435_s1 + $0x20] sm:$0xff]   ;;  %v2076_v49 = vld [vmem:[%s2274_s8 + $0x10] sm:$0xff]   ;;  %v2078_v51 = vld [vmem:[%s2274_s8 + $0x18] sm:$0xff]  }
  0x31   : > { %1948 = vmatmul.mubr.msk.bf16.vlgmr.msra.gmra.mxu0 %vm550_vm0, %v2067_v41  ;;  %1952 = vmatmul.mubr.msk.bf16.vlgmr.msra.gmra.mxu1 %vm550_vm0, %v2068_v42  ;;  %v2077_v50 = vld [vmem:[%s2274_s8 + $0x50] sm:$0xff]   ;;  %v2079_v52 = vld [vmem:[%s2274_s8 + $0x58] sm:$0xff]   ;;  %v2082_v53 = vld [vmem:[%s2435_s1 + $0x28] sm:$0xff]  }
  0x32   : > { %1966 = vmatpush3.bf16.msra.mxu0 %v2069_v38  ;;  %1956 = vmatpush3.bf16.msra.mxu1 %v2066_v37  ;;  %v2081_v54 = vld [vmem:[%s2274_s8 + $0x80] sm:$0xff]   ;;  %v2085_v56 = vld [vmem:[%s2435_s1 + $0x30] sm:$0xff]   ;;  %v2083_v57 = vld [vmem:[%s2274_s8 + $0x68] sm:$0xff]  }
  0x33   : > { %1957 = vmatprep.mubr.msk.bf16.mxu1 %vm550_vm0, %v2070_v43  ;;  %1967 = vmatprep.mubr.msk.bf16.mxu0 %vm550_vm0, %v2071_v44  ;;  %v2080_v55 = vld [vmem:[%s2274_s8 + $0x60] sm:$0xff]   ;;  %v2084_v58 = vld [vmem:[%s2274_s8 + $0x88] sm:$0xff]   ;;  %v2086_v59 = vld [vmem:[%s2274_s8 + $0x70] sm:$0xff]  }
  0x34   : > { %1975 = vmatprep.subr.bf16.mxu1 %v2072_v45  ;;  %1985 = vmatprep.subr.bf16.mxu0 %v2075_v48  ;;  %v2087_v60 = vld [vmem:[%s2274_s8 + $0x90] sm:$0xff]   ;;  %v2092_v61 = vld [vmem:[%s2435_s1 + $0x38] sm:$0xff]   ;;  %v2095_v62 = vld [vmem:[%s2435_s1 + $0x40] sm:$0xff]  }
  0x35   : > { %v2088_v63 = vld [vmem:[%s2274_s8 + $0x78] sm:$0xff]   ;;  %v2091_v1 = vld [vmem:[%s2274_s8 + $0xc0] sm:$0xff]   ;;  %v2094_v3 = vld [vmem:[%s2274_s8 + $0xc8] sm:$0xff]  }
  0x36   : > { %v2089_v0 = vld [vmem:[%s2274_s8 + $0x98] sm:$0xff]   ;;  %v2090_v2 = vld [vmem:[%s2274_s8 + $0xa0] sm:$0xff]   ;;  %v2093_v4 = vld [vmem:[%s2274_s8 + $0xa8] sm:$0xff]  }
  0x37   : > { %v2096_v5 = vld [vmem:[%s2274_s8 + $0xb0] sm:$0xff]   ;;  %v2099_v7 = vld [vmem:[%s2274_s8 + $0xd8] sm:$0xff]   ;;  %v2101_v9 = vld [vmem:[%s2274_s8 + $0x100] sm:$0xff]  }
  0x38   : > { %v2097_v6 = vld [vmem:[%s2274_s8 + $0xd0] sm:$0xff]   ;;  %v2098_v8 = vld [vmem:[%s2274_s8 + $0xb8] sm:$0xff]   ;;  %v2100_v10 = vld [vmem:[%s2274_s8 + $0xe0] sm:$0xff]  }
  0x39   : > { %1968 = vmatmul.mubr.msk.bf16.vlgmr.msra.gmra.mxu0 %vm550_vm0, %v2074_v47  ;;  %1958 = vmatmul.mubr.msk.bf16.vlgmr.msra.gmra.mxu1 %vm550_vm0, %v2073_v46  ;;  %v2103_v11 = vld [vmem:[%s2274_s8 + $0x108] sm:$0xff]   ;;  %v2105_v13 = vld [vmem:[%s2274_s8 + $0x110] sm:$0xff]   ;;  %v2107_v15 = vld [vmem:[%s2274_s8 + $0x118] sm:$0xff]  }
  0x3a   : > { %1986 = vmatpush3.bf16.msra.mxu0 %v2075_v48  ;;  %1976 = vmatpush3.bf16.msra.mxu1 %v2072_v45  ;;  %v2102_v12 = vld [vmem:[%s2274_s8 + $0xe8] sm:$0xff]   ;;  %v2104_v14 = vld [vmem:[%s2274_s8 + $0xf0] sm:$0xff]   ;;  %v2106_v16 = vld [vmem:[%s2274_s8 + $0xf8] sm:$0xff]  }
  0x3b   : > { %1961 = vmatprep.mubr.msk.bf16.mxu1 %vm550_vm0, %v2076_v49  ;;  %1971 = vmatprep.mubr.msk.bf16.mxu0 %vm550_vm0, %v2077_v50 }
  0x3c   : > { %1995 = vmatprep.subr.bf16.mxu1 %v2082_v53  ;;  %2005 = vmatprep.subr.bf16.mxu0 %v2085_v56 }
  0x41   : > { %1972 = vmatmul.mubr.msk.bf16.gmra.mxu0 %vm550_vm0, %v2079_v52  ;;  %1962 = vmatmul.mubr.msk.bf16.gmra.mxu1 %vm550_vm0, %v2078_v51 }
  0x42   : > { %1987 = vmatprep.mubr.msk.bf16.mxu0 %vm550_vm0, %v2081_v54  ;;  %1977 = vmatprep.mubr.msk.bf16.mxu1 %vm550_vm0, %v2080_v55 }
  0x49   : > { %1988 = vmatmul.mubr.msk.bf16.vlgmr.msra.gmra.mxu0 %vm550_vm0, %v2084_v58  ;;  %1978 = vmatmul.mubr.msk.bf16.vlgmr.msra.gmra.mxu1 %vm550_vm0, %v2083_v57 }
  0x4a   : > { %2006 = vmatpush3.bf16.msra.mxu0 %v2085_v56  ;;  %1996 = vmatpush3.bf16.msra.mxu1 %v2082_v53 }
  0x4b   : > { %1981 = vmatprep.mubr.msk.bf16.mxu1 %vm550_vm0, %v2086_v59  ;;  %1991 = vmatprep.mubr.msk.bf16.mxu0 %vm550_vm0, %v2087_v60 }
  0x4c   : > { %2015 = vmatprep.subr.bf16.mxu1 %v2092_v61  ;;  %2025 = vmatprep.subr.bf16.mxu0 %v2095_v62 }
  0x51   : > { %1992 = vmatmul.mubr.msk.bf16.gmra.mxu0 %vm550_vm0, %v2089_v0  ;;  %1982 = vmatmul.mubr.msk.bf16.gmra.mxu1 %vm550_vm0, %v2088_v63 }
  0x52   : > { %2007 = vmatprep.mubr.msk.bf16.mxu0 %vm550_vm0, %v2091_v1  ;;  %1997 = vmatprep.mubr.msk.bf16.mxu1 %vm550_vm0, %v2090_v2 }
  0x59   : > { %2008 = vmatmul.mubr.msk.bf16.vlgmr.msra.gmra.mxu0 %vm550_vm0, %v2094_v3  ;;  %1998 = vmatmul.mubr.msk.bf16.vlgmr.msra.gmra.mxu1 %vm550_vm0, %v2093_v4 }
  0x5a   : > { %2026 = vmatpush3.bf16.msra.mxu0 %v2095_v62  ;;  %2016 = vmatpush3.bf16.msra.mxu1 %v2092_v61 }
  0x5b   : > { %2001 = vmatprep.mubr.msk.bf16.mxu1 %vm550_vm0, %v2096_v5  ;;  %2011 = vmatprep.mubr.msk.bf16.mxu0 %vm550_vm0, %v2097_v6 }
  0x61   : > { %2012 = vmatmul.mubr.msk.bf16.gmra.mxu0 %vm550_vm0, %v2099_v7  ;;  %2002 = vmatmul.mubr.msk.bf16.gmra.mxu1 %vm550_vm0, %v2098_v8 }
  0x62   : > { %2027 = vmatprep.mubr.msk.bf16.mxu0 %vm550_vm0, %v2101_v9  ;;  %2017 = vmatprep.mubr.msk.bf16.mxu1 %vm550_vm0, %v2100_v10 }
  0x69   : > { %2028 = vmatmul.mubr.msk.bf16.vlgmr.msra.gmra.mxu0 %vm550_vm0, %v2103_v11  ;;  %2018 = vmatmul.mubr.msk.bf16.vlgmr.msra.gmra.mxu1 %vm550_vm0, %v2102_v12 }
  0x6a   : > { %2031 = vmatprep.mubr.msk.bf16.mxu0 %vm550_vm0, %v2105_v13  ;;  %2021 = vmatprep.mubr.msk.bf16.mxu1 %vm550_vm0, %v2104_v14 }
  0x71   : > { %2032 = vmatmul.mubr.msk.bf16.gmra.mxu0 %vm550_vm0, %v2107_v15  ;;  %2022 = vmatmul.mubr.msk.bf16.gmra.mxu1 %vm550_vm0, %v2106_v16 }
  0xf1   : > { %v1949_v17 = vpop.f32.mrf.mxu0  ;;  %v1953_v18 = vpop.f32.mrf.mxu1 }
  0xf3   : > { %v597_v19 = vpop.f32.mrf.mxu0  ;;  %v613_v20 = vpop.f32.mrf.mxu1 }
  0xf5   : > { %v1950_v21 = vpop.f32.mrf.mxu0  ;;  %v1954_v22 = vpop.f32.mrf.mxu1 }
  0xf7   : > { %v600_v23 = vpop.f32.mrf.mxu0  ;;  %v2366_v24 = vpop.f32.mrf.mxu1 }
  0xf9   : > { %v1969_v25 = vpop.f32.mrf.mxu0  ;;  %v1959_v26 = vpop.f32.mrf.mxu1 }
  0xfa   : > { %v709_v57 = vadd.f32 %v1959_v26, %v1949_v17 }
  0xfb   : > { %v815_v27 = vpop.f32.mrf.mxu0  ;;  %v700_v28 = vpop.f32.mrf.mxu1 }
  0xfc   : > { %v701_v60 = vadd.f32 %v700_v28, %v597_v19  ;;  %v848_v63 = vadd.f32 %v1969_v25, %v709_v57  ;;  %v2389_v57 = vld [vmem:[%s2436_s2] ss:$0 sm:$0xff] }
  0xfd   : > { %v1970_v29 = vpop.f32.mrf.mxu0  ;;  %v1960_v30 = vpop.f32.mrf.mxu1 }
  0xfe   : > { %v712_v0 = vadd.f32 %v1960_v30, %v1950_v21  ;;  %v846_v3 = vadd.f32 %v815_v27, %v701_v60 }
  0xff   : > { %v818_v31 = vpop.f32.mrf.mxu0  ;;  %v703_v32 = vpop.f32.mrf.mxu1 }
 0x100   : > { %v704_v4 = vadd.f32 %v703_v32, %v600_v23  ;;  %v849_v9 = vadd.f32 %v1970_v29, %v712_v0 }
 0x101   : > { %v1973_v33 = vpop.f32.mrf.mxu0  ;;  %v1963_v34 = vpop.f32.mrf.mxu1 }
 0x102   : > { %v725_v7 = vadd.f32 %v1963_v34, %v1953_v18  ;;  %v847_v14 = vadd.f32 %v818_v31, %v704_v4 }
 0x103   : > { %v831_v35 = vpop.f32.mrf.mxu0  ;;  %v716_v36 = vpop.f32.mrf.mxu1 }
 0x104   : > { %v717_v12 = vadd.f32 %v716_v36, %v613_v20  ;;  %v852_v19 = vadd.f32 %v1973_v33, %v725_v7 }
 0x105   : > { %v1974_v37 = vpop.f32.mrf.mxu0  ;;  %v1964_v38 = vpop.f32.mrf.mxu1 }
 0x106   : > { %v728_v21 = vadd.f32 %v1964_v38, %v1954_v22  ;;  %v850_v18 = vadd.f32 %v831_v35, %v717_v12 }
 0x107   : > { %v2368_v39 = vpop.f32.mrf.mxu0  ;;  %v719_v40 = vpop.f32.mrf.mxu1 }
 0x108   : > { %v720_v29 = vadd.f32 %v719_v40, %v2366_v24  ;;  %v853_v36 = vadd.f32 %v1974_v37, %v728_v21 }
 0x109   : > { %v1989_v41 = vpop.f32.mrf.mxu0  ;;  %v1979_v42 = vpop.f32.mrf.mxu1 }
 0x10a   : > { %v971_v5 = vadd.f32 %v1979_v42, %v848_v63  ;;  %v851_v35 = vadd.f32 %v2368_v39, %v720_v29 }
 0x10b   : > { %v1061_v43 = vpop.f32.mrf.mxu0  ;;  %v938_v44 = vpop.f32.mrf.mxu1 }
 0x10c   : > { %v969_v10 = vadd.f32 %v938_v44, %v846_v3  ;;  %v1094_v15 = vadd.f32 %v1989_v41, %v971_v5 }
 0x10d   : > { %v1990_v45 = vpop.f32.mrf.mxu0  ;;  %v1980_v46 = vpop.f32.mrf.mxu1 }
 0x10e   : > { %v972_v16 = vadd.f32 %v1980_v46, %v849_v9  ;;  %v1092_v26 = vadd.f32 %v1061_v43, %v969_v10 }
 0x10f   : > { %v1064_v47 = vpop.f32.mrf.mxu0  ;;  %v941_v48 = vpop.f32.mrf.mxu1 }
 0x110   : > { %v970_v23 = vadd.f32 %v941_v48, %v847_v14  ;;  %v1095_v32 = vadd.f32 %v1990_v45, %v972_v16 }
 0x111   : > { %v1993_v49 = vpop.f32.mrf.mxu0  ;;  %v1983_v50 = vpop.f32.mrf.mxu1 }
 0x112   : > { %v975_v20 = vadd.f32 %v1983_v50, %v852_v19  ;;  %v1093_v33 = vadd.f32 %v1064_v47, %v970_v23 }
 0x113   : > { %v2370_v51 = vpop.f32.mrf.mxu0  ;;  %v954_v52 = vpop.f32.mrf.mxu1 }
 0x114   : > { %v973_v41 = vadd.f32 %v954_v52, %v850_v18  ;;  %v1098_v44 = vadd.f32 %v1993_v49, %v975_v20 }
 0x115   : > { %v2372_v53 = vpop.f32.mrf.mxu0  ;;  %v1984_v54 = vpop.f32.mrf.mxu1 }
 0x116   : > { %v976_v24 = vadd.f32 %v1984_v54, %v853_v36  ;;  %v1096_v37 = vadd.f32 %v2370_v51, %v973_v41 }
 0x117   : > { %v2374_v55 = vpop.f32.mrf.mxu0  ;;  %v957_v56 = vpop.f32.mrf.mxu1 }
 0x118   : > { %v974_v52 = vadd.f32 %v957_v56, %v851_v35  ;;  %v1099_v60 = vadd.f32 %v2372_v53, %v976_v24 }
 0x119   : > { %v2009_v58 = vpop.f32.mrf.mxu0  ;;  %v1999_v59 = vpop.f32.mrf.mxu1 }
 0x11a   : > { %v1217_v27 = vadd.f32 %v1999_v59, %v1094_v15  ;;  %v1097_v3 = vadd.f32 %v2374_v55, %v974_v52 }
 0x11b   : > { %v1307_v61 = vpop.f32.mrf.mxu0  ;;  %v1184_v62 = vpop.f32.mrf.mxu1 }
 0x11c   : > { %v1215_v34 = vadd.f32 %v1184_v62, %v1092_v26  ;;  %v1340_v22 = vadd.f32 %v2009_v58, %v1217_v27 }
 0x11d   : > { %v2010_v1 = vpop.f32.mrf.mxu0  ;;  %v2000_v2 = vpop.f32.mrf.mxu1 }
 0x11e   : > { %v1218_v38 = vadd.f32 %v2000_v2, %v1095_v32  ;;  %v1338_v46 = vadd.f32 %v1307_v61, %v1215_v34 }
 0x11f   : > { %v1310_v6 = vpop.f32.mrf.mxu0  ;;  %v1187_v8 = vpop.f32.mrf.mxu1 }
 0x120   : > { %v1216_v45 = vadd.f32 %v1187_v8, %v1093_v33  ;;  %v1341_v59 = vadd.f32 %v2010_v1, %v1218_v38 }
 0x121   : > { %v2013_v11 = vpop.f32.mrf.mxu0  ;;  %v2003_v13 = vpop.f32.mrf.mxu1 }
 0x122   : > { %v1221_v47 = vadd.f32 %v2003_v13, %v1098_v44  ;;  %v1339_v63 = vadd.f32 %v1310_v6, %v1216_v45 }
 0x123   : > { %v1323_v17 = vpop.f32.mrf.mxu0  ;;  %v1200_v25 = vpop.f32.mrf.mxu1 }
 0x124   : > { %v1219_v61 = vadd.f32 %v1200_v25, %v1096_v37  ;;  %v1344_v4 = vadd.f32 %v2013_v11, %v1221_v47 }
 0x125   : > { %v2378_v28 = vpop.f32.mrf.mxu0  ;;  %v2004_v30 = vpop.f32.mrf.mxu1 }
 0x126   : > { %v1222_v5 = vadd.f32 %v2004_v30, %v1099_v60  ;;  %v1342_v10 = vadd.f32 %v1323_v17, %v1219_v61 }
 0x127   : > { %v1326_v31 = vpop.f32.mrf.mxu0  ;;  %v1203_v42 = vpop.f32.mrf.mxu1 }
 0x128   : > { %v1220_v12 = vadd.f32 %v1203_v42, %v1097_v3  ;;  %v1345_v19 = vadd.f32 %v2378_v28, %v1222_v5 }
 0x129   : > { %v2029_v43 = vpop.f32.mrf.mxu0  ;;  %v2019_v40 = vpop.f32.mrf.mxu1 }
 0x12a   : > { %v1463_v48 = vadd.f32 %v2019_v40, %v1340_v22  ;;  %v1343_v27 = vadd.f32 %v1326_v31, %v1220_v12 }
 0x12b   : > { %v1553_v50 = vpop.f32.mrf.mxu0  ;;  %v1430_v58 = vpop.f32.mrf.mxu1 }
 0x12c   : > { %v1586_v39 = vadd.f32 %v2029_v43, %v1463_v48  ;;  %v1461_v49 = vadd.f32 %v1430_v58, %v1338_v46 }
 0x12d   : > { %v2030_v54 = vpop.f32.mrf.mxu0  ;;  %v2020_v62 = vpop.f32.mrf.mxu1 }
 0x12e   : > { %v1601_v51 = vadd.f32 %v2389_v57, %v1586_v39  ;;  %v1584_v56 = vadd.f32 %v1553_v50, %v1461_v49  ;;  %v1464_v0 = vadd.f32 %v2020_v62, %v1341_v59 }
 0x12f   : > { %v1556_v2 = vpop.f32.mrf.mxu0  ;;  %v1433_v53 = vpop.f32.mrf.mxu1 }
 0x130   : > { %v1894_v1 = vpack.c.bf16 %v1601_v51, %v1601_v51  ;;  %v1599_v6 = vadd.f32 %v2389_v57, %v1584_v56  ;;  %v1587_v7 = vadd.f32 %v2030_v54, %v1464_v0  ;;  %v1462_v8 = vadd.f32 %v1433_v53, %v1339_v63 }
 0x131   : > { %v2033_v9 = vpop.f32.mrf.mxu0  ;;  %v2023_v55 = vpop.f32.mrf.mxu1 }
 0x132   : > { %1642 = vst.msk [vmem:[%s2398_s30 + $0x8] sm:$0xf] %vm1639_vm1, %v1894_v1  ;;  %v1892_v11 = vpack.c.bf16 %v1599_v6, %v1599_v6  ;;  %v1602_v13 = vadd.f32 %v2389_v57, %v1587_v7  ;;  %v1585_v14 = vadd.f32 %v1556_v2, %v1462_v8  ;;  %v1467_v15 = vadd.f32 %v2023_v55, %v1344_v4 }
 0x133   : > { %v1569_v16 = vpop.f32.mrf.mxu0  ;;  %v1446_v21 = vpop.f32.mrf.mxu1 }
 0x134   : > { %1640 = vst.msk [vmem:[%s2398_s30] sm:$0xf] %vm1639_vm1, %v1892_v11  ;;  %v1895_v25 = vpack.c.bf16 %v1602_v13, %v1602_v13  ;;  %v1600_v17 = vadd.f32 %v2389_v57, %v1585_v14  ;;  %v1590_v26 = vadd.f32 %v2033_v9, %v1467_v15  ;;  %v1465_v23 = vadd.f32 %v1446_v21, %v1342_v10 }
 0x135   : > { %v2024_v18 = vpop.f32.mrf.mxu1  ;;  %v2034_v29 = vpop.f32.mrf.mxu0 }
 0x136   : > { %1643 = vst.msk [vmem:[%s2398_s30 + $0xc] sm:$0xf] %vm1639_vm1, %v1895_v25  ;;  %v1893_v20 = vpack.c.bf16 %v1600_v17, %v1600_v17  ;;  %v1605_v30 = vadd.f32 %v2389_v57, %v1590_v26  ;;  %v1588_v28 = vadd.f32 %v1569_v16, %v1465_v23  ;;  %v1468_v32 = vadd.f32 %v2024_v18, %v1345_v19 }
 0x137   : > { %v1449_v34 = vpop.f32.mrf.mxu1  ;;  %v1572_v33 = vpop.f32.mrf.mxu0 }
 0x138   : > { %1641 = vst.msk [vmem:[%s2398_s30 + $0x4] sm:$0xf] %vm1639_vm1, %v1893_v20  ;;  %v1898_v36 = vpack.c.bf16 %v1605_v30, %v1605_v30  ;;  %v1603_v41 = vadd.f32 %v2389_v57, %v1588_v28  ;;  %v1591_v42 = vadd.f32 %v2034_v29, %v1468_v32  ;;  %v1466_v31 = vadd.f32 %v1449_v34, %v1343_v27 }
 0x13a   : > { %1646 = vst.msk [vmem:[%s2398_s30 + $0x18] sm:$0xf] %vm1639_vm1, %v1898_v36  ;;  %v1896_v22 = vpack.c.bf16 %v1603_v41, %v1603_v41  ;;  %v1606_v38 = vadd.f32 %v2389_v57, %v1591_v42  ;;  %v1589_v43 = vadd.f32 %v1572_v33, %v1466_v31 }
 0x13c   : > { %1644 = vst.msk [vmem:[%s2398_s30 + $0x10] sm:$0xf] %vm1639_vm1, %v1896_v22  ;;  %v1899_v35 = vpack.c.bf16 %v1606_v38, %v1606_v38  ;;  %v1604_v44 = vadd.f32 %v2389_v57, %v1589_v43 }
 0x13e   : > { %1647 = vst.msk [vmem:[%s2398_s30 + $0x1c] sm:$0xf] %vm1639_vm1, %v1899_v35  ;;  %v1897_v24 = vpack.c.bf16 %v1604_v44, %v1604_v44 }
 0x140   : > { %1645 = vst.msk [vmem:[%s2398_s30 + $0x14] sm:$0xf] %vm1639_vm1, %v1897_v24 }
 0x141 PF: > { %p10_p9 = scmp.ge.s32.totalorder %s2169_s16, 4   ;;  %s2438_s12 = smov %s2126_s13 }
 0x142   : > { %s2439_s13 = smov %s2178_s19  ;;  %s2440_s14 = smov %s2169_s16 }
 0x143   :  { %12 = sbr.rel (!%p10_p9) target bundleno = 2 (0x2), region = 124 }

// kernel: densenet_forward.14
= control target key start
LH: loop header
LB: loop body
LE: loop exit
PB: predicated region body
PF: predicated region fallthrough
CT: control target
= control target key end

     0   :  { %s733_s27 = smov 0   ;;  %s781_s0 = inlined_call_operand.vmem [shape: f32[1,24], index: 0, kind: input, shape index: {}]   ;;  %s782_s1 = inlined_call_operand.vmem [shape: f32[1,24], index: 1, kind: input, shape index: {}]   ;;  %s783_s2 = inlined_call_operand.vmem [shape: bf16[1,32,24], index: 2, kind: input, shape index: {}]   ;;  %s784_s3 = inlined_call_operand.vmem [shape: bf16[1,32,24], index: 3, kind: input, shape index: {}]   ;;  %s785_s4 = inlined_call_operand.vmem [shape: bf16[1,32,24], index: 4, kind: input, shape index: {}]   ;;  %s786_s5 = inlined_call_operand.vmem [shape: bf16[1,32,24], index: 5, kind: input, shape index: {}]   ;;  %s787_s6 = inlined_call_operand.vmem [shape: bf16[1,24,24], index: 6, kind: input, shape index: {}]   ;;  %s788_s7 = inlined_call_operand.vmem [shape: f32[1,24], index: 7, kind: input, shape index: {}]   ;;  %s789_s8 = inlined_call_operand.vmem [shape: bf16[32,24], index: 8, kind: output, shape index: {}]  }
   0x1 LB: > { %s612_s28 = sadd.s32 4294967295, %s684_s27   ;;  %p616_p0 = scmp.ge.s32.totalorder %s684_s27, 1  ;;  %s684_s27 = sphi %s733_s27, %s18_s27  }
   0x2   : > { %p296_p1 = scmp.lt.s32.totalorder %s684_s27, 3 }
   0x4   : > { %p297_p2 = pnand %p616_p0, %p296_p1 }
   0x5   : > { %s617_s9 = sshll.u32 (!%p297_p2), %s612_s28, 1 }
   0x6   : > { %300 = sbr.rel (%p297_p2) target bundleno = 237 (0xed), region = 52  ;;  %p346_p3 = scmp.lt.s32.totalorder (!%p297_p2), %s617_s9, 3 }
   0xb   : > { %v676_v0 = vld [vmem:[%s787_s6 + $0x8] ss:$0 sps:$4 sm:$0xff]   ;;  %vm464_vm0 = vcmask 1043456   ;;  %v686_v1 = vmov 0.0   ;;  %vm687_vm1 = vmmov 0   ;;  %v677_v3 = vld [vmem:[%s787_s6] sm:$0xff]  }
   0xc   : > { %658 = vmatprep.subr.bf16.mxu0 %v686_v1  ;;  %v466_v2 = vsel %vm464_vm0, %v676_v0, 0  ;;  %662 = vmatprep.mubr.msk.bf16.mxu0 %vm687_vm1, %v686_v1  ;;  %s791_s9 = smov (!%p346_p3, %s617_s9), 3  ;;  %v627_v5 = vld [vmem:[%s781_s0] ss:$0 sm:$0xff]  ;;  %vm460_vm2 = vcmask 195584   ;;  %vm517_vm3 = vcmask 191488  }
   0xd   : > { %659 = vmatpush3.bf16.msra.mxu0 %v466_v2  ;;  %s747_s12 = sshll.u32 %s791_s9, 2  ;;  %v628_v13 = vld [vmem:[%s782_s1] ss:$0 sm:$0xff] }
   0xe   : > { %660 = vmatprep.subr.bf16.mxu0 %v686_v1  ;;  %s349_s15 = scalar_lea.vmem %s783_s2, %s747_s12  ;;  %s355_s18 = scalar_lea.vmem %s784_s3, %s747_s12  ;;  %v629_v51 = vld [vmem:[%s788_s7] ss:$0 sm:$0xff] }
   0xf   : > { %s361_s21 = scalar_lea.vmem %s785_s4, %s747_s12  ;;  %s367_s24 = scalar_lea.vmem %s786_s5, %s747_s12  ;;  %v640_v4 = vld [vmem:[%s349_s15] sm:$0xff]  }
  0x10   : > { %v644_v6 = vld [vmem:[%s355_s18] sm:$0xff]   ;;  %v641_v7 = vunpack.c.l.bf16 %v640_v4  ;;  %v642_v8 = vunpack.c.h.bf16 %v640_v4  ;;  %s373_s13 = scalar_lea.vmem %s789_s8, %s747_s12 }
  0x11   : > { %661 = vmatpush3.bf16.msra.mxu0 %v677_v3  ;;  %v645_v9 = vunpack.c.l.bf16 %v644_v6  ;;  %v646_v10 = vunpack.c.h.bf16 %v644_v6  ;;  %v648_v11 = vld [vmem:[%s361_s21] sm:$0xff]  }
  0x12   : > { %v652_v12 = vld [vmem:[%s367_s24] sm:$0xff]   ;;  %v649_v14 = vunpack.c.l.bf16 %v648_v11  ;;  %v650_v15 = vunpack.c.h.bf16 %v648_v11  ;;  %v387_v18 = vmul.f32 %v641_v7, %v627_v5  ;;  %v388_v19 = vmul.f32 %v642_v8, %v627_v5 }
  0x13   : > { %v653_v16 = vunpack.c.l.bf16 %v652_v12  ;;  %v654_v17 = vunpack.c.h.bf16 %v652_v12  ;;  %v406_v20 = vmul.f32 %v645_v9, %v627_v5  ;;  %v407_v21 = vmul.f32 %v646_v10, %v627_v5 }
  0x14   : > { %v418_v22 = vmul.f32 %v649_v14, %v627_v5  ;;  %v419_v23 = vmul.f32 %v650_v15, %v627_v5  ;;  %v396_v26 = vadd.f32 %v628_v13, %v387_v18  ;;  %v397_v27 = vadd.f32 %v628_v13, %v388_v19 }
  0x15   : > { %v430_v24 = vmul.f32 %v653_v16, %v627_v5  ;;  %v431_v25 = vmul.f32 %v654_v17, %v627_v5  ;;  %v408_v28 = vadd.f32 %v628_v13, %v406_v20  ;;  %v409_v29 = vadd.f32 %v628_v13, %v407_v21 }
  0x16   : > { %v420_v30 = vadd.f32 %v628_v13, %v418_v22  ;;  %v421_v31 = vadd.f32 %v628_v13, %v419_v23  ;;  %v398_v34 = vmax.f32 %v396_v26, 0.0  ;;  %v399_v35 = vmax.f32 %v397_v27, 0.0 }
  0x17   : > { %v432_v32 = vadd.f32 %v628_v13, %v430_v24  ;;  %v433_v33 = vadd.f32 %v628_v13, %v431_v25  ;;  %v410_v36 = vmax.f32 %v408_v28, 0.0  ;;  %v411_v37 = vmax.f32 %v409_v29, 0.0 }
  0x18   : > { %v422_v38 = vmax.f32 %v420_v30, 0.0  ;;  %v423_v39 = vmax.f32 %v421_v31, 0.0 }
  0x19   : > { %v412_v40 = vadd.f32 %v410_v36, %v398_v34  ;;  %v413_v41 = vadd.f32 %v411_v37, %v399_v35  ;;  %v434_v42 = vmax.f32 %v432_v32, 0.0  ;;  %v435_v43 = vmax.f32 %v433_v33, 0.0 }
  0x1b   : > { %v424_v44 = vadd.f32 %v422_v38, %v412_v40  ;;  %v425_v45 = vadd.f32 %v423_v39, %v413_v41 }
  0x1d   : > { %v436_v46 = vadd.f32 %v434_v42, %v424_v44  ;;  %v437_v47 = vadd.f32 %v435_v43, %v425_v45 }
  0x1f   : > { %v438_v48 = vmul.f32 0.25, %v436_v46  ;;  %v439_v49 = vmul.f32 0.25, %v437_v47 }
  0x21   : > { %v440_v50 = vpack.c.bf16 %v439_v49, %v438_v48 }
  0x23   : > { %663 = vmatmul.mubr.msk.bf16.vlgmr.msra.gmra.mxu0 %vm460_vm2, %v440_v50 }
  0xe3   : > { %v502_v52 = vpop.f32.mrf.mxu0 }
  0xe4   : > { %v503_v53 = vadd.f32 %v629_v51, %v502_v52 }
  0xe5   : > { %v664_v54 = vpop.f32.mrf.mxu0 }
  0xe6   : > { %v637_v55 = vpack.c.bf16 %v503_v53, %v503_v53 }
  0xe7   : > { %v505_v56 = vpop.f32.mrf.mxu0 }
  0xe8   : > { %518 = vst.msk [vmem:[%s373_s13] sm:$0xf] %vm517_vm3, %v637_v55  ;;  %v506_v57 = vadd.f32 %v629_v51, %v505_v56 }
  0xe9   : > { %v665_v58 = vpop.f32.mrf.mxu0 }
  0xea   : > { %v638_v59 = vpack.c.bf16 %v506_v57, %v506_v57 }
  0xec   : > { %519 = vst.msk [vmem:[%s373_s13 + $0x4] sm:$0xf] %vm517_vm3, %v638_v59 }
  0xed PF: > { %s18_s27 = sadd.s32 1, %s684_s27  }
  0xee   : > { %p15_p4 = scmp.ge.s32.totalorder %s18_s27, 4  }
  0xf0   :  { %17 = sbr.rel (!%p15_p4) target bundleno = 1 (0x1), region = 91 }

// kernel: densenet_forward.15
= control target key start
LH: loop header
LB: loop body
LE: loop exit
PB: predicated region body
PF: predicated region fallthrough
CT: control target
= control target key end

     0   :  { %s1287_s12 = smov 0   ;;  %s1289_s13 = smov 0   ;;  %s1461_s0 = inlined_call_operand.vmem [shape: bf16[9,32,24], index: 0, kind: input, shape index: {}]   ;;  %s1462_s1 = inlined_call_operand.vmem [shape: bf16[9,24,8], index: 1, kind: input, shape index: {}]   ;;  %s1463_s2 = inlined_call_operand.vmem [shape: f32[1,8], index: 2, kind: input, shape index: {}]   ;;  %s1464_s3 = inlined_call_operand.vmem [shape: bf16[32,8], index: 3, kind: output, shape index: {}]  }
   0x1   :  { %s1291_s14 = smov 0  }
   0x2 LB: > { %s994_s15 = sadd.s32 4294967295, %s1263_s14   ;;  %s1304_s16 = sadd.s32 1, %s1263_s14   ;;  %s1263_s14 = sphi %s1291_s14, %s1467_s14   ;;  %s1259_s13 = sphi %s1289_s13, %s1466_s13   ;;  %s1255_s12 = sphi %s1287_s12, %s1465_s12  }
   0x3   : > { %s17_s17 = ssub.s32 %s1263_s14, %s1304_s16  ;;  %s20_s18 = sadd.s32 1, %s1259_s13 }
   0x4   : > { %p18_p0 = scmp.eq.s32.totalorder %s17_s17, 0  ;;  %p27_p1 = scmp.ne.s32.totalorder %s1259_s13, %s1255_s12 }
   0x5   : > { %p28_p2 = scmp.eq.s32.totalorder %s1263_s14, 0  ;;  %p997_p4 = scmp.ge.s32.totalorder %s1263_s14, 2 }
   0x6   : > { %s1313_s19 = scalar_select %p18_p0, %s1259_s13, %s20_s18  }
   0x7   : > { %p29_p3 = por %p28_p2, %p27_p1  ;;  %127 = sbr.rel (%p997_p4) target bundleno = 21 (0x15), region = 24 }
   0xc   : > { %130 = sbr.rel (!%p29_p3) target bundleno = 21 (0x15), region = 28  ;;  %s132_s20 = sand.u32 (%p29_p3), 1, %s1259_s13  }
   0xd   : > { %s1084_s21 = sshll.u32 (%p29_p3), %s1263_s14, 3  ;;  %s1186_s22 = smul.u32 (%p29_p3), 72, %s132_s20 }
   0xe   : > { %s137_s25 = scalar_lea.vmem (%p29_p3), %s1461_s0, %s1084_s21 }
   0xf   : > { %v154_v0 = vld [vmem:[%s137_s25] sm:$0xff] (%p29_p3)   ;;  %v158_v1 = vld [vmem:[%s137_s25 + $0x10] sm:$0xff] (%p29_p3)   ;;  %s134_s26 = scalar_lea.vmem (%p29_p3), [#allocation2], %s1186_s22 }
  0x10   : > { %v162_v2 = vld [vmem:[%s137_s25 + $0x20] sm:$0xff] (%p29_p3)   ;;  %v166_v3 = vld [vmem:[%s137_s25 + $0x30] sm:$0xff] (%p29_p3)   ;;  %155 = vst [vmem:[%s134_s26] sm:$0xff] (%p29_p3), %v154_v0   ;;  %159 = vst [vmem:[%s134_s26 + $0x8] sm:$0xff] (%p29_p3), %v158_v1  }
  0x11   : > { %v170_v4 = vld [vmem:[%s137_s25 + $0x40] sm:$0xff]   ;;  %v174_v5 = vld [vmem:[%s137_s25 + $0x50] sm:$0xff]   ;;  %163 = vst [vmem:[%s134_s26 + $0x10] sm:$0xff] %v162_v2   ;;  %167 = vst [vmem:[%s134_s26 + $0x18] sm:$0xff] %v166_v3  }
  0x12   : > { %171 = vst [vmem:[%s134_s26 + $0x20] sm:$0xff] %v170_v4   ;;  %175 = vst [vmem:[%s134_s26 + $0x28] sm:$0xff] %v174_v5   ;;  %v178_v6 = vld [vmem:[%s137_s25 + $0x60] sm:$0xff]   ;;  %v182_v7 = vld [vmem:[%s137_s25 + $0x70] sm:$0xff]  }
  0x13   : > { %v186_v8 = vld [vmem:[%s137_s25 + $0x80] sm:$0xff]   ;;  %179 = vst [vmem:[%s134_s26 + $0x30] sm:$0xff] %v178_v6   ;;  %183 = vst [vmem:[%s134_s26 + $0x38] sm:$0xff] %v182_v7  }
  0x14   : > { %187 = vst [vmem:[%s134_s26 + $0x40] sm:$0xff] %v186_v8  }
  0x15 PF: > { %p1000_p5 = scmp.ge.s32.totalorder %s1263_s14, 1  ;;  %p248_p6 = scmp.lt.s32.totalorder %s1263_s14, 3 }
  0x17   : > { %p249_p7 = pnand %p1000_p5, %p248_p6 }
  0x18   : > { %s255_s6 = sand.u32 (!%p249_p7), 1, %s1255_s12  }
  0x19   : > { %252 = sbr.rel (%p249_p7) target bundleno = 275 (0x113), region = 69 }
  0x1a   : > { %s1187_s9 = smul.u32 (!%p249_p7), 72, %s255_s6 }
  0x1c   : > { %s1352_s18 = scalar_lea.vmem (!%p249_p7), [#allocation2], %s1187_s9 }
  0x1e   : > { %v1214_v9 = vld [vmem:[%s1462_s1 + $0x14] ss:$0 sps:$4 sm:$0xff]   ;;  %vm316_vm0 = vcmask 1043456   ;;  %v1265_v10 = vmov 0.0   ;;  %v1215_v11 = vld [vmem:[%s1462_s1 + $0x8] ss:$0 sps:$4 sm:$0xff]  }
  0x1f   : > { %1114 = vmatprep.subr.bf16.mxu0 %v1265_v10  ;;  %1122 = vmatprep.subr.bf16.mxu1 %v1265_v10  ;;  %v318_v12 = vsel %vm316_vm0, %v1214_v9, 0  ;;  %v379_v13 = vsel %vm316_vm0, %v1215_v11, 0  ;;  %v1216_v14 = vld [vmem:[%s1462_s1 + $0xc] sm:$0xff]   ;;  %v1217_v15 = vld [vmem:[%s1462_s1] sm:$0xff]   ;;  %vm1266_vm1 = vmmov 0   ;;  %vm312_vm2 = vcmask 195584  }
  0x20   : > { %1115 = vmatpush3.bf16.msra.mxu0 %v318_v12  ;;  %1123 = vmatpush3.bf16.msra.mxu1 %v379_v13  ;;  %v1220_v16 = vld [vmem:[%s1462_s1 + $0x20] ss:$0 sps:$4 sm:$0xff]   ;;  %v1221_v17 = vld [vmem:[%s1462_s1 + $0x2c] ss:$0 sps:$4 sm:$0xff]   ;;  %v1222_v22 = vld [vmem:[%s1462_s1 + $0x18] sm:$0xff]   ;;  %vm929_vm3 = vcmask 60416  }
  0x21   : > { %1116 = vmatprep.subr.bf16.mxu0 %v1265_v10  ;;  %1124 = vmatprep.subr.bf16.mxu1 %v1265_v10  ;;  %v1218_v18 = vld [vmem:[%s1352_s18 + $0x8] sm:$0xff]   ;;  %v447_v19 = vsel %vm316_vm0, %v1220_v16, 0  ;;  %v1219_v20 = vld [vmem:[%s1352_s18] sm:$0xff]   ;;  %v517_v21 = vsel %vm316_vm0, %v1221_v17, 0  ;;  %v1226_v24 = vld [vmem:[%s1462_s1 + $0x38] ss:$0 sps:$4 sm:$0xff]  }
  0x22   : > { %1118 = vmatprep.mubr.msk.bf16.mxu0 %vm1266_vm1, %v1265_v10  ;;  %1126 = vmatprep.mubr.msk.bf16.mxu1 %vm1266_vm1, %v1265_v10  ;;  %v1223_v23 = vld [vmem:[%s1462_s1 + $0x24] sm:$0xff]   ;;  %v1224_v26 = vld [vmem:[%s1352_s18 + $0x10] sm:$0xff]   ;;  %v587_v28 = vsel %vm316_vm0, %v1226_v24, 0 }
  0x23   : > { %v1227_v25 = vld [vmem:[%s1462_s1 + $0x44] ss:$0 sps:$4 sm:$0xff]   ;;  %v1228_v30 = vld [vmem:[%s1462_s1 + $0x30] sm:$0xff]   ;;  %v1229_v31 = vld [vmem:[%s1462_s1 + $0x3c] sm:$0xff]  }
  0x24   : > { %1117 = vmatpush3.bf16.msra.mxu0 %v1216_v14  ;;  %1125 = vmatpush3.bf16.msra.mxu1 %v1217_v15  ;;  %v1225_v27 = vld [vmem:[%s1352_s18 + $0x18] sm:$0xff]   ;;  %v657_v29 = vsel %vm316_vm0, %v1227_v25, 0  ;;  %v1232_v32 = vld [vmem:[%s1462_s1 + $0x50] ss:$0 sps:$4 sm:$0xff]   ;;  %v1230_v34 = vld [vmem:[%s1352_s18 + $0x20] sm:$0xff]  }
  0x25   : > { %1130 = vmatprep.subr.bf16.mxu0 %v1265_v10  ;;  %1138 = vmatprep.subr.bf16.mxu1 %v1265_v10  ;;  %v1233_v33 = vld [vmem:[%s1462_s1 + $0x5c] ss:$0 sps:$4 sm:$0xff]   ;;  %v1231_v35 = vld [vmem:[%s1352_s18 + $0x28] sm:$0xff]   ;;  %v727_v36 = vsel %vm316_vm0, %v1232_v32, 0  ;;  %v1239_v44 = vld [vmem:[%s1462_s1 + $0x60] sm:$0xff]  }
  0x26   : > { %v797_v37 = vsel %vm316_vm0, %v1233_v33, 0  ;;  %v1234_v38 = vld [vmem:[%s1462_s1 + $0x48] sm:$0xff]   ;;  %v1235_v39 = vld [vmem:[%s1462_s1 + $0x54] sm:$0xff]  }
  0x27   : > { %1119 = vmatmul.mubr.msk.bf16.vlgmr.msra.gmra.mxu0 %vm312_vm2, %v1218_v18  ;;  %1127 = vmatmul.mubr.msk.bf16.vlgmr.msra.gmra.mxu1 %vm312_vm2, %v1219_v20  ;;  %v1238_v40 = vld [vmem:[%s1462_s1 + $0x68] ss:$0 sps:$4 sm:$0xff]   ;;  %v1236_v41 = vld [vmem:[%s1352_s18 + $0x30] sm:$0xff]   ;;  %v1237_v42 = vld [vmem:[%s1352_s18 + $0x38] sm:$0xff]  }
  0x28   : > { %1131 = vmatpush3.bf16.msra.mxu0 %v447_v19  ;;  %1139 = vmatpush3.bf16.msra.mxu1 %v517_v21  ;;  %v867_v43 = vsel %vm316_vm0, %v1238_v40, 0  ;;  %v1240_v45 = vld [vmem:[%s1352_s18 + $0x40] sm:$0xff]   ;;  %s1001_s18 = sshll.u32 %s994_s15, 1 }
  0x29   : > { %1132 = vmatprep.subr.bf16.mxu0 %v1265_v10  ;;  %1140 = vmatprep.subr.bf16.mxu1 %v1265_v10  ;;  %p280_p8 = scmp.lt.s32.totalorder %s1001_s18, 3 }
  0x2a   : > { %1134 = vmatprep.mubr.msk.bf16.mxu0 %vm1266_vm1, %v1265_v10  ;;  %1142 = vmatprep.mubr.msk.bf16.mxu1 %vm1266_vm1, %v1265_v10 }
  0x2b   : > { %s1469_s18 = smov (!%p280_p8, %s1001_s18), 3 }
  0x2c   : > { %1133 = vmatpush3.bf16.msra.mxu0 %v1222_v22  ;;  %1141 = vmatpush3.bf16.msra.mxu1 %v1223_v23  ;;  %s1002_s23 = sshll.u32 %s1469_s18, 2 }
  0x2d   : > { %1146 = vmatprep.subr.bf16.mxu0 %v1265_v10  ;;  %1154 = vmatprep.subr.bf16.mxu1 %v1265_v10  ;;  %s283_s26 = scalar_lea.vmem %s1464_s3, %s1002_s23 }
  0x2f   : > { %1135 = vmatmul.mubr.msk.bf16.vlgmr.msra.gmra.mxu0 %vm312_vm2, %v1224_v26  ;;  %1143 = vmatmul.mubr.msk.bf16.vlgmr.msra.gmra.mxu1 %vm312_vm2, %v1225_v27 }
  0x30   : > { %1147 = vmatpush3.bf16.msra.mxu0 %v587_v28  ;;  %1155 = vmatpush3.bf16.msra.mxu1 %v657_v29  ;;  %v1079_v28 = vld [vmem:[%s1463_s2] ss:$0 sm:$0xff] }
  0x31   : > { %1148 = vmatprep.subr.bf16.mxu0 %v1265_v10  ;;  %1156 = vmatprep.subr.bf16.mxu1 %v1265_v10 }
  0x32   : > { %1150 = vmatprep.mubr.msk.bf16.mxu0 %vm1266_vm1, %v1265_v10  ;;  %1158 = vmatprep.mubr.msk.bf16.mxu1 %vm1266_vm1, %v1265_v10 }
  0x34   : > { %1149 = vmatpush3.bf16.msra.mxu0 %v1228_v30  ;;  %1157 = vmatpush3.bf16.msra.mxu1 %v1229_v31 }
  0x35   : > { %1162 = vmatprep.subr.bf16.mxu0 %v1265_v10  ;;  %1170 = vmatprep.subr.bf16.mxu1 %v1265_v10 }
  0x37   : > { %1151 = vmatmul.mubr.msk.bf16.vlgmr.msra.gmra.mxu0 %vm312_vm2, %v1230_v34  ;;  %1159 = vmatmul.mubr.msk.bf16.vlgmr.msra.gmra.mxu1 %vm312_vm2, %v1231_v35 }
  0x38   : > { %1163 = vmatpush3.bf16.msra.mxu0 %v727_v36  ;;  %1171 = vmatpush3.bf16.msra.mxu1 %v797_v37 }
  0x39   : > { %1164 = vmatprep.subr.bf16.mxu0 %v1265_v10  ;;  %1172 = vmatprep.subr.bf16.mxu1 %v1265_v10 }
  0x3a   : > { %1166 = vmatprep.mubr.msk.bf16.mxu0 %vm1266_vm1, %v1265_v10  ;;  %1174 = vmatprep.mubr.msk.bf16.mxu1 %vm1266_vm1, %v1265_v10 }
  0x3c   : > { %1165 = vmatpush3.bf16.msra.mxu0 %v1234_v38  ;;  %1173 = vmatpush3.bf16.msra.mxu1 %v1235_v39 }
  0x3d   : > { %1178 = vmatprep.subr.bf16.mxu0 %v1265_v10 }
  0x3f   : > { %1167 = vmatmul.mubr.msk.bf16.vlgmr.msra.gmra.mxu0 %vm312_vm2, %v1236_v41  ;;  %1175 = vmatmul.mubr.msk.bf16.vlgmr.msra.gmra.mxu1 %vm312_vm2, %v1237_v42 }
  0x40   : > { %1179 = vmatpush3.bf16.msra.mxu0 %v867_v43  ;;  %1182 = vmatprep.mubr.msk.bf16.mxu0 %vm1266_vm1, %v1265_v10 }
  0x41   : > { %1180 = vmatprep.subr.bf16.mxu0 %v1265_v10 }
  0x44   : > { %1181 = vmatpush3.bf16.msra.mxu0 %v1239_v44 }
  0x47   : > { %1183 = vmatmul.mubr.msk.bf16.vlgmr.msra.gmra.mxu0 %vm312_vm2, %v1240_v45 }
  0xe7   : > { %v354_v46 = vpop.f32.mrf.mxu0  ;;  %v415_v47 = vpop.f32.mrf.mxu1 }
  0xe8   : > { %v416_v59 = vadd.f32 %v415_v47, %v354_v46 }
  0xe9   : > { %v1120_v48 = vpop.f32.mrf.mxu0  ;;  %v1128_v49 = vpop.f32.mrf.mxu1 }
  0xeb   : > { %v357_v50 = vpop.f32.mrf.mxu0  ;;  %v418_v51 = vpop.f32.mrf.mxu1 }
  0xec   : > { %v419_v1 = vadd.f32 %v418_v51, %v357_v50 }
  0xed   : > { %v1121_v52 = vpop.f32.mrf.mxu0  ;;  %v1129_v53 = vpop.f32.mrf.mxu1 }
  0xef   : > { %v483_v54 = vpop.f32.mrf.mxu0  ;;  %v553_v55 = vpop.f32.mrf.mxu1 }
  0xf0   : > { %v490_v62 = vadd.f32 %v483_v54, %v416_v59 }
  0xf1   : > { %v1136_v56 = vpop.f32.mrf.mxu0  ;;  %v1144_v57 = vpop.f32.mrf.mxu1 }
  0xf2   : > { %v560_v4 = vadd.f32 %v553_v55, %v490_v62 }
  0xf3   : > { %v486_v58 = vpop.f32.mrf.mxu0  ;;  %v556_v60 = vpop.f32.mrf.mxu1 }
  0xf4   : > { %v491_v5 = vadd.f32 %v486_v58, %v419_v1 }
  0xf5   : > { %v1137_v61 = vpop.f32.mrf.mxu0  ;;  %v1145_v63 = vpop.f32.mrf.mxu1 }
  0xf6   : > { %v561_v11 = vadd.f32 %v556_v60, %v491_v5 }
  0xf7   : > { %v623_v0 = vpop.f32.mrf.mxu0  ;;  %v693_v2 = vpop.f32.mrf.mxu1 }
  0xf8   : > { %v630_v8 = vadd.f32 %v623_v0, %v560_v4 }
  0xf9   : > { %v1152_v3 = vpop.f32.mrf.mxu0  ;;  %v1160_v6 = vpop.f32.mrf.mxu1 }
  0xfa   : > { %v700_v14 = vadd.f32 %v693_v2, %v630_v8 }
  0xfb   : > { %v626_v7 = vpop.f32.mrf.mxu0  ;;  %v696_v9 = vpop.f32.mrf.mxu1 }
  0xfc   : > { %v631_v15 = vadd.f32 %v626_v7, %v561_v11 }
  0xfd   : > { %v1153_v10 = vpop.f32.mrf.mxu0  ;;  %v1161_v12 = vpop.f32.mrf.mxu1 }
  0xfe   : > { %v701_v21 = vadd.f32 %v696_v9, %v631_v15 }
  0xff   : > { %v763_v13 = vpop.f32.mrf.mxu0  ;;  %v833_v16 = vpop.f32.mrf.mxu1 }
 0x100   : > { %v770_v18 = vadd.f32 %v763_v13, %v700_v14 }
 0x101   : > { %v1168_v17 = vpop.f32.mrf.mxu0  ;;  %v1176_v19 = vpop.f32.mrf.mxu1 }
 0x102   : > { %v840_v24 = vadd.f32 %v833_v16, %v770_v18 }
 0x103   : > { %v766_v20 = vpop.f32.mrf.mxu0  ;;  %v836_v22 = vpop.f32.mrf.mxu1 }
 0x104   : > { %v771_v25 = vadd.f32 %v766_v20, %v701_v21 }
 0x105   : > { %v1169_v23 = vpop.f32.mrf.mxu0  ;;  %v1177_v26 = vpop.f32.mrf.mxu1 }
 0x106   : > { %v841_v31 = vadd.f32 %v836_v22, %v771_v25 }
 0x107   : > { %v903_v27 = vpop.f32.mrf.mxu0 }
 0x108   : > { %v910_v29 = vadd.f32 %v903_v27, %v840_v24 }
 0x109   : > { %v1184_v30 = vpop.f32.mrf.mxu0 }
 0x10a   : > { %v919_v32 = vadd.f32 %v1079_v28, %v910_v29 }
 0x10b   : > { %v906_v33 = vpop.f32.mrf.mxu0 }
 0x10c   : > { %v1085_v34 = vpack.c.bf16 %v919_v32, %v919_v32  ;;  %v911_v35 = vadd.f32 %v906_v33, %v841_v31 }
 0x10d   : > { %v1185_v36 = vpop.f32.mrf.mxu0 }
 0x10e   : > { %930 = vst.msk [vmem:[%s283_s26] sm:$0xf] %vm929_vm3, %v1085_v34  ;;  %v920_v37 = vadd.f32 %v1079_v28, %v911_v35 }
 0x110   : > { %v1086_v38 = vpack.c.bf16 %v920_v37, %v920_v37 }
 0x112   : > { %931 = vst.msk [vmem:[%s283_s26 + $0x4] sm:$0xf] %vm929_vm3, %v1086_v38 }
 0x113 PF: > { %p10_p9 = scmp.ge.s32.totalorder %s1304_s16, 4   ;;  %s1465_s12 = smov %s1259_s13 }
 0x114   : > { %s1466_s13 = smov %s1313_s19  ;;  %s1467_s14 = smov %s1304_s16 }
 0x115   :  { %12 = sbr.rel (!%p10_p9) target bundleno = 2 (0x2), region = 124 }

// kernel: densenet_forward.16
= control target key start
LH: loop header
LB: loop body
LE: loop exit
PB: predicated region body
PF: predicated region fallthrough
CT: control target
= control target key end

     0   :  { %v165_v0 = vmov 0.0   ;;  %vm166_vm0 = vmmov 0   ;;  %vm93_vm1 = vcmask 261120   ;;  %vm138_vm2 = vcmask 257024   ;;  %s242_s6 = inlined_call_operand.vmem [shape: bf16[1,32,32], index: 6, kind: input, shape index: {}]   ;;  %s243_s0 = inlined_call_operand.vmem [shape: f32[1,32], index: 0, kind: input, shape index: {}]   ;;  %s244_s2 = inlined_call_operand.vmem [shape: bf16[1,8,32], index: 2, kind: input, shape index: {}]   ;;  %s245_s3 = inlined_call_operand.vmem [shape: bf16[1,8,32], index: 3, kind: input, shape index: {}]   ;;  %s246_s4 = inlined_call_operand.vmem [shape: bf16[1,8,32], index: 4, kind: input, shape index: {}]   ;;  %s247_s5 = inlined_call_operand.vmem [shape: bf16[1,8,32], index: 5, kind: input, shape index: {}]   ;;  %s248_s1 = inlined_call_operand.vmem [shape: f32[1,32], index: 1, kind: input, shape index: {}]   ;;  %s249_s7 = inlined_call_operand.vmem [shape: f32[1,32], index: 7, kind: input, shape index: {}]   ;;  %s250_s8 = inlined_call_operand.vmem [shape: bf16[8,32], index: 8, kind: output, shape index: {}]  }
   0x1   :  { %153 = vmatprep.subr.bf16.mxu0 %v165_v0  ;;  %v163_v1 = vld [vmem:[%s242_s6 + $0x8] sm:$0xff]   ;;  %157 = vmatprep.mubr.msk.bf16.mxu0 %vm166_vm0, %v165_v0  ;;  %v164_v2 = vld [vmem:[%s242_s6] sm:$0xff]  }
   0x2   :  { %154 = vmatpush3.bf16.msra.mxu0 %v163_v1  ;;  %v30_v3 = vld [vmem:[%s244_s2] sm:$0xf] }
   0x3   :  { %v144_v4 = vld [vmem:[%s243_s0] ss:$0 sm:$0xff]  ;;  %155 = vmatprep.subr.bf16.mxu0 %v165_v0  ;;  %v31_v5 = vunpack.c.l.bf16 %v30_v3 }
   0x4   :  { %v50_v6 = vld [vmem:[%s245_s3] sm:$0xf] }
   0x5   :  { %v56_v7 = vld [vmem:[%s246_s4] sm:$0xf]  ;;  %v51_v10 = vunpack.c.l.bf16 %v50_v6  ;;  %v39_v13 = vmul.f32 %v144_v4, %v31_v5 }
   0x6   :  { %v62_v8 = vld [vmem:[%s247_s5] sm:$0xf]  ;;  %v57_v11 = vunpack.c.l.bf16 %v56_v7  ;;  %156 = vmatpush3.bf16.msra.mxu0 %v164_v2 }
   0x7   :  { %v145_v9 = vld [vmem:[%s248_s1] ss:$0 sm:$0xff]  ;;  %v63_v12 = vunpack.c.l.bf16 %v62_v8  ;;  %v52_v14 = vmul.f32 %v144_v4, %v51_v10 }
   0x8   :  { %v58_v15 = vmul.f32 %v144_v4, %v57_v11  ;;  %v47_v17 = vadd.f32 %v145_v9, %v39_v13  ;;  %v146_v30 = vld [vmem:[%s249_s7] ss:$0 sm:$0xff] }
   0x9   :  { %v64_v16 = vmul.f32 %v144_v4, %v63_v12  ;;  %v53_v18 = vadd.f32 %v145_v9, %v52_v14 }
   0xa   :  { %v59_v19 = vadd.f32 %v145_v9, %v58_v15  ;;  %v48_v21 = vmax.f32 %v47_v17, 0.0 }
   0xb   :  { %v65_v20 = vadd.f32 %v145_v9, %v64_v16  ;;  %v54_v22 = vmax.f32 %v53_v18, 0.0 }
   0xc   :  { %v60_v23 = vmax.f32 %v59_v19, 0.0 }
   0xd   :  { %v55_v24 = vadd.f32 %v54_v22, %v48_v21  ;;  %v66_v25 = vmax.f32 %v65_v20, 0.0 }
   0xf   :  { %v61_v26 = vadd.f32 %v60_v23, %v55_v24 }
  0x11   :  { %v67_v27 = vadd.f32 %v66_v25, %v61_v26 }
  0x13   :  { %v68_v28 = vmul.f32 0.25, %v67_v27 }
  0x15   :  { %v69_v29 = vpack.c.bf16 %v68_v28, %v68_v28 }
  0x17   :  { %158 = vmatmul.mubr.msk.bf16.vlgmr.msra.gmra.mxu0 %vm93_vm1, %v69_v29 }
  0xd7   :  { %v131_v31 = vpop.f32.mrf.mxu0 }
  0xd8   :  { %v132_v32 = vadd.f32 %v146_v30, %v131_v31 }
  0xd9   :  { %v159_v33 = vpop.f32.mrf.mxu0 }
  0xda   :  { %v137_v34 = vpack.c.bf16 %v132_v32, %v132_v32 }
  0xdb   :  { %v134_v35 = vpop.f32.mrf.mxu0 }
  0xdc   :  { %139 = vst.msk [vmem:[%s250_s8] sm:$0xf] %vm138_vm2, %v137_v34 }
  0xdd   :  { %v160_v36 = vpop.f32.mrf.mxu0 }

// kernel: densenet_forward.17
= control target key start
LH: loop header
LB: loop body
LE: loop exit
PB: predicated region body
PF: predicated region fallthrough
CT: control target
= control target key end

     0   :  { %v781_v0 = vmov 0.0   ;;  %vm782_vm0 = vmmov 0   ;;  %vm39_vm1 = vcmask 261120   ;;  %vm588_vm2 = vcmask 60416   ;;  %s935_s1 = inlined_call_operand.vmem [shape: bf16[9,32,8], index: 1, kind: input, shape index: {}]   ;;  %s936_s0 = inlined_call_operand.vmem [shape: bf16[9,8,32], index: 0, kind: input, shape index: {}]   ;;  %s937_s2 = inlined_call_operand.vmem [shape: f32[1,8], index: 2, kind: input, shape index: {}]   ;;  %s938_s3 = inlined_call_operand.vmem [shape: bf16[8,8], index: 3, kind: output, shape index: {}]  }
   0x1   :  { %689 = vmatprep.subr.bf16.mxu0 %v781_v0  ;;  %v763_v1 = vld [vmem:[%s935_s1 + $0x18] sm:$0xff]   ;;  %697 = vmatprep.subr.bf16.mxu1 %v781_v0  ;;  %v764_v2 = vld [vmem:[%s935_s1 + $0x8] sm:$0xff]   ;;  %v765_v3 = vld [vmem:[%s935_s1 + $0x10] sm:$0xff]  }
   0x2   :  { %693 = vmatprep.mubr.msk.bf16.mxu0 %vm782_vm0, %v781_v0  ;;  %701 = vmatprep.mubr.msk.bf16.mxu1 %vm782_vm0, %v781_v0  ;;  %v766_v4 = vld [vmem:[%s935_s1] sm:$0xff]   ;;  %v767_v7 = vld [vmem:[%s935_s1 + $0x28] sm:$0xff]   ;;  %v768_v8 = vld [vmem:[%s935_s1 + $0x38] sm:$0xff]  }
   0x3   :  { %690 = vmatpush3.bf16.msra.mxu0 %v763_v1  ;;  %698 = vmatpush3.bf16.msra.mxu1 %v764_v2  ;;  %v594_v5 = vld [vmem:[%s936_s0 + $0x4] sm:$0xf]  ;;  %v15_v6 = vld [vmem:[%s936_s0] sm:$0xf]  ;;  %v770_v10 = vld [vmem:[%s935_s1 + $0x30] sm:$0xff]  }
   0x4   :  { %691 = vmatprep.subr.bf16.mxu0 %v781_v0  ;;  %699 = vmatprep.subr.bf16.mxu1 %v781_v0  ;;  %v769_v9 = vld [vmem:[%s935_s1 + $0x20] sm:$0xff]   ;;  %v605_v11 = vld [vmem:[%s936_s0 + $0x8] sm:$0xf]  ;;  %v613_v12 = vld [vmem:[%s936_s0 + $0xc] sm:$0xf] }
   0x5   :  { %v771_v13 = vld [vmem:[%s935_s1 + $0x48] sm:$0xff]   ;;  %v772_v14 = vld [vmem:[%s935_s1 + $0x58] sm:$0xff]   ;;  %v773_v15 = vld [vmem:[%s935_s1 + $0x40] sm:$0xff]  }
   0x6   :  { %v774_v16 = vld [vmem:[%s935_s1 + $0x50] sm:$0xff]   ;;  %v775_v18 = vld [vmem:[%s935_s1 + $0x68] sm:$0xff]   ;;  %v776_v20 = vld [vmem:[%s935_s1 + $0x78] sm:$0xff]  }
   0x7   :  { %692 = vmatpush3.bf16.msra.mxu0 %v765_v3  ;;  %700 = vmatpush3.bf16.msra.mxu1 %v766_v4  ;;  %v621_v17 = vld [vmem:[%s936_s0 + $0x10] sm:$0xf]  ;;  %v629_v19 = vld [vmem:[%s936_s0 + $0x14] sm:$0xf]  ;;  %v777_v21 = vld [vmem:[%s935_s1 + $0x60] sm:$0xff]  }
   0x8   :  { %705 = vmatprep.subr.bf16.mxu0 %v781_v0  ;;  %713 = vmatprep.subr.bf16.mxu1 %v781_v0  ;;  %v778_v22 = vld [vmem:[%s935_s1 + $0x70] sm:$0xff]   ;;  %v637_v23 = vld [vmem:[%s936_s0 + $0x18] sm:$0xf]  ;;  %v779_v24 = vld [vmem:[%s935_s1 + $0x88] sm:$0xff]  }
   0x9   :  { %v645_v25 = vld [vmem:[%s936_s0 + $0x1c] sm:$0xf]  ;;  %v780_v26 = vld [vmem:[%s935_s1 + $0x80] sm:$0xff]  }
   0xa   :  { %694 = vmatmul.mubr.msk.bf16.vlgmr.msra.gmra.mxu0 %vm39_vm1, %v594_v5  ;;  %702 = vmatmul.mubr.msk.bf16.vlgmr.msra.gmra.mxu1 %vm39_vm1, %v15_v6  ;;  %v653_v27 = vld [vmem:[%s936_s0 + $0x20] sm:$0xf] }
   0xb   :  { %706 = vmatpush3.bf16.msra.mxu0 %v767_v7  ;;  %714 = vmatpush3.bf16.msra.mxu1 %v768_v8  ;;  %v661_v4 = vld [vmem:[%s937_s2] ss:$0 sm:$0xff] }
   0xc   :  { %707 = vmatprep.subr.bf16.mxu0 %v781_v0  ;;  %715 = vmatprep.subr.bf16.mxu1 %v781_v0 }
   0xd   :  { %709 = vmatprep.mubr.msk.bf16.mxu0 %vm782_vm0, %v781_v0  ;;  %717 = vmatprep.mubr.msk.bf16.mxu1 %vm782_vm0, %v781_v0 }
   0xf   :  { %708 = vmatpush3.bf16.msra.mxu0 %v769_v9  ;;  %716 = vmatpush3.bf16.msra.mxu1 %v770_v10 }
  0x10   :  { %721 = vmatprep.subr.bf16.mxu0 %v781_v0  ;;  %729 = vmatprep.subr.bf16.mxu1 %v781_v0 }
  0x12   :  { %710 = vmatmul.mubr.msk.bf16.vlgmr.msra.gmra.mxu0 %vm39_vm1, %v605_v11  ;;  %718 = vmatmul.mubr.msk.bf16.vlgmr.msra.gmra.mxu1 %vm39_vm1, %v613_v12 }
  0x13   :  { %722 = vmatpush3.bf16.msra.mxu0 %v771_v13  ;;  %730 = vmatpush3.bf16.msra.mxu1 %v772_v14 }
  0x14   :  { %723 = vmatprep.subr.bf16.mxu0 %v781_v0  ;;  %731 = vmatprep.subr.bf16.mxu1 %v781_v0 }
  0x15   :  { %725 = vmatprep.mubr.msk.bf16.mxu0 %vm782_vm0, %v781_v0  ;;  %733 = vmatprep.mubr.msk.bf16.mxu1 %vm782_vm0, %v781_v0 }
  0x17   :  { %724 = vmatpush3.bf16.msra.mxu0 %v773_v15  ;;  %732 = vmatpush3.bf16.msra.mxu1 %v774_v16 }
  0x18   :  { %737 = vmatprep.subr.bf16.mxu0 %v781_v0  ;;  %745 = vmatprep.subr.bf16.mxu1 %v781_v0 }
  0x1a   :  { %726 = vmatmul.mubr.msk.bf16.vlgmr.msra.gmra.mxu0 %vm39_vm1, %v621_v17  ;;  %734 = vmatmul.mubr.msk.bf16.vlgmr.msra.gmra.mxu1 %vm39_vm1, %v629_v19 }
  0x1b   :  { %738 = vmatpush3.bf16.msra.mxu0 %v775_v18  ;;  %746 = vmatpush3.bf16.msra.mxu1 %v776_v20 }
  0x1c   :  { %739 = vmatprep.subr.bf16.mxu0 %v781_v0  ;;  %747 = vmatprep.subr.bf16.mxu1 %v781_v0 }
  0x1d   :  { %741 = vmatprep.mubr.msk.bf16.mxu0 %vm782_vm0, %v781_v0  ;;  %749 = vmatprep.mubr.msk.bf16.mxu1 %vm782_vm0, %v781_v0 }
  0x1f   :  { %740 = vmatpush3.bf16.msra.mxu0 %v777_v21  ;;  %748 = vmatpush3.bf16.msra.mxu1 %v778_v22 }
  0x20   :  { %753 = vmatprep.subr.bf16.mxu0 %v781_v0 }
  0x22   :  { %742 = vmatmul.mubr.msk.bf16.vlgmr.msra.gmra.mxu0 %vm39_vm1, %v637_v23  ;;  %750 = vmatmul.mubr.msk.bf16.vlgmr.msra.gmra.mxu1 %vm39_vm1, %v645_v25 }
  0x23   :  { %754 = vmatpush3.bf16.msra.mxu0 %v779_v24  ;;  %757 = vmatprep.mubr.msk.bf16.mxu0 %vm782_vm0, %v781_v0 }
  0x24   :  { %755 = vmatprep.subr.bf16.mxu0 %v781_v0 }
  0x27   :  { %756 = vmatpush3.bf16.msra.mxu0 %v780_v26 }
  0x2a   :  { %758 = vmatmul.mubr.msk.bf16.vlgmr.msra.gmra.mxu0 %vm39_vm1, %v653_v27 }
  0xca   :  { %v77_v28 = vpop.f32.mrf.mxu0  ;;  %v132_v29 = vpop.f32.mrf.mxu1 }
  0xcb   :  { %v133_v41 = vadd.f32 %v132_v29, %v77_v28 }
  0xcc   :  { %v695_v30 = vpop.f32.mrf.mxu0  ;;  %v703_v31 = vpop.f32.mrf.mxu1 }
  0xce   :  { %v80_v32 = vpop.f32.mrf.mxu0  ;;  %v135_v33 = vpop.f32.mrf.mxu1 }
  0xd0   :  { %v696_v34 = vpop.f32.mrf.mxu0  ;;  %v704_v35 = vpop.f32.mrf.mxu1 }
  0xd2   :  { %v194_v36 = vpop.f32.mrf.mxu0  ;;  %v257_v37 = vpop.f32.mrf.mxu1 }
  0xd3   :  { %v200_v44 = vadd.f32 %v194_v36, %v133_v41 }
  0xd4   :  { %v711_v38 = vpop.f32.mrf.mxu0  ;;  %v719_v39 = vpop.f32.mrf.mxu1 }
  0xd5   :  { %v263_v49 = vadd.f32 %v257_v37, %v200_v44 }
  0xd6   :  { %v197_v40 = vpop.f32.mrf.mxu0  ;;  %v260_v42 = vpop.f32.mrf.mxu1 }
  0xd8   :  { %v712_v43 = vpop.f32.mrf.mxu0  ;;  %v720_v45 = vpop.f32.mrf.mxu1 }
  0xda   :  { %v320_v46 = vpop.f32.mrf.mxu0  ;;  %v383_v47 = vpop.f32.mrf.mxu1 }
  0xdb   :  { %v326_v52 = vadd.f32 %v320_v46, %v263_v49 }
  0xdc   :  { %v727_v48 = vpop.f32.mrf.mxu0  ;;  %v735_v50 = vpop.f32.mrf.mxu1 }
  0xdd   :  { %v389_v57 = vadd.f32 %v383_v47, %v326_v52 }
  0xde   :  { %v323_v51 = vpop.f32.mrf.mxu0  ;;  %v386_v53 = vpop.f32.mrf.mxu1 }
  0xe0   :  { %v728_v54 = vpop.f32.mrf.mxu0  ;;  %v736_v55 = vpop.f32.mrf.mxu1 }
  0xe2   :  { %v446_v56 = vpop.f32.mrf.mxu0  ;;  %v509_v58 = vpop.f32.mrf.mxu1 }
  0xe3   :  { %v452_v60 = vadd.f32 %v446_v56, %v389_v57 }
  0xe4   :  { %v743_v59 = vpop.f32.mrf.mxu0  ;;  %v751_v61 = vpop.f32.mrf.mxu1 }
  0xe5   :  { %v515_v1 = vadd.f32 %v509_v58, %v452_v60 }
  0xe6   :  { %v449_v62 = vpop.f32.mrf.mxu0  ;;  %v512_v63 = vpop.f32.mrf.mxu1 }
  0xe8   :  { %v744_v0 = vpop.f32.mrf.mxu0  ;;  %v752_v2 = vpop.f32.mrf.mxu1 }
  0xea   :  { %v572_v3 = vpop.f32.mrf.mxu0 }
  0xeb   :  { %v578_v5 = vadd.f32 %v572_v3, %v515_v1 }
  0xec   :  { %v759_v6 = vpop.f32.mrf.mxu0 }
  0xed   :  { %v586_v7 = vadd.f32 %v661_v4, %v578_v5 }
  0xee   :  { %v575_v8 = vpop.f32.mrf.mxu0 }
  0xef   :  { %v587_v9 = vpack.c.bf16 %v586_v7, %v586_v7 }
  0xf0   :  { %v760_v10 = vpop.f32.mrf.mxu0 }
  0xf1   :  { %589 = vst.msk [vmem:[%s938_s3] sm:$0xf] %vm588_vm2, %v587_v9 }

// kernel: densenet_forward.18
= control target key start
LH: loop header
LB: loop body
LE: loop exit
PB: predicated region body
PF: predicated region fallthrough
CT: control target
= control target key end

     0   :  { %vm101_vm0 = vcmask 1043456   ;;  %v178_v0 = vmov 0.0   ;;  %vm179_vm1 = vmmov 0   ;;  %vm97_vm2 = vcmask 326656   ;;  %s258_s6 = inlined_call_operand.vmem [shape: bf16[1,40,40], index: 6, kind: input, shape index: {}]   ;;  %s259_s2 = inlined_call_operand.vmem [shape: bf16[1,8,40], index: 2, kind: input, shape index: {}]   ;;  %s260_s0 = inlined_call_operand.vmem [shape: f32[1,40], index: 0, kind: input, shape index: {}]   ;;  %s261_s3 = inlined_call_operand.vmem [shape: bf16[1,8,40], index: 3, kind: input, shape index: {}]   ;;  %s262_s1 = inlined_call_operand.vmem [shape: f32[1,40], index: 1, kind: input, shape index: {}]   ;;  %s263_s4 = inlined_call_operand.vmem [shape: bf16[1,8,40], index: 4, kind: input, shape index: {}]   ;;  %s264_s5 = inlined_call_operand.vmem [shape: bf16[1,8,40], index: 5, kind: input, shape index: {}]   ;;  %s265_s7 = inlined_call_operand.vmem [shape: f32[1,40], index: 7, kind: input, shape index: {}]   ;;  %s266_s8 = inlined_call_operand.vmem [shape: bf16[8,40], index: 8, kind: output, shape index: {}]  }
   0x1   :  { %163 = vmatprep.subr.bf16.mxu0 %v178_v0  ;;  %v175_v1 = vld [vmem:[%s258_s6 + $0x10] ss:$0 sps:$4 sm:$0xff]   ;;  %169 = vmatprep.mubr.msk.bf16.mxu0 %vm179_vm1, %v178_v0  ;;  %v30_v3 = vld [vmem:[%s259_s2] sm:$0xf]  ;;  %v176_v4 = vld [vmem:[%s258_s6 + $0x8] sm:$0xff]   ;;  %vm146_vm3 = vcmask 322560  }
   0x2   :  { %v103_v2 = vsel %vm101_vm0, %v175_v1, 0  ;;  %v31_v5 = vunpack.c.l.bf16 %v30_v3  ;;  %v152_v6 = vld [vmem:[%s260_s0] ss:$0 sm:$0xff] }
   0x3   :  { %164 = vmatpush3.bf16.msra.mxu0 %v103_v2  ;;  %v50_v7 = vld [vmem:[%s261_s3] sm:$0xf] }
   0x4   :  { %165 = vmatprep.subr.bf16.mxu0 %v178_v0  ;;  %v153_v8 = vld [vmem:[%s262_s1] ss:$0 sm:$0xff]  ;;  %v51_v9 = vunpack.c.l.bf16 %v50_v7  ;;  %v39_v12 = vmul.f32 %v152_v6, %v31_v5 }
   0x5   :  { %v56_v10 = vld [vmem:[%s263_s4] sm:$0xf] }
   0x6   :  { %v62_v11 = vld [vmem:[%s264_s5] sm:$0xf]  ;;  %v57_v13 = vunpack.c.l.bf16 %v56_v10  ;;  %v52_v15 = vmul.f32 %v152_v6, %v51_v9  ;;  %v47_v17 = vadd.f32 %v153_v8, %v39_v12 }
   0x7   :  { %v63_v14 = vunpack.c.l.bf16 %v62_v11  ;;  %166 = vmatpush3.bf16.msra.mxu0 %v176_v4  ;;  %v177_v16 = vld [vmem:[%s258_s6] sm:$0xff]  }
   0x8   :  { %v58_v18 = vmul.f32 %v152_v6, %v57_v13  ;;  %167 = vmatprep.subr.bf16.mxu0 %v178_v0  ;;  %v53_v20 = vadd.f32 %v153_v8, %v52_v15  ;;  %v48_v21 = vmax.f32 %v47_v17, 0.0  ;;  %v154_v32 = vld [vmem:[%s265_s7] ss:$0 sm:$0xff] }
   0x9   :  { %v64_v19 = vmul.f32 %v152_v6, %v63_v14 }
   0xa   :  { %v59_v22 = vadd.f32 %v153_v8, %v58_v18  ;;  %v54_v24 = vmax.f32 %v53_v20, 0.0 }
   0xb   :  { %v65_v23 = vadd.f32 %v153_v8, %v64_v19  ;;  %168 = vmatpush3.bf16.msra.mxu0 %v177_v16 }
   0xc   :  { %v60_v25 = vmax.f32 %v59_v22, 0.0  ;;  %v55_v26 = vadd.f32 %v54_v24, %v48_v21 }
   0xd   :  { %v66_v27 = vmax.f32 %v65_v23, 0.0 }
   0xe   :  { %v61_v28 = vadd.f32 %v60_v25, %v55_v26 }
  0x10   :  { %v67_v29 = vadd.f32 %v66_v27, %v61_v28 }
  0x12   :  { %v68_v30 = vmul.f32 0.25, %v67_v29 }
  0x14   :  { %v69_v31 = vpack.c.bf16 %v68_v30, %v68_v30 }
  0x16   :  { %170 = vmatmul.mubr.msk.bf16.vlgmr.msra.gmra.mxu0 %vm97_vm2, %v69_v31 }
  0xd6   :  { %v139_v33 = vpop.f32.mrf.mxu0 }
  0xd7   :  { %v140_v34 = vadd.f32 %v154_v32, %v139_v33 }
  0xd8   :  { %v171_v35 = vpop.f32.mrf.mxu0 }
  0xd9   :  { %v145_v36 = vpack.c.bf16 %v140_v34, %v140_v34 }
  0xda   :  { %v142_v37 = vpop.f32.mrf.mxu0 }
  0xdb   :  { %147 = vst.msk [vmem:[%s266_s8] sm:$0xf] %vm146_vm3, %v145_v36 }
  0xdc   :  { %v172_v38 = vpop.f32.mrf.mxu0 }

// kernel: densenet_forward.20
= control target key start
LH: loop header
LB: loop body
LE: loop exit
PB: predicated region body
PF: predicated region fallthrough
CT: control target
= control target key end

     0   :  { %v16_v0 = vlaneseq  ;;  %vm24_vm0 = vcmask 1041409   ;;  %vm27_vm1 = vcmask 386048   ;;  %s52_s0 = inlined_call_operand.vmem [shape: bf16[2,1,48], index: 0, kind: input, shape index: {}]   ;;  %s53_s1 = inlined_call_operand.vmem [shape: f32[2,48], index: 1, kind: output, shape index: {}]  }
   0x1   :  { %v8_v1 = vld [vmem:[%s52_s0] sm:$0x1]  ;;  %v9_v2 = vld [vmem:[%s52_s0 + $0x1] sm:$0x1] }
   0x2   :  { %v10_v3 = vunpack.c.l.bf16 %v8_v1  ;;  %v11_v4 = vunpack.c.l.bf16 %v9_v2  ;;  %v17_v5 = vshrl.u32 %v16_v0, 7 }
   0x4   :  { %v18_v6 = vsub.s32 0, %v17_v5 }
   0x6   :  { %v19_v7 = vrot.slane %v10_v3, %v18_v6  ;;  %v23_v8 = vrot.slane %v11_v4, %v18_v6 }
   0x8   :  { %v25_v9 = vsel %vm24_vm0, %v23_v8, %v19_v7 }
   0x9   :  { %28 = vst.msk [vmem:[%s53_s1] sm:$0x3] %vm27_vm1, %v25_v9 }

// kernel: densenet_forward.21
= control target key start
LH: loop header
LB: loop body
LE: loop exit
PB: predicated region body
PF: predicated region fallthrough
CT: control target
= control target key end

     0   :  { %v121_v0 = vmov 0.0   ;;  %vm122_vm0 = vmmov 0   ;;  %vm47_vm1 = vcmask 392192   ;;  %vm91_vm2 = vcmask 80896   ;;  %s161_s1 = inlined_call_operand.vmem [shape: bf16[1,48,10], index: 1, kind: input, shape index: {}]   ;;  %s162_s0 = inlined_call_operand.vmem [shape: bf16[1,8,48], index: 0, kind: input, shape index: {}]   ;;  %s163_s2 = inlined_call_operand.vmem [shape: f32[1,10], index: 2, kind: input, shape index: {}]   ;;  %s164_s3 = inlined_call_operand.vmem [shape: f32[8,10], index: 3, kind: output, shape index: {}]  }
   0x1   :  { %106 = vmatprep.subr.bf16.mxu0 %v121_v0  ;;  %v118_v1 = vld [vmem:[%s161_s1 + $0x10] sm:$0xff]   ;;  %112 = vmatprep.mubr.msk.bf16.mxu0 %vm122_vm0, %v121_v0  ;;  %v119_v2 = vld [vmem:[%s161_s1 + $0x8] sm:$0xff]   ;;  %v120_v3 = vld [vmem:[%s161_s1] sm:$0xff]  }
   0x2   :  { %107 = vmatpush3.bf16.msra.mxu0 %v118_v1  ;;  %v15_v4 = vld [vmem:[%s162_s0] sm:$0xf] }
   0x3   :  { %108 = vmatprep.subr.bf16.mxu0 %v121_v0  ;;  %v97_v5 = vld [vmem:[%s163_s2] ss:$0 sm:$0xff] }
   0x6   :  { %109 = vmatpush3.bf16.msra.mxu0 %v119_v2 }
   0x7   :  { %110 = vmatprep.subr.bf16.mxu0 %v121_v0 }
   0xa   :  { %111 = vmatpush3.bf16.msra.mxu0 %v120_v3 }
   0xd   :  { %113 = vmatmul.mubr.msk.bf16.vlgmr.msra.gmra.mxu0 %vm47_vm1, %v15_v4 }
  0xcd   :  { %v85_v6 = vpop.f32.mrf.mxu0 }
  0xce   :  { %v86_v7 = vadd.f32 %v97_v5, %v85_v6 }
  0xcf   :  { %v114_v8 = vpop.f32.mrf.mxu0 }
  0xd0   :  { %92 = vst.msk [vmem:[%s164_s3] sm:$0xff] %vm91_vm2, %v86_v7 }
  0xd1   :  { %v88_v9 = vpop.f32.mrf.mxu0 }
  0xd3   :  { %v115_v10 = vpop.f32.mrf.mxu0 }

// kernel: densenet_forward.19
= control target key start
LH: loop header
LB: loop body
LE: loop exit
PB: predicated region body
PF: predicated region fallthrough
CT: control target
= control target key end

     0   :  { %vm48_vm0 = vcmask 1043456   ;;  %v898_v0 = vmov 0.0   ;;  %vm899_vm1 = vmmov 0   ;;  %vm44_vm2 = vcmask 326656   ;;  %s1097_s1 = inlined_call_operand.vmem [shape: bf16[9,40,8], index: 1, kind: input, shape index: {}]   ;;  %s1098_s0 = inlined_call_operand.vmem [shape: bf16[9,8,40], index: 0, kind: input, shape index: {}]   ;;  %s1099_s2 = inlined_call_operand.vmem [shape: f32[1,8], index: 2, kind: input, shape index: {}]   ;;  %s1100_s3 = inlined_call_operand.vmem [shape: bf16[8,8], index: 3, kind: output, shape index: {}]  }
   0x1   :  { %779 = vmatprep.subr.bf16.mxu0 %v898_v0  ;;  %v871_v1 = vld [vmem:[%s1097_s1 + $0x24] ss:$0 sps:$4 sm:$0xff]   ;;  %789 = vmatprep.subr.bf16.mxu1 %v898_v0  ;;  %v872_v2 = vld [vmem:[%s1097_s1 + $0x10] ss:$0 sps:$4 sm:$0xff]   ;;  %v873_v5 = vld [vmem:[%s1097_s1 + $0x1c] sm:$0xff]   ;;  %vm652_vm3 = vcmask 60416  }
   0x2   :  { %785 = vmatprep.mubr.msk.bf16.mxu0 %vm899_vm1, %v898_v0  ;;  %795 = vmatprep.mubr.msk.bf16.mxu1 %vm899_vm1, %v898_v0  ;;  %v50_v3 = vsel %vm48_vm0, %v871_v1, 0  ;;  %v111_v4 = vsel %vm48_vm0, %v872_v2, 0  ;;  %v874_v6 = vld [vmem:[%s1097_s1 + $0x8] sm:$0xff]   ;;  %v875_v7 = vld [vmem:[%s1097_s1 + $0x14] sm:$0xff]   ;;  %v876_v8 = vld [vmem:[%s1097_s1] sm:$0xff]  }
   0x3   :  { %780 = vmatpush3.bf16.msra.mxu0 %v50_v3  ;;  %790 = vmatpush3.bf16.msra.mxu1 %v111_v4  ;;  %v877_v9 = vld [vmem:[%s1097_s1 + $0x38] ss:$0 sps:$4 sm:$0xff]   ;;  %v878_v10 = vld [vmem:[%s1097_s1 + $0x4c] ss:$0 sps:$4 sm:$0xff]   ;;  %v658_v11 = vld [vmem:[%s1098_s0 + $0x4] sm:$0xf] }
   0x4   :  { %781 = vmatprep.subr.bf16.mxu0 %v898_v0  ;;  %791 = vmatprep.subr.bf16.mxu1 %v898_v0  ;;  %v15_v12 = vld [vmem:[%s1098_s0] sm:$0xf]  ;;  %v180_v13 = vsel %vm48_vm0, %v877_v9, 0  ;;  %v250_v14 = vsel %vm48_vm0, %v878_v10, 0  ;;  %v879_v15 = vld [vmem:[%s1097_s1 + $0x30] sm:$0xff]   ;;  %v880_v16 = vld [vmem:[%s1097_s1 + $0x44] sm:$0xff]  }
   0x5   :  { %v881_v17 = vld [vmem:[%s1097_s1 + $0x28] sm:$0xff]   ;;  %v882_v18 = vld [vmem:[%s1097_s1 + $0x3c] sm:$0xff]   ;;  %v884_v20 = vld [vmem:[%s1097_s1 + $0x74] ss:$0 sps:$4 sm:$0xff]  }
   0x6   :  { %v883_v19 = vld [vmem:[%s1097_s1 + $0x60] ss:$0 sps:$4 sm:$0xff]   ;;  %v672_v21 = vld [vmem:[%s1098_s0 + $0x8] sm:$0xf]  ;;  %v682_v23 = vld [vmem:[%s1098_s0 + $0xc] sm:$0xf] }
   0x7   :  { %782 = vmatpush3.bf16.msra.mxu0 %v873_v5  ;;  %792 = vmatpush3.bf16.msra.mxu1 %v874_v6  ;;  %v320_v22 = vsel %vm48_vm0, %v883_v19, 0  ;;  %v390_v24 = vsel %vm48_vm0, %v884_v20, 0  ;;  %v885_v25 = vld [vmem:[%s1097_s1 + $0x58] sm:$0xff]   ;;  %v886_v26 = vld [vmem:[%s1097_s1 + $0x6c] sm:$0xff]   ;;  %v888_v28 = vld [vmem:[%s1097_s1 + $0x64] sm:$0xff]  }
   0x8   :  { %783 = vmatprep.subr.bf16.mxu0 %v898_v0  ;;  %793 = vmatprep.subr.bf16.mxu1 %v898_v0  ;;  %v887_v27 = vld [vmem:[%s1097_s1 + $0x50] sm:$0xff]   ;;  %v889_v29 = vld [vmem:[%s1097_s1 + $0x88] ss:$0 sps:$4 sm:$0xff]   ;;  %v890_v30 = vld [vmem:[%s1097_s1 + $0x9c] ss:$0 sps:$4 sm:$0xff]  }
   0x9   :  { %v692_v31 = vld [vmem:[%s1098_s0 + $0x10] sm:$0xf]  ;;  %v460_v32 = vsel %vm48_vm0, %v889_v29, 0  ;;  %v702_v33 = vld [vmem:[%s1098_s0 + $0x14] sm:$0xf]  ;;  %v530_v34 = vsel %vm48_vm0, %v890_v30, 0 }
   0xa   :  { %v891_v35 = vld [vmem:[%s1097_s1 + $0x80] sm:$0xff]   ;;  %v892_v36 = vld [vmem:[%s1097_s1 + $0x94] sm:$0xff]   ;;  %v894_v38 = vld [vmem:[%s1097_s1 + $0x8c] sm:$0xff]  }
   0xb   :  { %784 = vmatpush3.bf16.msra.mxu0 %v875_v7  ;;  %794 = vmatpush3.bf16.msra.mxu1 %v876_v8  ;;  %v893_v37 = vld [vmem:[%s1097_s1 + $0x78] sm:$0xff]   ;;  %v895_v39 = vld [vmem:[%s1097_s1 + $0xb0] ss:$0 sps:$4 sm:$0xff]   ;;  %v896_v43 = vld [vmem:[%s1097_s1 + $0xa8] sm:$0xff]  }
   0xc   :  { %799 = vmatprep.subr.bf16.mxu0 %v898_v0  ;;  %809 = vmatprep.subr.bf16.mxu1 %v898_v0  ;;  %v712_v40 = vld [vmem:[%s1098_s0 + $0x18] sm:$0xf]  ;;  %v600_v41 = vsel %vm48_vm0, %v895_v39, 0  ;;  %v722_v42 = vld [vmem:[%s1098_s0 + $0x1c] sm:$0xf]  ;;  %v897_v44 = vld [vmem:[%s1097_s1 + $0xa0] sm:$0xff]  }
   0xd   :  { %v732_v45 = vld [vmem:[%s1098_s0 + $0x20] sm:$0xf] }
   0xe   :  { %786 = vmatmul.mubr.msk.bf16.vlgmr.msra.gmra.mxu0 %vm44_vm2, %v658_v11  ;;  %796 = vmatmul.mubr.msk.bf16.vlgmr.msra.gmra.mxu1 %vm44_vm2, %v15_v12 }
   0xf   :  { %800 = vmatpush3.bf16.msra.mxu0 %v180_v13  ;;  %810 = vmatpush3.bf16.msra.mxu1 %v250_v14 }
  0x10   :  { %801 = vmatprep.subr.bf16.mxu0 %v898_v0  ;;  %811 = vmatprep.subr.bf16.mxu1 %v898_v0 }
  0x11   :  { %805 = vmatprep.mubr.msk.bf16.mxu0 %vm899_vm1, %v898_v0  ;;  %815 = vmatprep.mubr.msk.bf16.mxu1 %vm899_vm1, %v898_v0 }
  0x13   :  { %802 = vmatpush3.bf16.msra.mxu0 %v879_v15  ;;  %812 = vmatpush3.bf16.msra.mxu1 %v880_v16 }
  0x14   :  { %803 = vmatprep.subr.bf16.mxu0 %v898_v0  ;;  %813 = vmatprep.subr.bf16.mxu1 %v898_v0 }
  0x17   :  { %804 = vmatpush3.bf16.msra.mxu0 %v881_v17  ;;  %814 = vmatpush3.bf16.msra.mxu1 %v882_v18 }
  0x18   :  { %819 = vmatprep.subr.bf16.mxu0 %v898_v0  ;;  %829 = vmatprep.subr.bf16.mxu1 %v898_v0 }
  0x1a   :  { %806 = vmatmul.mubr.msk.bf16.vlgmr.msra.gmra.mxu0 %vm44_vm2, %v672_v21  ;;  %816 = vmatmul.mubr.msk.bf16.vlgmr.msra.gmra.mxu1 %vm44_vm2, %v682_v23 }
  0x1b   :  { %820 = vmatpush3.bf16.msra.mxu0 %v320_v22  ;;  %830 = vmatpush3.bf16.msra.mxu1 %v390_v24  ;;  %v742_v22 = vld [vmem:[%s1099_s2] ss:$0 sm:$0xff] }
  0x1c   :  { %821 = vmatprep.subr.bf16.mxu0 %v898_v0  ;;  %831 = vmatprep.subr.bf16.mxu1 %v898_v0 }
  0x1d   :  { %825 = vmatprep.mubr.msk.bf16.mxu0 %vm899_vm1, %v898_v0  ;;  %835 = vmatprep.mubr.msk.bf16.mxu1 %vm899_vm1, %v898_v0 }
  0x1f   :  { %822 = vmatpush3.bf16.msra.mxu0 %v885_v25  ;;  %832 = vmatpush3.bf16.msra.mxu1 %v886_v26 }
  0x20   :  { %823 = vmatprep.subr.bf16.mxu0 %v898_v0  ;;  %833 = vmatprep.subr.bf16.mxu1 %v898_v0 }
  0x23   :  { %824 = vmatpush3.bf16.msra.mxu0 %v887_v27  ;;  %834 = vmatpush3.bf16.msra.mxu1 %v888_v28 }
  0x24   :  { %839 = vmatprep.subr.bf16.mxu0 %v898_v0  ;;  %849 = vmatprep.subr.bf16.mxu1 %v898_v0 }
  0x26   :  { %826 = vmatmul.mubr.msk.bf16.vlgmr.msra.gmra.mxu0 %vm44_vm2, %v692_v31  ;;  %836 = vmatmul.mubr.msk.bf16.vlgmr.msra.gmra.mxu1 %vm44_vm2, %v702_v33 }
  0x27   :  { %840 = vmatpush3.bf16.msra.mxu0 %v460_v32  ;;  %850 = vmatpush3.bf16.msra.mxu1 %v530_v34 }
  0x28   :  { %841 = vmatprep.subr.bf16.mxu0 %v898_v0  ;;  %851 = vmatprep.subr.bf16.mxu1 %v898_v0 }
  0x29   :  { %845 = vmatprep.mubr.msk.bf16.mxu0 %vm899_vm1, %v898_v0  ;;  %855 = vmatprep.mubr.msk.bf16.mxu1 %vm899_vm1, %v898_v0 }
  0x2b   :  { %842 = vmatpush3.bf16.msra.mxu0 %v891_v35  ;;  %852 = vmatpush3.bf16.msra.mxu1 %v892_v36 }
  0x2c   :  { %843 = vmatprep.subr.bf16.mxu0 %v898_v0  ;;  %853 = vmatprep.subr.bf16.mxu1 %v898_v0 }
  0x2f   :  { %844 = vmatpush3.bf16.msra.mxu0 %v893_v37  ;;  %854 = vmatpush3.bf16.msra.mxu1 %v894_v38 }
  0x30   :  { %859 = vmatprep.subr.bf16.mxu0 %v898_v0 }
  0x32   :  { %846 = vmatmul.mubr.msk.bf16.vlgmr.msra.gmra.mxu0 %vm44_vm2, %v712_v40  ;;  %856 = vmatmul.mubr.msk.bf16.vlgmr.msra.gmra.mxu1 %vm44_vm2, %v722_v42 }
  0x33   :  { %860 = vmatpush3.bf16.msra.mxu0 %v600_v41  ;;  %865 = vmatprep.mubr.msk.bf16.mxu0 %vm899_vm1, %v898_v0 }
  0x34   :  { %861 = vmatprep.subr.bf16.mxu0 %v898_v0 }
  0x37   :  { %862 = vmatpush3.bf16.msra.mxu0 %v896_v43 }
  0x38   :  { %863 = vmatprep.subr.bf16.mxu0 %v898_v0 }
  0x3b   :  { %864 = vmatpush3.bf16.msra.mxu0 %v897_v44 }
  0x3e   :  { %866 = vmatmul.mubr.msk.bf16.vlgmr.msra.gmra.mxu0 %vm44_vm2, %v732_v45 }
  0xce   :  { %v86_v46 = vpop.f32.mrf.mxu0  ;;  %v147_v47 = vpop.f32.mrf.mxu1 }
  0xcf   :  { %v148_v3 = vadd.f32 %v147_v47, %v86_v46 }
  0xd0   :  { %v787_v48 = vpop.f32.mrf.mxu0  ;;  %v797_v49 = vpop.f32.mrf.mxu1 }
  0xd2   :  { %v89_v50 = vpop.f32.mrf.mxu0  ;;  %v150_v51 = vpop.f32.mrf.mxu1 }
  0xd4   :  { %v788_v52 = vpop.f32.mrf.mxu0  ;;  %v798_v53 = vpop.f32.mrf.mxu1 }
  0xda   :  { %v216_v54 = vpop.f32.mrf.mxu0  ;;  %v286_v55 = vpop.f32.mrf.mxu1 }
  0xdb   :  { %v222_v6 = vadd.f32 %v216_v54, %v148_v3 }
  0xdc   :  { %v807_v56 = vpop.f32.mrf.mxu0  ;;  %v817_v57 = vpop.f32.mrf.mxu1 }
  0xdd   :  { %v292_v8 = vadd.f32 %v286_v55, %v222_v6 }
  0xde   :  { %v219_v58 = vpop.f32.mrf.mxu0  ;;  %v289_v59 = vpop.f32.mrf.mxu1 }
  0xe0   :  { %v808_v60 = vpop.f32.mrf.mxu0  ;;  %v818_v61 = vpop.f32.mrf.mxu1 }
  0xe6   :  { %v356_v62 = vpop.f32.mrf.mxu0  ;;  %v426_v63 = vpop.f32.mrf.mxu1 }
  0xe7   :  { %v362_v10 = vadd.f32 %v356_v62, %v292_v8 }
  0xe8   :  { %v827_v0 = vpop.f32.mrf.mxu0  ;;  %v837_v1 = vpop.f32.mrf.mxu1 }
  0xe9   :  { %v432_v15 = vadd.f32 %v426_v63, %v362_v10 }
  0xea   :  { %v359_v2 = vpop.f32.mrf.mxu0  ;;  %v429_v4 = vpop.f32.mrf.mxu1 }
  0xec   :  { %v828_v5 = vpop.f32.mrf.mxu0  ;;  %v838_v7 = vpop.f32.mrf.mxu1 }
  0xf2   :  { %v496_v9 = vpop.f32.mrf.mxu0  ;;  %v566_v11 = vpop.f32.mrf.mxu1 }
  0xf3   :  { %v502_v18 = vadd.f32 %v496_v9, %v432_v15 }
  0xf4   :  { %v847_v12 = vpop.f32.mrf.mxu0  ;;  %v857_v13 = vpop.f32.mrf.mxu1 }
  0xf5   :  { %v572_v20 = vadd.f32 %v566_v11, %v502_v18 }
  0xf6   :  { %v499_v14 = vpop.f32.mrf.mxu0  ;;  %v569_v16 = vpop.f32.mrf.mxu1 }
  0xf8   :  { %v848_v17 = vpop.f32.mrf.mxu0  ;;  %v858_v19 = vpop.f32.mrf.mxu1 }
  0xfe   :  { %v636_v21 = vpop.f32.mrf.mxu0 }
  0xff   :  { %v642_v23 = vadd.f32 %v636_v21, %v572_v20 }
 0x100   :  { %v867_v24 = vpop.f32.mrf.mxu0 }
 0x101   :  { %v650_v25 = vadd.f32 %v742_v22, %v642_v23 }
 0x102   :  { %v639_v26 = vpop.f32.mrf.mxu0 }
 0x103   :  { %v651_v27 = vpack.c.bf16 %v650_v25, %v650_v25 }
 0x104   :  { %v868_v28 = vpop.f32.mrf.mxu0 }
 0x105   :  { %653 = vst.msk [vmem:[%s1100_s3] sm:$0xf] %vm652_vm3, %v651_v27 }

</bundles_post_ra>
